<compile_context>
chip_gen: v5e
topology: v5e:2x2
jax: 0.10.0
libtpu: 0.0.40
codegen_flags: <defaults>
</compile_context>

<pallas_src>
import math
from functools import partial

import jax
import jax.numpy as jnp
from jax.experimental import pallas as pl
from jax.experimental.pallas import tpu as pltpu

_VMEM_LIMIT = 48 * 1024 * 1024   # > v5e 16 MiB scoped default, < v7x 64 MiB physical


# ----------------------------- tiling helpers --------------------------------

def _tile_mn(dim, target):
    """M/N tile: full dim if small, else the target; cdiv grid + masked boundary
    writes handle the remainder."""
    return dim if dim <= target else target


def _tile_k(dim):
    """K tile must exactly divide K.  Full slab when it fits comfortably,
    otherwise the largest 128-multiple divisor <= 1024."""
    if dim <= 1536:
        return dim
    for c in (1024, 896, 768, 640, 512, 384, 256, 128):
        if dim % c == 0:
            return c
    return dim


def _pick_head_group(heads, dh, seq_len, batch):
    """Largest lane-aligned (G*dh % 128 == 0) head group that fits the per-step
    VMEM budget; keeps >= 2 parallel grid steps when batch == 1 (v7x 2 TCs)."""
    cands = [g for g in range(1, heads + 1)
             if heads % g == 0 and (g * dh) % 128 == 0]
    if not cands:
        return heads
    budget = 8 * 1024 * 1024
    best = cands[0]
    for g in cands:
        qkvo = 4 * 2 * seq_len * g * dh * 2      # q/k/v/out blocks, 2-buffered, bf16
        scores = g * seq_len * seq_len * 4       # f32 score/prob temporaries
        if qkvo + scores <= budget:
            best = g
    if batch == 1 and best == heads and heads > 1:
        smaller = [g for g in cands if g < heads]
        if smaller:
            best = smaller[-1]
    return best


def _maybe_deep_buffered_w_spec(tk, tn, mt, kt, nt):
    """Weight BlockSpec; 3-deep buffering in the weight-streaming regime
    (single M tile, many K*N steps) to hide DMA latency (mainly v5e)."""
    if mt == 1 and kt * nt >= 4:
        return pl.BlockSpec((tk, tn), lambda i, j, k: (k, j),
                            pipeline_mode=pl.Buffered(3))
    return pl.BlockSpec((tk, tn), lambda i, j, k: (k, j))


# ----------------------------- Pallas kernels --------------------------------

def _matmul_kernel(x_ref, w_ref, o_ref, acc_ref):
    @pl.when(pl.program_id(2) == 0)
    def _():
        acc_ref[...] = jnp.zeros_like(acc_ref)

    acc_ref[...] += jnp.dot(x_ref[...].astype(jnp.bfloat16), w_ref[...],
                            preferred_element_type=jnp.float32)

    @pl.when(pl.program_id(2) == pl.num_programs(2) - 1)
    def _():
        o_ref[...] = acc_ref[...].astype(o_ref.dtype)


def _linear_residual_kernel(x_ref, w_ref, b_ref, res_ref, o_ref, acc_ref):
    @pl.when(pl.program_id(2) == 0)
    def _():
        acc_ref[...] = jnp.zeros_like(acc_ref)

    acc_ref[...] += jnp.dot(x_ref[...].astype(jnp.bfloat16), w_ref[...],
                            preferred_element_type=jnp.float32)

    @pl.when(pl.program_id(2) == pl.num_programs(2) - 1)
    def _():
        # bias + residual add stay f32; downcast only on store
        o_ref[...] = (acc_ref[...]
                      + b_ref[...].astype(jnp.float32)
                      + res_ref[...].astype(jnp.float32)).astype(o_ref.dtype)


def _ln_linear_kernel(x_ref, g_ref, bln_ref, w_ref, b_ref, o_ref, xn_ref,
                      *, activation):
    # LayerNorm (f32) + bf16 cast computed ONCE per M tile (j == 0) into VMEM
    # scratch; reused for every N tile (j is the innermost "arbitrary" axis).
    @pl.when(pl.program_id(1) == 0)
    def _():
        x = x_ref[...].astype(jnp.float32)
        mu = jnp.mean(x, axis=-1, keepdims=True)
        var = jnp.mean((x - mu) ** 2, axis=-1, keepdims=True)
        xn = (x - mu) * jax.lax.rsqrt(var + 1e-5)
        xn = xn * g_ref[...].astype(jnp.float32) + bln_ref[...].astype(jnp.float32)
        xn_ref[...] = xn.astype(jnp.bfloat16)

    acc = jnp.dot(xn_ref[...], w_ref[...], preferred_element_type=jnp.float32)
    acc = acc + b_ref[...].astype(jnp.float32)
    if activation == "quickgelu":
        acc = acc * jax.nn.sigmoid(1.702 * acc)
    o_ref[...] = acc.astype(o_ref.dtype)


def _embed_ln_kernel(feat_ref, cls_ref, pos0_ref, posr_ref, g_ref, b_ref, o_ref):
    # Fused: [class token ; patch features] + positional embedding -> ln_pre.
    # LayerNorm is row-wise, so cls row and patch rows are normalized / stored
    # separately (no in-kernel concatenate relayout).
    g = g_ref[...].astype(jnp.float32)
    b = b_ref[...].astype(jnp.float32)

    def _ln(v):
        mu = jnp.mean(v, axis=-1, keepdims=True)
        var = jnp.mean((v - mu) ** 2, axis=-1, keepdims=True)
        return (v - mu) * jax.lax.rsqrt(var + 1e-5) * g + b

    x0 = cls_ref[...].astype(jnp.float32) + pos0_ref[...].astype(jnp.float32)  # (1, W)
    xp = feat_ref[0].astype(jnp.float32) + posr_ref[...].astype(jnp.float32)   # (Lp, W)
    o_ref[0, 0:1, :] = _ln(x0).astype(o_ref.dtype)
    o_ref[0, 1:, :] = _ln(xp).astype(o_ref.dtype)


def _attention_kernel(q_ref, k_ref, v_ref, o_ref, *, heads_per_blk, head_dim):
    # One (batch, head-group) pair per grid step.  Blocks are (1, L, G*dh) lane
    # windows of the (B, L, 3W) QKV tensor.  1/sqrt(dh) is folded into the Q
    # projection weights at prepare_params time.  Softmax stays f32 (v5e-safe).
    # Each head's PV result is stored directly into its lane window (no concat).
    G, dh = heads_per_blk, head_dim
    qb = q_ref[0]                                           # (L, G*dh) bf16
    kb = k_ref[0]
    vb = v_ref[0]
    for h in range(G):
        lo = h * dh
        q = qb[:, lo:lo + dh].astype(jnp.bfloat16)
        k = kb[:, lo:lo + dh].astype(jnp.bfloat16)
        v = vb[:, lo:lo + dh].astype(jnp.bfloat16)
        s = jax.lax.dot_general(q, k, (((1,), (1,)), ((), ())),
                                preferred_element_type=jnp.float32)
        s = s - jnp.max(s, axis=-1, keepdims=True)
        p = jnp.exp(s)
        p = p * pl.reciprocal(jnp.sum(p, axis=-1, keepdims=True), approx=True)
        o = jnp.dot(p.astype(jnp.bfloat16), v, preferred_element_type=jnp.float32)
        o_ref[0, :, lo:lo + dh] = o.astype(o_ref.dtype)


# ----------------------------- wrappers ---------------------------------------

def matmul_bf16(x, w_bf16, out_dtype=jnp.bfloat16):
    M, K = x.shape
    _, N = w_bf16.shape
    TM, TN, TK = _tile_mn(M, 512), _tile_mn(N, 1024), _tile_k(K)
    mt, nt, kt = pl.cdiv(M, TM), pl.cdiv(N, TN), K // TK
    return pl.pallas_call(
        _matmul_kernel,
        out_shape=jax.ShapeDtypeStruct((M, N), out_dtype),
        grid=(mt, nt, kt),
        in_specs=[pl.BlockSpec((TM, TK), lambda i, j, k: (i, k)),
                  _maybe_deep_buffered_w_spec(TK, TN, mt, kt, nt)],
        out_specs=pl.BlockSpec((TM, TN), lambda i, j, k: (i, j)),
        scratch_shapes=[pltpu.VMEM((TM, TN), jnp.float32)],
        compiler_params=pltpu.CompilerParams(
            dimension_semantics=("parallel", "parallel", "arbitrary"),
            vmem_limit_bytes=_VMEM_LIMIT),
        cost_estimate=pl.CostEstimate(
            flops=2 * M * N * K, transcendentals=0,
            bytes_accessed=(x.size * x.dtype.itemsize + w_bf16.size * 2
                            + M * N * jnp.dtype(out_dtype).itemsize)),
    )(x, w_bf16)


def linear_residual(x, w_bf16, b, res, out_dtype=jnp.bfloat16):
    M, K = x.shape
    _, N = w_bf16.shape
    TM, TN, TK = _tile_mn(M, 512), _tile_mn(N, 1024), _tile_k(K)
    mt, nt, kt = pl.cdiv(M, TM), pl.cdiv(N, TN), K // TK
    return pl.pallas_call(
        _linear_residual_kernel,
        out_shape=jax.ShapeDtypeStruct((M, N), out_dtype),
        grid=(mt, nt, kt),
        in_specs=[pl.BlockSpec((TM, TK), lambda i, j, k: (i, k)),
                  _maybe_deep_buffered_w_spec(TK, TN, mt, kt, nt),
                  pl.BlockSpec((1, TN), lambda i, j, k: (0, j)),
                  pl.BlockSpec((TM, TN), lambda i, j, k: (i, j))],
        out_specs=pl.BlockSpec((TM, TN), lambda i, j, k: (i, j)),
        scratch_shapes=[pltpu.VMEM((TM, TN), jnp.float32)],
        compiler_params=pltpu.CompilerParams(
            dimension_semantics=("parallel", "parallel", "arbitrary"),
            vmem_limit_bytes=_VMEM_LIMIT),
        cost_estimate=pl.CostEstimate(
            flops=2 * M * N * K, transcendentals=0,
            bytes_accessed=(x.size * x.dtype.itemsize + w_bf16.size * 2
                            + res.size * res.dtype.itemsize
                            + M * N * jnp.dtype(out_dtype).itemsize)),
    )(x, w_bf16, b.reshape(1, -1), res)


def ln_linear(x, ln_g, ln_b, w_bf16, b, *, activation=None, out_dtype=jnp.bfloat16):
    # LayerNorm needs the full feature row, so K is a single slab (<= width).
    M, K = x.shape
    _, N = w_bf16.shape
    TM, TN = _tile_mn(M, 512), _tile_mn(N, 1024)
    grid = (pl.cdiv(M, TM), pl.cdiv(N, TN))
    return pl.pallas_call(
        partial(_ln_linear_kernel, activation=activation),
        out_shape=jax.ShapeDtypeStruct((M, N), out_dtype),
        grid=grid,
        in_specs=[pl.BlockSpec((TM, K), lambda i, j: (i, 0)),
                  pl.BlockSpec((1, K), lambda i, j: (0, 0)),
                  pl.BlockSpec((1, K), lambda i, j: (0, 0)),
                  pl.BlockSpec((K, TN), lambda i, j: (0, j)),
                  pl.BlockSpec((1, TN), lambda i, j: (0, j))],
        out_specs=pl.BlockSpec((TM, TN), lambda i, j: (i, j)),
        scratch_shapes=[pltpu.VMEM((TM, K), jnp.bfloat16)],
        compiler_params=pltpu.CompilerParams(
            # N axis "arbitrary": keeps per-M-tile LN-scratch reuse megacore-safe
            dimension_semantics=("parallel", "arbitrary"),
            vmem_limit_bytes=_VMEM_LIMIT),
        cost_estimate=pl.CostEstimate(
            flops=2 * M * N * K,
            transcendentals=M * N if activation else M,
            bytes_accessed=(x.size * x.dtype.itemsize + w_bf16.size * 2
                            + M * N * jnp.dtype(out_dtype).itemsize)),
    )(x, ln_g.reshape(1, -1), ln_b.reshape(1, -1), w_bf16, b.reshape(1, -1))


def embed_ln(feat, cls, pos, gamma, beta):
    # feat: (B, gh*gw, W) bf16 -> (B, L, W) bf16 with class token + pos-emb + ln_pre.
    B, Lp, Wd = feat.shape
    L = Lp + 1
    return pl.pallas_call(
        _embed_ln_kernel,
        out_shape=jax.ShapeDtypeStruct((B, L, Wd), feat.dtype),
        grid=(B,),
        in_specs=[pl.BlockSpec((1, Lp, Wd), lambda i: (i, 0, 0)),
                  pl.BlockSpec((1, Wd), lambda i: (0, 0)),
                  pl.BlockSpec((1, Wd), lambda i: (0, 0)),
                  pl.BlockSpec((Lp, Wd), lambda i: (0, 0)),
                  pl.BlockSpec((1, Wd), lambda i: (0, 0)),
                  pl.BlockSpec((1, Wd), lambda i: (0, 0))],
        out_specs=pl.BlockSpec((1, L, Wd), lambda i: (i, 0, 0)),
        compiler_params=pltpu.CompilerParams(dimension_semantics=("parallel",)),
    )(feat, cls.reshape(1, -1), pos[:1], pos[1:],
      gamma.reshape(1, -1), beta.reshape(1, -1))


def multi_head_attention(qkv, width, heads):
    # qkv: (B, L, 3W) bf16 straight out of the fused LN+QKV linear.  Head slicing
    # is done through BlockSpec index_maps; output is (B, L, W) concat-heads.
    B, L, _ = qkv.shape
    dh = width // heads
    G = _pick_head_group(heads, dh, L, B)
    HG = heads // G
    blk = (1, L, G * dh)
    kernel = partial(_attention_kernel, heads_per_blk=G, head_dim=dh)
    return pl.pallas_call(
        kernel,
        out_shape=jax.ShapeDtypeStruct((B, L, width), qkv.dtype),
        grid=(B, HG),
        in_specs=[pl.BlockSpec(blk, lambda b, g: (b, 0, g)),
                  pl.BlockSpec(blk, lambda b, g: (b, 0, HG + g)),
                  pl.BlockSpec(blk, lambda b, g: (b, 0, 2 * HG + g))],
        out_specs=pl.BlockSpec(blk, lambda b, g: (b, 0, g)),
        compiler_params=pltpu.CompilerParams(
            dimension_semantics=("parallel", "parallel")),
    )(qkv, qkv, qkv)


# ----------------------------- model forward ----------------------------------

def prepare_params(raw, *, heads):
    """One-time: transpose weights to (in, out), cast matmul weights to bf16,
    fold 1/sqrt(dh) into the Q projection, pad conv1 K to a 128 multiple."""
    width = raw["class_embedding"].shape[0]
    dh = width // heads
    scale = 1.0 / math.sqrt(dh)

    conv_w = raw["conv1_w"].reshape(width, -1).T            # (C*p*p, W)
    kpad = (-conv_w.shape[0]) % 128
    if kpad:
        conv_w = jnp.pad(conv_w, ((0, kpad), (0, 0)))

    prep = {
        "conv1_w": conv_w.astype(jnp.bfloat16),
        "class_embedding": raw["class_embedding"],
        "positional_embedding": raw["positional_embedding"],
        "ln_pre_g": raw["ln_pre_g"], "ln_pre_b": raw["ln_pre_b"],
        "blocks": [],
    }
    for lb in raw["blocks"]:
        in_w = lb["in_proj_w"].T                            # (W, 3W)
        in_w = in_w.at[:, :width].multiply(scale)           # fold 1/sqrt(dh) into Q
        in_b = lb["in_proj_b"].at[:width].multiply(scale)
        prep["blocks"].append({
            "ln1_g": lb["ln1_g"], "ln1_b": lb["ln1_b"],
            "in_proj_w": in_w.astype(jnp.bfloat16),
            "in_proj_b": in_b,
            "out_proj_w": lb["out_proj_w"].T.astype(jnp.bfloat16),
            "out_proj_b": lb["out_proj_b"],
            "ln2_g": lb["ln2_g"], "ln2_b": lb["ln2_b"],
            "fc_w": lb["fc_w"].T.astype(jnp.bfloat16),
            "fc_b": lb["fc_b"],
            "proj_w": lb["proj_w"].T.astype(jnp.bfloat16),
            "proj_b": lb["proj_b"],
        })
    return prep


def visual_transformer_forward(x, params, *, patch_size, heads):
    B, C, H, W_img = x.shape
    p = patch_size
    gh, gw = H // p, W_img // p
    width = params["class_embedding"].shape[0]
    L = gh * gw + 1

    # conv1 (stride == kernel == patch_size, no bias) as a patch matmul;
    # K is zero-padded to a 128 multiple for aligned MXU loads.
    patches = (x.reshape(B, C, gh, p, gw, p)
                 .transpose(0, 2, 4, 1, 3, 5)
                 .reshape(B * gh * gw, C * p * p))
    kpad = params["conv1_w"].shape[0] - C * p * p
    if kpad:
        patches = jnp.pad(patches, ((0, 0), (0, kpad)))
    feat = matmul_bf16(patches, params["conv1_w"]).reshape(B, gh * gw, width)

    # fused: [class ; patches] + positional_embedding -> ln_pre   (bf16 out)
    xs = embed_ln(feat, params["class_embedding"], params["positional_embedding"],
                  params["ln_pre_g"], params["ln_pre_b"])          # (B, L, W)

    xf = xs.reshape(B * L, width)                                  # bf16 residual stream
    for lp in params["blocks"]:
        # --- multi-head self attention (LN1 fused into the QKV projection) ---
        qkv = ln_linear(xf, lp["ln1_g"], lp["ln1_b"],
                        lp["in_proj_w"], lp["in_proj_b"])           # (B*L, 3W) bf16
        att = multi_head_attention(qkv.reshape(B, L, 3 * width), width, heads)
        xf = linear_residual(att.reshape(B * L, width),
                             lp["out_proj_w"], lp["out_proj_b"], xf)
        # --- MLP (LN2 fused into c_fc + QuickGELU) ---
        h = ln_linear(xf, lp["ln2_g"], lp["ln2_b"],
                      lp["fc_w"], lp["fc_b"], activation="quickgelu")
        xf = linear_residual(h, lp["proj_w"], lp["proj_b"], xf)

    # PyTorch forward returns seq-first (L, B, width); ln_post / proj are None.
    return xf.reshape(B, L, width).transpose(1, 0, 2).astype(jnp.float32)


# ----------------------------- reference (pure JAX, f32) -----------------------

def reference_forward(x, params, *, patch_size, heads):
    B, C, H, W_img = x.shape
    p = patch_size
    gh, gw = H // p, W_img // p
    width = params["conv1_w"].shape[0]

    patches = (x.reshape(B, C, gh, p, gw, p)
                 .transpose(0, 2, 4, 1, 3, 5)
                 .reshape(B, gh * gw, C * p * p))
    feat = patches @ params["conv1_w"].reshape(width, -1).T
    cls = jnp.broadcast_to(params["class_embedding"][None, None, :], (B, 1, width))
    xs = jnp.concatenate([cls, feat], axis=1) + params["positional_embedding"][None]

    def ln(v, g, b):
        mu = v.mean(-1, keepdims=True)
        var = ((v - mu) ** 2).mean(-1, keepdims=True)
        return (v - mu) / jnp.sqrt(var + 1e-5) * g + b

    xs = ln(xs, params["ln_pre_g"], params["ln_pre_b"])
    L = xs.shape[1]
    dh = width // heads
    scale = 1.0 / math.sqrt(dh)
    for lp in params["blocks"]:
        h = ln(xs, lp["ln1_g"], lp["ln1_b"])
        qkv = h @ lp["in_proj_w"].T + lp["in_proj_b"]
        q, k, v = jnp.split(qkv, 3, axis=-1)
        q = q.reshape(B, L, heads, dh).transpose(0, 2, 1, 3)
        k = k.reshape(B, L, heads, dh).transpose(0, 2, 1, 3)
        v = v.reshape(B, L, heads, dh).transpose(0, 2, 1, 3)
        s = jnp.einsum("bhld,bhmd->bhlm", q, k) * scale
        pw = jax.nn.softmax(s, axis=-1)
        att = (jnp.einsum("bhlm,bhmd->bhld", pw, v)
                  .transpose(0, 2, 1, 3).reshape(B, L, width))
        xs = xs + att @ lp["out_proj_w"].T + lp["out_proj_b"]
        h2 = ln(xs, lp["ln2_g"], lp["ln2_b"])
        h2 = h2 @ lp["fc_w"].T + lp["fc_b"]
        h2 = h2 * jax.nn.sigmoid(1.702 * h2)
        xs = xs + h2 @ lp["proj_w"].T + lp["proj_b"]
    return xs.transpose(1, 0, 2)


# ----------------------------- parameter init ----------------------------------

def init_params(key, *, input_resolution, patch_size, width, layers, heads):
    del heads
    p = patch_size
    L = (input_resolution // patch_size) ** 2 + 1
    scale = width ** -0.5
    attn_std = width ** -0.5
    proj_std = (width ** -0.5) * ((2 * layers) ** -0.5)
    fc_std = (2 * width) ** -0.5

    keys = jax.random.split(key, 4 + layers)
    params = {
        "conv1_w": jax.random.normal(keys[0], (width, 3, p, p), jnp.float32) * 0.02,
        "class_embedding": jax.random.normal(keys[1], (width,), jnp.float32) * scale,
        "positional_embedding": jax.random.normal(keys[2], (L, width), jnp.float32) * 0.01,
        "ln_pre_g": jnp.ones((width,), jnp.float32),
        "ln_pre_b": jnp.zeros((width,), jnp.float32),
        "blocks": [],
    }
    for i in range(layers):
        bk = jax.random.split(keys[4 + i], 4)
        params["blocks"].append({
            "ln1_g": jnp.ones((width,), jnp.float32),
            "ln1_b": jnp.zeros((width,), jnp.float32),
            "in_proj_w": jax.random.normal(bk[0], (3 * width, width), jnp.float32) * attn_std,
            "in_proj_b": jnp.zeros((3 * width,), jnp.float32),
            "out_proj_w": jax.random.normal(bk[1], (width, width), jnp.float32) * proj_std,
            "out_proj_b": jnp.zeros((width,), jnp.float32),
            "ln2_g": jnp.ones((width,), jnp.float32),
            "ln2_b": jnp.zeros((width,), jnp.float32),
            "fc_w": jax.random.normal(bk[2], (4 * width, width), jnp.float32) * fc_std,
            "fc_b": jnp.zeros((4 * width,), jnp.float32),
            "proj_w": jax.random.normal(bk[3], (width, 4 * width), jnp.float32) * proj_std,
            "proj_b": jnp.zeros((width,), jnp.float32),
        })
    return params


# ----------------------------- main --------------------------------------------

if __name__ == "__main__":
    B = 2
    input_resolution = 16
    patch_size = 4
    width = 128      # tiling-friendly small width (dh=32, heads grouped to 128 lanes)
    layers = 2
    heads = 4
    # embed_dim unused in forward (proj is None)

    key = jax.random.PRNGKey(0)
    pkey, xkey = jax.random.split(key)
    raw_params = init_params(pkey, input_resolution=input_resolution,
                             patch_size=patch_size, width=width,
                             layers=layers, heads=heads)
    x = jax.random.normal(xkey, (B, 3, input_resolution, input_resolution),
                          jnp.float32)

    params = prepare_params(raw_params, heads=heads)   # one-time weight prep
    fwd = jax.jit(partial(visual_transformer_forward,
                          patch_size=patch_size, heads=heads))
    out = jax.block_until_ready(fwd(x, params))

    L = (input_resolution // patch_size) ** 2 + 1
    assert out.shape == (L, B, width), out.shape

    ref = reference_forward(x, raw_params, patch_size=patch_size, heads=heads)
    # bf16 MXU operands + bf16 activation storage vs f32 reference -> 5e-2 tolerance
    if not jnp.allclose(out, ref, rtol=5e-2, atol=5e-2):
        raise AssertionError("Pallas output does not match JAX reference")

    print("KERNEL_OK")
</pallas_src>

<mosaic_0001>
module attributes {stable_mosaic.version = 11 : i64} {
  func.func @_ln_linear_kernel(%arg0: i32, %arg1: i32, %arg2: memref<34x128xbf16, #tpu.memory_space<vmem>>, %arg3: memref<1x128xf32, #tpu.memory_space<vmem>>, %arg4: memref<1x128xf32, #tpu.memory_space<vmem>>, %arg5: memref<128x384xbf16, #tpu.memory_space<vmem>>, %arg6: memref<1x384xf32, #tpu.memory_space<vmem>>, %arg7: memref<34x384xbf16, #tpu.memory_space<vmem>>, %arg8: memref<34x128xbf16, #tpu.memory_space<vmem>>) attributes {dimension_semantics = [#tpu.dimension_semantics<parallel>, #tpu.dimension_semantics<arbitrary>], iteration_bounds = array<i64: 1, 1>, scalar_prefetch = 0 : i64, scratch_operands = 1 : i64, tpu.core_type = #tpu.core_type<tc>, window_params = [{transform_indices = @transform_0, window_bounds = array<i64: 34, 128>}, {pipeline_mode = #tpu.pipeline_mode<synchronous>, transform_indices = @transform_1, window_bounds = array<i64: 1, 128>}, {pipeline_mode = #tpu.pipeline_mode<synchronous>, transform_indices = @transform_2, window_bounds = array<i64: 1, 128>}, {transform_indices = @transform_3, window_bounds = array<i64: 128, 384>}, {transform_indices = @transform_4, window_bounds = array<i64: 1, 384>}, {transform_indices = @transform_5, window_bounds = array<i64: 34, 384>}]} {
    %c0_i32 = arith.constant 0 : i32
    %0 = arith.cmpi eq, %arg1, %c0_i32 : i32
    %1 = arith.extui %0 : i1 to i32
    %c0_i32_0 = arith.constant 0 : i32
    %2 = arith.cmpi ne, %1, %c0_i32_0 : i32
    scf.if %2 {
      %c0_8 = arith.constant 0 : index
      %c0_9 = arith.constant 0 : index
      %11 = vector.load %arg2[%c0_8, %c0_9] : memref<34x128xbf16, #tpu.memory_space<vmem>>, vector<34x128xbf16>
      %12 = arith.extf %11 : vector<34x128xbf16> to vector<34x128xf32>
      %cst_10 = arith.constant dense<0.000000e+00> : vector<34xf32>
      %13 = vector.multi_reduction <add>, %12, %cst_10 [1] : vector<34x128xf32> to vector<34xf32>
      %14 = vector.shape_cast %13 : vector<34xf32> to vector<34x1xf32>
      %cst_11 = arith.constant 1.280000e+02 : f32
      %15 = vector.broadcast %cst_11 : f32 to vector<34x1xf32>
      %16 = arith.divf %14, %15 : vector<34x1xf32>
      %17 = vector.broadcast %16 : vector<34x1xf32> to vector<34x128xf32>
      %18 = arith.subf %12, %17 : vector<34x128xf32>
      %19 = arith.mulf %18, %18 : vector<34x128xf32>
      %cst_12 = arith.constant dense<0.000000e+00> : vector<34xf32>
      %20 = vector.multi_reduction <add>, %19, %cst_12 [1] : vector<34x128xf32> to vector<34xf32>
      %21 = vector.shape_cast %20 : vector<34xf32> to vector<34x1xf32>
      %cst_13 = arith.constant 1.280000e+02 : f32
      %22 = vector.broadcast %cst_13 : f32 to vector<34x1xf32>
      %23 = arith.divf %21, %22 : vector<34x1xf32>
      %24 = vector.broadcast %16 : vector<34x1xf32> to vector<34x128xf32>
      %25 = arith.subf %12, %24 : vector<34x128xf32>
      %cst_14 = arith.constant 9.99999974E-6 : f32
      %26 = vector.broadcast %cst_14 : f32 to vector<34x1xf32>
      %27 = arith.addf %23, %26 : vector<34x1xf32>
      %28 = math.rsqrt %27 : vector<34x1xf32>
      %29 = vector.broadcast %28 : vector<34x1xf32> to vector<34x128xf32>
      %30 = arith.mulf %25, %29 : vector<34x128xf32>
      %c0_15 = arith.constant 0 : index
      %c0_16 = arith.constant 0 : index
      %31 = vector.load %arg3[%c0_15, %c0_16] : memref<1x128xf32, #tpu.memory_space<vmem>>, vector<1x128xf32>
      %32 = vector.broadcast %31 : vector<1x128xf32> to vector<34x128xf32>
      %33 = arith.mulf %30, %32 : vector<34x128xf32>
      %c0_17 = arith.constant 0 : index
      %c0_18 = arith.constant 0 : index
      %34 = vector.load %arg4[%c0_17, %c0_18] : memref<1x128xf32, #tpu.memory_space<vmem>>, vector<1x128xf32>
      %35 = vector.broadcast %34 : vector<1x128xf32> to vector<34x128xf32>
      %36 = arith.addf %33, %35 : vector<34x128xf32>
      %37 = arith.truncf %36 : vector<34x128xf32> to vector<34x128xbf16>
      %c0_19 = arith.constant 0 : index
      %c0_20 = arith.constant 0 : index
      %38 = vector.load %arg8[%c0_19, %c0_20] : memref<34x128xbf16, #tpu.memory_space<vmem>>, vector<34x128xbf16>
      tpu.vector_store %arg8[%c0_19, %c0_20], %37 {strides = array<i32>} : memref<34x128xbf16, #tpu.memory_space<vmem>>, vector<34x128xbf16>,
    } else {
    }
    %c0 = arith.constant 0 : index
    %c0_1 = arith.constant 0 : index
    %3 = vector.load %arg8[%c0, %c0_1] : memref<34x128xbf16, #tpu.memory_space<vmem>>, vector<34x128xbf16>
    %c0_2 = arith.constant 0 : index
    %c0_3 = arith.constant 0 : index
    %4 = vector.load %arg5[%c0_2, %c0_3] : memref<128x384xbf16, #tpu.memory_space<vmem>>, vector<128x384xbf16>
    %cst = arith.constant dense<0.000000e+00> : vector<34x384xf32>
    %5 = tpu.matmul %3, %4, %cst {dimension_numbers = #tpu.dot_dimension_numbers<[1], [0], [0], [1], [0, 0, 1, 1], [], []>} : vector<34x128xbf16>, vector<128x384xbf16>, vector<34x384xf32> -> vector<34x384xf32>
    %c0_4 = arith.constant 0 : index
    %c0_5 = arith.constant 0 : index
    %6 = vector.load %arg6[%c0_4, %c0_5] : memref<1x384xf32, #tpu.memory_space<vmem>>, vector<1x384xf32>
    %7 = vector.broadcast %6 : vector<1x384xf32> to vector<34x384xf32>
    %8 = arith.addf %5, %7 : vector<34x384xf32>
    %9 = arith.truncf %8 : vector<34x384xf32> to vector<34x384xbf16>
    %c0_6 = arith.constant 0 : index
    %c0_7 = arith.constant 0 : index
    %10 = vector.load %arg7[%c0_6, %c0_7] : memref<34x384xbf16, #tpu.memory_space<vmem>>, vector<34x384xbf16>
    tpu.vector_store %arg7[%c0_6, %c0_7], %9 {strides = array<i32>} : memref<34x384xbf16, #tpu.memory_space<vmem>>, vector<34x384xbf16>,
    return
  }
  func.func @transform_0(%arg0: i32, %arg1: i32) -> (i32, i32) {
    %c0_i32 = arith.constant 0 : i32
    %c0_i32_0 = arith.constant 0 : i32
    return %arg0, %c0_i32 : i32, i32
  }
  func.func @transform_1(%arg0: i32, %arg1: i32) -> (i32, i32) {
    %c0_i32 = arith.constant 0 : i32
    %c0_i32_0 = arith.constant 0 : i32
    %c0_i32_1 = arith.constant 0 : i32
    return %c0_i32, %c0_i32_0 : i32, i32
  }
  func.func @transform_2(%arg0: i32, %arg1: i32) -> (i32, i32) {
    %c0_i32 = arith.constant 0 : i32
    %c0_i32_0 = arith.constant 0 : i32
    %c0_i32_1 = arith.constant 0 : i32
    return %c0_i32, %c0_i32_0 : i32, i32
  }
  func.func @transform_3(%arg0: i32, %arg1: i32) -> (i32, i32) {
    %c0_i32 = arith.constant 0 : i32
    %c0_i32_0 = arith.constant 0 : i32
    return %c0_i32, %arg1 : i32, i32
  }
  func.func @transform_4(%arg0: i32, %arg1: i32) -> (i32, i32) {
    %c0_i32 = arith.constant 0 : i32
    %c0_i32_0 = arith.constant 0 : i32
    return %c0_i32, %arg1 : i32, i32
  }
  func.func @transform_5(%arg0: i32, %arg1: i32) -> (i32, i32) {
    %c0_i32 = arith.constant 0 : i32
    return %arg0, %arg1 : i32, i32
  }
}

module attributes {stable_mosaic.version = 11 : i64} {
  func.func @_matmul_kernel(%arg0: i32, %arg1: i32, %arg2: i32, %arg3: memref<32x128xf32, #tpu.memory_space<vmem>>, %arg4: memref<128x128xbf16, #tpu.memory_space<vmem>>, %arg5: memref<32x128xbf16, #tpu.memory_space<vmem>>, %arg6: memref<32x128xf32, #tpu.memory_space<vmem>>) attributes {dimension_semantics = [#tpu.dimension_semantics<parallel>, #tpu.dimension_semantics<parallel>, #tpu.dimension_semantics<arbitrary>], iteration_bounds = array<i64: 1, 1, 1>, scalar_prefetch = 0 : i64, scratch_operands = 1 : i64, tpu.core_type = #tpu.core_type<tc>, window_params = [{transform_indices = @transform_0, window_bounds = array<i64: 32, 128>}, {transform_indices = @transform_1, window_bounds = array<i64: 128, 128>}, {transform_indices = @transform_2, window_bounds = array<i64: 32, 128>}]} {
    %c0_i32 = arith.constant 0 : i32
    %0 = arith.cmpi eq, %arg2, %c0_i32 : i32
    %1 = arith.extui %0 : i1 to i32
    %c0_i32_0 = arith.constant 0 : i32
    %2 = arith.cmpi ne, %1, %c0_i32_0 : i32
    scf.if %2 {
      %cst_10 = arith.constant 0.000000e+00 : f32
      %13 = vector.broadcast %cst_10 : f32 to vector<32x128xf32>
      %c0_11 = arith.constant 0 : index
      %c0_12 = arith.constant 0 : index
      %14 = vector.load %arg6[%c0_11, %c0_12] : memref<32x128xf32, #tpu.memory_space<vmem>>, vector<32x128xf32>
      tpu.vector_store %arg6[%c0_11, %c0_12], %13 {strides = array<i32>} : memref<32x128xf32, #tpu.memory_space<vmem>>, vector<32x128xf32>,
    } else {
    }
    %c0 = arith.constant 0 : index
    %c0_1 = arith.constant 0 : index
    %3 = vector.load %arg6[%c0, %c0_1] : memref<32x128xf32, #tpu.memory_space<vmem>>, vector<32x128xf32>
    %c0_2 = arith.constant 0 : index
    %c0_3 = arith.constant 0 : index
    %4 = vector.load %arg3[%c0_2, %c0_3] : memref<32x128xf32, #tpu.memory_space<vmem>>, vector<32x128xf32>
    %5 = arith.truncf %4 : vector<32x128xf32> to vector<32x128xbf16>
    %c0_4 = arith.constant 0 : index
    %c0_5 = arith.constant 0 : index
    %6 = vector.load %arg4[%c0_4, %c0_5] : memref<128x128xbf16, #tpu.memory_space<vmem>>, vector<128x128xbf16>
    %cst = arith.constant dense<0.000000e+00> : vector<32x128xf32>
    %7 = tpu.matmul %5, %6, %cst {dimension_numbers = #tpu.dot_dimension_numbers<[1], [0], [0], [1], [0, 0, 1, 1], [], []>} : vector<32x128xbf16>, vector<128x128xbf16>, vector<32x128xf32> -> vector<32x128xf32>
    %8 = arith.addf %3, %7 : vector<32x128xf32>
    %c0_6 = arith.constant 0 : index
    %c0_7 = arith.constant 0 : index
    %9 = vector.load %arg6[%c0_6, %c0_7] : memref<32x128xf32, #tpu.memory_space<vmem>>, vector<32x128xf32>
    tpu.vector_store %arg6[%c0_6, %c0_7], %8 {strides = array<i32>} : memref<32x128xf32, #tpu.memory_space<vmem>>, vector<32x128xf32>,
    %c0_i32_8 = arith.constant 0 : i32
    %10 = arith.cmpi eq, %arg2, %c0_i32_8 : i32
    %11 = arith.extui %10 : i1 to i32
    %c0_i32_9 = arith.constant 0 : i32
    %12 = arith.cmpi ne, %11, %c0_i32_9 : i32
    scf.if %12 {
      %c0_10 = arith.constant 0 : index
      %c0_11 = arith.constant 0 : index
      %13 = vector.load %arg6[%c0_10, %c0_11] : memref<32x128xf32, #tpu.memory_space<vmem>>, vector<32x128xf32>
      %14 = arith.truncf %13 : vector<32x128xf32> to vector<32x128xbf16>
      %c0_12 = arith.constant 0 : index
      %c0_13 = arith.constant 0 : index
      %15 = vector.load %arg5[%c0_12, %c0_13] : memref<32x128xbf16, #tpu.memory_space<vmem>>, vector<32x128xbf16>
      tpu.vector_store %arg5[%c0_12, %c0_13], %14 {strides = array<i32>} : memref<32x128xbf16, #tpu.memory_space<vmem>>, vector<32x128xbf16>,
    } else {
    }
    return
  }
  func.func @transform_0(%arg0: i32, %arg1: i32, %arg2: i32) -> (i32, i32) {
    %c0_i32 = arith.constant 0 : i32
    return %arg0, %arg2 : i32, i32
  }
  func.func @transform_1(%arg0: i32, %arg1: i32, %arg2: i32) -> (i32, i32) {
    %c0_i32 = arith.constant 0 : i32
    return %arg2, %arg1 : i32, i32
  }
  func.func @transform_2(%arg0: i32, %arg1: i32, %arg2: i32) -> (i32, i32) {
    %c0_i32 = arith.constant 0 : i32
    return %arg0, %arg1 : i32, i32
  }
}

module attributes {stable_mosaic.version = 11 : i64} {
  func.func @_embed_ln_kernel(%arg0: i32, %arg1: memref<1x16x128xbf16, #tpu.memory_space<vmem>>, %arg2: memref<1x128xf32, #tpu.memory_space<vmem>>, %arg3: memref<1x128xf32, #tpu.memory_space<vmem>>, %arg4: memref<16x128xf32, #tpu.memory_space<vmem>>, %arg5: memref<1x128xf32, #tpu.memory_space<vmem>>, %arg6: memref<1x128xf32, #tpu.memory_space<vmem>>, %arg7: memref<1x17x128xbf16, #tpu.memory_space<vmem>>) attributes {dimension_semantics = [#tpu.dimension_semantics<parallel>], iteration_bounds = array<i64: 2>, scalar_prefetch = 0 : i64, scratch_operands = 0 : i64, tpu.core_type = #tpu.core_type<tc>, window_params = [{transform_indices = @transform_0, window_bounds = array<i64: 1, 16, 128>}, {pipeline_mode = #tpu.pipeline_mode<synchronous>, transform_indices = @transform_1, window_bounds = array<i64: 1, 128>}, {pipeline_mode = #tpu.pipeline_mode<synchronous>, transform_indices = @transform_2, window_bounds = array<i64: 1, 128>}, {pipeline_mode = #tpu.pipeline_mode<synchronous>, transform_indices = @transform_3, window_bounds = array<i64: 16, 128>}, {pipeline_mode = #tpu.pipeline_mode<synchronous>, transform_indices = @transform_4, window_bounds = array<i64: 1, 128>}, {pipeline_mode = #tpu.pipeline_mode<synchronous>, transform_indices = @transform_5, window_bounds = array<i64: 1, 128>}, {transform_indices = @transform_6, window_bounds = array<i64: 1, 17, 128>}]} {
    %c0 = arith.constant 0 : index
    %c0_0 = arith.constant 0 : index
    %0 = vector.load %arg5[%c0, %c0_0] : memref<1x128xf32, #tpu.memory_space<vmem>>, vector<1x128xf32>
    %c0_1 = arith.constant 0 : index
    %c0_2 = arith.constant 0 : index
    %1 = vector.load %arg6[%c0_1, %c0_2] : memref<1x128xf32, #tpu.memory_space<vmem>>, vector<1x128xf32>
    %c0_3 = arith.constant 0 : index
    %c0_4 = arith.constant 0 : index
    %2 = vector.load %arg2[%c0_3, %c0_4] : memref<1x128xf32, #tpu.memory_space<vmem>>, vector<1x128xf32>
    %c0_5 = arith.constant 0 : index
    %c0_6 = arith.constant 0 : index
    %3 = vector.load %arg3[%c0_5, %c0_6] : memref<1x128xf32, #tpu.memory_space<vmem>>, vector<1x128xf32>
    %4 = arith.addf %2, %3 : vector<1x128xf32>
    %c0_7 = arith.constant 0 : index
    %c0_8 = arith.constant 0 : index
    %c0_9 = arith.constant 0 : index
    %5 = vector.load %arg1[%c0_7, %c0_8, %c0_9] : memref<1x16x128xbf16, #tpu.memory_space<vmem>>, vector<1x16x128xbf16>
    %6 = vector.shape_cast %5 : vector<1x16x128xbf16> to vector<16x128xbf16>
    %7 = arith.extf %6 : vector<16x128xbf16> to vector<16x128xf32>
    %c0_10 = arith.constant 0 : index
    %c0_11 = arith.constant 0 : index
    %8 = vector.load %arg4[%c0_10, %c0_11] : memref<16x128xf32, #tpu.memory_space<vmem>>, vector<16x128xf32>
    %9 = arith.addf %7, %8 : vector<16x128xf32>
    %cst = arith.constant dense<0.000000e+00> : vector<1xf32>
    %10 = vector.multi_reduction <add>, %4, %cst [1] : vector<1x128xf32> to vector<1xf32>
    %11 = vector.shape_cast %10 : vector<1xf32> to vector<1x1xf32>
    %cst_12 = arith.constant 1.280000e+02 : f32
    %12 = vector.broadcast %cst_12 : f32 to vector<1x1xf32>
    %13 = arith.divf %11, %12 : vector<1x1xf32>
    %14 = vector.broadcast %13 : vector<1x1xf32> to vector<1x128xf32>
    %15 = arith.subf %4, %14 : vector<1x128xf32>
    %16 = arith.mulf %15, %15 : vector<1x128xf32>
    %cst_13 = arith.constant dense<0.000000e+00> : vector<1xf32>
    %17 = vector.multi_reduction <add>, %16, %cst_13 [1] : vector<1x128xf32> to vector<1xf32>
    %18 = vector.shape_cast %17 : vector<1xf32> to vector<1x1xf32>
    %cst_14 = arith.constant 1.280000e+02 : f32
    %19 = vector.broadcast %cst_14 : f32 to vector<1x1xf32>
    %20 = arith.divf %18, %19 : vector<1x1xf32>
    %21 = vector.broadcast %13 : vector<1x1xf32> to vector<1x128xf32>
    %22 = arith.subf %4, %21 : vector<1x128xf32>
    %cst_15 = arith.constant 9.99999974E-6 : f32
    %23 = vector.broadcast %cst_15 : f32 to vector<1x1xf32>
    %24 = arith.addf %20, %23 : vector<1x1xf32>
    %25 = math.rsqrt %24 : vector<1x1xf32>
    %26 = vector.broadcast %25 : vector<1x1xf32> to vector<1x128xf32>
    %27 = arith.mulf %22, %26 : vector<1x128xf32>
    %28 = arith.mulf %27, %0 : vector<1x128xf32>
    %29 = arith.addf %28, %1 : vector<1x128xf32>
    %30 = arith.truncf %29 : vector<1x128xf32> to vector<1x128xbf16>
    %c0_16 = arith.constant 0 : index
    %c0_17 = arith.constant 0 : index
    %c0_18 = arith.constant 0 : index
    %31 = vector.load %arg7[%c0_16, %c0_17, %c0_18] : memref<1x17x128xbf16, #tpu.memory_space<vmem>>, vector<1x1x128xbf16>
    %32 = vector.shape_cast %31 : vector<1x1x128xbf16> to vector<1x128xbf16>
    %33 = vector.shape_cast %30 : vector<1x128xbf16> to vector<1x1x128xbf16>
    tpu.vector_store %arg7[%c0_16, %c0_17, %c0_18], %33 {strides = array<i32>} : memref<1x17x128xbf16, #tpu.memory_space<vmem>>, vector<1x1x128xbf16>,
    %cst_19 = arith.constant dense<0.000000e+00> : vector<16xf32>
    %34 = vector.multi_reduction <add>, %9, %cst_19 [1] : vector<16x128xf32> to vector<16xf32>
    %35 = vector.shape_cast %34 : vector<16xf32> to vector<16x1xf32>
    %cst_20 = arith.constant 1.280000e+02 : f32
    %36 = vector.broadcast %cst_20 : f32 to vector<16x1xf32>
    %37 = arith.divf %35, %36 : vector<16x1xf32>
    %38 = vector.broadcast %37 : vector<16x1xf32> to vector<16x128xf32>
    %39 = arith.subf %9, %38 : vector<16x128xf32>
    %40 = arith.mulf %39, %39 : vector<16x128xf32>
    %cst_21 = arith.constant dense<0.000000e+00> : vector<16xf32>
    %41 = vector.multi_reduction <add>, %40, %cst_21 [1] : vector<16x128xf32> to vector<16xf32>
    %42 = vector.shape_cast %41 : vector<16xf32> to vector<16x1xf32>
    %cst_22 = arith.constant 1.280000e+02 : f32
    %43 = vector.broadcast %cst_22 : f32 to vector<16x1xf32>
    %44 = arith.divf %42, %43 : vector<16x1xf32>
    %45 = vector.broadcast %37 : vector<16x1xf32> to vector<16x128xf32>
    %46 = arith.subf %9, %45 : vector<16x128xf32>
    %cst_23 = arith.constant 9.99999974E-6 : f32
    %47 = vector.broadcast %cst_23 : f32 to vector<16x1xf32>
    %48 = arith.addf %44, %47 : vector<16x1xf32>
    %49 = math.rsqrt %48 : vector<16x1xf32>
    %50 = vector.broadcast %49 : vector<16x1xf32> to vector<16x128xf32>
    %51 = arith.mulf %46, %50 : vector<16x128xf32>
    %52 = vector.broadcast %0 : vector<1x128xf32> to vector<16x128xf32>
    %53 = arith.mulf %51, %52 : vector<16x128xf32>
    %54 = vector.broadcast %1 : vector<1x128xf32> to vector<16x128xf32>
    %55 = arith.addf %53, %54 : vector<16x128xf32>
    %56 = arith.truncf %55 : vector<16x128xf32> to vector<16x128xbf16>
    %c0_24 = arith.constant 0 : index
    %c1 = arith.constant 1 : index
    %c0_25 = arith.constant 0 : index
    %57 = vector.load %arg7[%c0_24, %c1, %c0_25] : memref<1x17x128xbf16, #tpu.memory_space<vmem>>, vector<1x16x128xbf16>
    %58 = vector.shape_cast %57 : vector<1x16x128xbf16> to vector<16x128xbf16>
    %59 = vector.shape_cast %56 : vector<16x128xbf16> to vector<1x16x128xbf16>
    tpu.vector_store %arg7[%c0_24, %c1, %c0_25], %59 {strides = array<i32>} : memref<1x17x128xbf16, #tpu.memory_space<vmem>>, vector<1x16x128xbf16>,
    return
  }
  func.func @transform_0(%arg0: i32) -> (i32, i32, i32) {
    %c0_i32 = arith.constant 0 : i32
    %c0_i32_0 = arith.constant 0 : i32
    %c0_i32_1 = arith.constant 0 : i32
    return %arg0, %c0_i32, %c0_i32_0 : i32, i32, i32
  }
  func.func @transform_1(%arg0: i32) -> (i32, i32) {
    %c0_i32 = arith.constant 0 : i32
    %c0_i32_0 = arith.constant 0 : i32
    %c0_i32_1 = arith.constant 0 : i32
    return %c0_i32, %c0_i32_0 : i32, i32
  }
  func.func @transform_2(%arg0: i32) -> (i32, i32) {
    %c0_i32 = arith.constant 0 : i32
    %c0_i32_0 = arith.constant 0 : i32
    %c0_i32_1 = arith.constant 0 : i32
    return %c0_i32, %c0_i32_0 : i32, i32
  }
  func.func @transform_3(%arg0: i32) -> (i32, i32) {
    %c0_i32 = arith.constant 0 : i32
    %c0_i32_0 = arith.constant 0 : i32
    %c0_i32_1 = arith.constant 0 : i32
    return %c0_i32, %c0_i32_0 : i32, i32
  }
  func.func @transform_4(%arg0: i32) -> (i32, i32) {
    %c0_i32 = arith.constant 0 : i32
    %c0_i32_0 = arith.constant 0 : i32
    %c0_i32_1 = arith.constant 0 : i32
    return %c0_i32, %c0_i32_0 : i32, i32
  }
  func.func @transform_5(%arg0: i32) -> (i32, i32) {
    %c0_i32 = arith.constant 0 : i32
    %c0_i32_0 = arith.constant 0 : i32
    %c0_i32_1 = arith.constant 0 : i32
    return %c0_i32, %c0_i32_0 : i32, i32
  }
  func.func @transform_6(%arg0: i32) -> (i32, i32, i32) {
    %c0_i32 = arith.constant 0 : i32
    %c0_i32_0 = arith.constant 0 : i32
    %c0_i32_1 = arith.constant 0 : i32
    return %arg0, %c0_i32, %c0_i32_0 : i32, i32, i32
  }
}

module attributes {stable_mosaic.version = 11 : i64} {
  func.func @_attention_kernel(%arg0: i32, %arg1: i32, %arg2: memref<1x17x128xbf16, #tpu.memory_space<vmem>>, %arg3: memref<1x17x128xbf16, #tpu.memory_space<vmem>>, %arg4: memref<1x17x128xbf16, #tpu.memory_space<vmem>>, %arg5: memref<1x17x128xbf16, #tpu.memory_space<vmem>>) attributes {dimension_semantics = [#tpu.dimension_semantics<parallel>, #tpu.dimension_semantics<parallel>], iteration_bounds = array<i64: 2, 1>, scalar_prefetch = 0 : i64, scratch_operands = 0 : i64, tpu.core_type = #tpu.core_type<tc>, window_params = [{transform_indices = @transform_0, window_bounds = array<i64: 1, 17, 128>}, {transform_indices = @transform_1, window_bounds = array<i64: 1, 17, 128>}, {transform_indices = @transform_2, window_bounds = array<i64: 1, 17, 128>}, {transform_indices = @transform_3, window_bounds = array<i64: 1, 17, 128>}]} {
    %c0 = arith.constant 0 : index
    %c0_0 = arith.constant 0 : index
    %c0_1 = arith.constant 0 : index
    %0 = vector.load %arg2[%c0, %c0_0, %c0_1] : memref<1x17x128xbf16, #tpu.memory_space<vmem>>, vector<1x17x128xbf16>
    %1 = vector.shape_cast %0 : vector<1x17x128xbf16> to vector<17x128xbf16>
    %c0_2 = arith.constant 0 : index
    %c0_3 = arith.constant 0 : index
    %c0_4 = arith.constant 0 : index
    %2 = vector.load %arg3[%c0_2, %c0_3, %c0_4] : memref<1x17x128xbf16, #tpu.memory_space<vmem>>, vector<1x17x128xbf16>
    %3 = vector.shape_cast %2 : vector<1x17x128xbf16> to vector<17x128xbf16>
    %c0_5 = arith.constant 0 : index
    %c0_6 = arith.constant 0 : index
    %c0_7 = arith.constant 0 : index
    %4 = vector.load %arg4[%c0_5, %c0_6, %c0_7] : memref<1x17x128xbf16, #tpu.memory_space<vmem>>, vector<1x17x128xbf16>
    %5 = vector.shape_cast %4 : vector<1x17x128xbf16> to vector<17x128xbf16>
    %6 = vector.extract_strided_slice %1 {offsets = [0, 0], sizes = [17, 32], strides = [1, 1]} : vector<17x128xbf16> to vector<17x32xbf16>
    %7 = vector.extract_strided_slice %3 {offsets = [0, 0], sizes = [17, 32], strides = [1, 1]} : vector<17x128xbf16> to vector<17x32xbf16>
    %8 = vector.extract_strided_slice %5 {offsets = [0, 0], sizes = [17, 32], strides = [1, 1]} : vector<17x128xbf16> to vector<17x32xbf16>
    %cst = arith.constant dense<0.000000e+00> : vector<17x17xf32>
    %9 = tpu.matmul %6, %7, %cst {dimension_numbers = #tpu.dot_dimension_numbers<[1], [1], [0], [0], [0, 0, 1, 0], [], []>} : vector<17x32xbf16>, vector<17x32xbf16>, vector<17x17xf32> -> vector<17x17xf32>
    %cst_8 = arith.constant dense<0xFF800000> : vector<17xf32>
    %10 = vector.multi_reduction <maximumf>, %9, %cst_8 [1] : vector<17x17xf32> to vector<17xf32>
    %11 = vector.shape_cast %10 : vector<17xf32> to vector<17x1xf32>
    %12 = vector.broadcast %11 : vector<17x1xf32> to vector<17x17xf32>
    %13 = arith.subf %9, %12 : vector<17x17xf32>
    %14 = math.exp %13 : vector<17x17xf32>
    %cst_9 = arith.constant dense<0.000000e+00> : vector<17xf32>
    %15 = vector.multi_reduction <add>, %14, %cst_9 [1] : vector<17x17xf32> to vector<17xf32>
    %16 = vector.shape_cast %15 : vector<17xf32> to vector<17x1xf32>
    %17 = tpu.reciprocal %16 {approx = true} : vector<17x1xf32> -> vector<17x1xf32>
    %18 = vector.broadcast %17 : vector<17x1xf32> to vector<17x17xf32>
    %19 = arith.mulf %14, %18 : vector<17x17xf32>
    %20 = arith.truncf %19 : vector<17x17xf32> to vector<17x17xbf16>
    %cst_10 = arith.constant dense<0.000000e+00> : vector<17x32xf32>
    %21 = tpu.matmul %20, %8, %cst_10 {dimension_numbers = #tpu.dot_dimension_numbers<[1], [0], [0], [1], [0, 0, 1, 1], [], []>} : vector<17x17xbf16>, vector<17x32xbf16>, vector<17x32xf32> -> vector<17x32xf32>
    %22 = arith.truncf %21 : vector<17x32xf32> to vector<17x32xbf16>
    %c0_11 = arith.constant 0 : index
    %c0_12 = arith.constant 0 : index
    %c0_13 = arith.constant 0 : index
    %23 = vector.load %arg5[%c0_11, %c0_12, %c0_13] : memref<1x17x128xbf16, #tpu.memory_space<vmem>>, vector<1x17x32xbf16>
    %24 = vector.shape_cast %23 : vector<1x17x32xbf16> to vector<17x32xbf16>
    %25 = vector.shape_cast %22 : vector<17x32xbf16> to vector<1x17x32xbf16>
    tpu.vector_store %arg5[%c0_11, %c0_12, %c0_13], %25 {strides = array<i32>} : memref<1x17x128xbf16, #tpu.memory_space<vmem>>, vector<1x17x32xbf16>,
    %26 = vector.extract_strided_slice %1 {offsets = [0, 32], sizes = [17, 32], strides = [1, 1]} : vector<17x128xbf16> to vector<17x32xbf16>
    %27 = vector.extract_strided_slice %3 {offsets = [0, 32], sizes = [17, 32], strides = [1, 1]} : vector<17x128xbf16> to vector<17x32xbf16>
    %28 = vector.extract_strided_slice %5 {offsets = [0, 32], sizes = [17, 32], strides = [1, 1]} : vector<17x128xbf16> to vector<17x32xbf16>
    %cst_14 = arith.constant dense<0.000000e+00> : vector<17x17xf32>
    %29 = tpu.matmul %26, %27, %cst_14 {dimension_numbers = #tpu.dot_dimension_numbers<[1], [1], [0], [0], [0, 0, 1, 0], [], []>} : vector<17x32xbf16>, vector<17x32xbf16>, vector<17x17xf32> -> vector<17x17xf32>
    %cst_15 = arith.constant dense<0xFF800000> : vector<17xf32>
    %30 = vector.multi_reduction <maximumf>, %29, %cst_15 [1] : vector<17x17xf32> to vector<17xf32>
    %31 = vector.shape_cast %30 : vector<17xf32> to vector<17x1xf32>
    %32 = vector.broadcast %31 : vector<17x1xf32> to vector<17x17xf32>
    %33 = arith.subf %29, %32 : vector<17x17xf32>
    %34 = math.exp %33 : vector<17x17xf32>
    %cst_16 = arith.constant dense<0.000000e+00> : vector<17xf32>
    %35 = vector.multi_reduction <add>, %34, %cst_16 [1] : vector<17x17xf32> to vector<17xf32>
    %36 = vector.shape_cast %35 : vector<17xf32> to vector<17x1xf32>
    %37 = tpu.reciprocal %36 {approx = true} : vector<17x1xf32> -> vector<17x1xf32>
    %38 = vector.broadcast %37 : vector<17x1xf32> to vector<17x17xf32>
    %39 = arith.mulf %34, %38 : vector<17x17xf32>
    %40 = arith.truncf %39 : vector<17x17xf32> to vector<17x17xbf16>
    %cst_17 = arith.constant dense<0.000000e+00> : vector<17x32xf32>
    %41 = tpu.matmul %40, %28, %cst_17 {dimension_numbers = #tpu.dot_dimension_numbers<[1], [0], [0], [1], [0, 0, 1, 1], [], []>} : vector<17x17xbf16>, vector<17x32xbf16>, vector<17x32xf32> -> vector<17x32xf32>
    %42 = arith.truncf %41 : vector<17x32xf32> to vector<17x32xbf16>
    %c0_18 = arith.constant 0 : index
    %c0_19 = arith.constant 0 : index
    %c32 = arith.constant 32 : index
    %43 = vector.load %arg5[%c0_18, %c0_19, %c32] : memref<1x17x128xbf16, #tpu.memory_space<vmem>>, vector<1x17x32xbf16>
    %44 = vector.shape_cast %43 : vector<1x17x32xbf16> to vector<17x32xbf16>
    %45 = vector.shape_cast %42 : vector<17x32xbf16> to vector<1x17x32xbf16>
    tpu.vector_store %arg5[%c0_18, %c0_19, %c32], %45 {strides = array<i32>} : memref<1x17x128xbf16, #tpu.memory_space<vmem>>, vector<1x17x32xbf16>,
    %46 = vector.extract_strided_slice %1 {offsets = [0, 64], sizes = [17, 32], strides = [1, 1]} : vector<17x128xbf16> to vector<17x32xbf16>
    %47 = vector.extract_strided_slice %3 {offsets = [0, 64], sizes = [17, 32], strides = [1, 1]} : vector<17x128xbf16> to vector<17x32xbf16>
    %48 = vector.extract_strided_slice %5 {offsets = [0, 64], sizes = [17, 32], strides = [1, 1]} : vector<17x128xbf16> to vector<17x32xbf16>
    %cst_20 = arith.constant dense<0.000000e+00> : vector<17x17xf32>
    %49 = tpu.matmul %46, %47, %cst_20 {dimension_numbers = #tpu.dot_dimension_numbers<[1], [1], [0], [0], [0, 0, 1, 0], [], []>} : vector<17x32xbf16>, vector<17x32xbf16>, vector<17x17xf32> -> vector<17x17xf32>
    %cst_21 = arith.constant dense<0xFF800000> : vector<17xf32>
    %50 = vector.multi_reduction <maximumf>, %49, %cst_21 [1] : vector<17x17xf32> to vector<17xf32>
    %51 = vector.shape_cast %50 : vector<17xf32> to vector<17x1xf32>
    %52 = vector.broadcast %51 : vector<17x1xf32> to vector<17x17xf32>
    %53 = arith.subf %49, %52 : vector<17x17xf32>
    %54 = math.exp %53 : vector<17x17xf32>
    %cst_22 = arith.constant dense<0.000000e+00> : vector<17xf32>
    %55 = vector.multi_reduction <add>, %54, %cst_22 [1] : vector<17x17xf32> to vector<17xf32>
    %56 = vector.shape_cast %55 : vector<17xf32> to vector<17x1xf32>
    %57 = tpu.reciprocal %56 {approx = true} : vector<17x1xf32> -> vector<17x1xf32>
    %58 = vector.broadcast %57 : vector<17x1xf32> to vector<17x17xf32>
    %59 = arith.mulf %54, %58 : vector<17x17xf32>
    %60 = arith.truncf %59 : vector<17x17xf32> to vector<17x17xbf16>
    %cst_23 = arith.constant dense<0.000000e+00> : vector<17x32xf32>
    %61 = tpu.matmul %60, %48, %cst_23 {dimension_numbers = #tpu.dot_dimension_numbers<[1], [0], [0], [1], [0, 0, 1, 1], [], []>} : vector<17x17xbf16>, vector<17x32xbf16>, vector<17x32xf32> -> vector<17x32xf32>
    %62 = arith.truncf %61 : vector<17x32xf32> to vector<17x32xbf16>
    %c0_24 = arith.constant 0 : index
    %c0_25 = arith.constant 0 : index
    %c64 = arith.constant 64 : index
    %63 = vector.load %arg5[%c0_24, %c0_25, %c64] : memref<1x17x128xbf16, #tpu.memory_space<vmem>>, vector<1x17x32xbf16>
    %64 = vector.shape_cast %63 : vector<1x17x32xbf16> to vector<17x32xbf16>
    %65 = vector.shape_cast %62 : vector<17x32xbf16> to vector<1x17x32xbf16>
    tpu.vector_store %arg5[%c0_24, %c0_25, %c64], %65 {strides = array<i32>} : memref<1x17x128xbf16, #tpu.memory_space<vmem>>, vector<1x17x32xbf16>,
    %66 = vector.extract_strided_slice %1 {offsets = [0, 96], sizes = [17, 32], strides = [1, 1]} : vector<17x128xbf16> to vector<17x32xbf16>
    %67 = vector.extract_strided_slice %3 {offsets = [0, 96], sizes = [17, 32], strides = [1, 1]} : vector<17x128xbf16> to vector<17x32xbf16>
    %68 = vector.extract_strided_slice %5 {offsets = [0, 96], sizes = [17, 32], strides = [1, 1]} : vector<17x128xbf16> to vector<17x32xbf16>
    %cst_26 = arith.constant dense<0.000000e+00> : vector<17x17xf32>
    %69 = tpu.matmul %66, %67, %cst_26 {dimension_numbers = #tpu.dot_dimension_numbers<[1], [1], [0], [0], [0, 0, 1, 0], [], []>} : vector<17x32xbf16>, vector<17x32xbf16>, vector<17x17xf32> -> vector<17x17xf32>
    %cst_27 = arith.constant dense<0xFF800000> : vector<17xf32>
    %70 = vector.multi_reduction <maximumf>, %69, %cst_27 [1] : vector<17x17xf32> to vector<17xf32>
    %71 = vector.shape_cast %70 : vector<17xf32> to vector<17x1xf32>
    %72 = vector.broadcast %71 : vector<17x1xf32> to vector<17x17xf32>
    %73 = arith.subf %69, %72 : vector<17x17xf32>
    %74 = math.exp %73 : vector<17x17xf32>
    %cst_28 = arith.constant dense<0.000000e+00> : vector<17xf32>
    %75 = vector.multi_reduction <add>, %74, %cst_28 [1] : vector<17x17xf32> to vector<17xf32>
    %76 = vector.shape_cast %75 : vector<17xf32> to vector<17x1xf32>
    %77 = tpu.reciprocal %76 {approx = true} : vector<17x1xf32> -> vector<17x1xf32>
    %78 = vector.broadcast %77 : vector<17x1xf32> to vector<17x17xf32>
    %79 = arith.mulf %74, %78 : vector<17x17xf32>
    %80 = arith.truncf %79 : vector<17x17xf32> to vector<17x17xbf16>
    %cst_29 = arith.constant dense<0.000000e+00> : vector<17x32xf32>
    %81 = tpu.matmul %80, %68, %cst_29 {dimension_numbers = #tpu.dot_dimension_numbers<[1], [0], [0], [1], [0, 0, 1, 1], [], []>} : vector<17x17xbf16>, vector<17x32xbf16>, vector<17x32xf32> -> vector<17x32xf32>
    %82 = arith.truncf %81 : vector<17x32xf32> to vector<17x32xbf16>
    %c0_30 = arith.constant 0 : index
    %c0_31 = arith.constant 0 : index
    %c96 = arith.constant 96 : index
    %83 = vector.load %arg5[%c0_30, %c0_31, %c96] : memref<1x17x128xbf16, #tpu.memory_space<vmem>>, vector<1x17x32xbf16>
    %84 = vector.shape_cast %83 : vector<1x17x32xbf16> to vector<17x32xbf16>
    %85 = vector.shape_cast %82 : vector<17x32xbf16> to vector<1x17x32xbf16>
    tpu.vector_store %arg5[%c0_30, %c0_31, %c96], %85 {strides = array<i32>} : memref<1x17x128xbf16, #tpu.memory_space<vmem>>, vector<1x17x32xbf16>,
    return
  }
  func.func @transform_0(%arg0: i32, %arg1: i32) -> (i32, i32, i32) {
    %c0_i32 = arith.constant 0 : i32
    %c0_i32_0 = arith.constant 0 : i32
    return %arg0, %c0_i32, %arg1 : i32, i32, i32
  }
  func.func @transform_1(%arg0: i32, %arg1: i32) -> (i32, i32, i32) {
    %c1_i32 = arith.constant 1 : i32
    %0 = arith.addi %c1_i32, %arg1 : i32
    %c0_i32 = arith.constant 0 : i32
    %c0_i32_0 = arith.constant 0 : i32
    return %arg0, %c0_i32, %0 : i32, i32, i32
  }
  func.func @transform_2(%arg0: i32, %arg1: i32) -> (i32, i32, i32) {
    %c2_i32 = arith.constant 2 : i32
    %0 = arith.addi %c2_i32, %arg1 : i32
    %c0_i32 = arith.constant 0 : i32
    %c0_i32_0 = arith.constant 0 : i32
    return %arg0, %c0_i32, %0 : i32, i32, i32
  }
  func.func @transform_3(%arg0: i32, %arg1: i32) -> (i32, i32, i32) {
    %c0_i32 = arith.constant 0 : i32
    %c0_i32_0 = arith.constant 0 : i32
    return %arg0, %c0_i32, %arg1 : i32, i32, i32
  }
}

module attributes {stable_mosaic.version = 11 : i64} {
  func.func @_linear_residual_kernel(%arg0: i32, %arg1: i32, %arg2: i32, %arg3: memref<34x512xbf16, #tpu.memory_space<vmem>>, %arg4: memref<512x128xbf16, #tpu.memory_space<vmem>>, %arg5: memref<1x128xf32, #tpu.memory_space<vmem>>, %arg6: memref<34x128xbf16, #tpu.memory_space<vmem>>, %arg7: memref<34x128xbf16, #tpu.memory_space<vmem>>, %arg8: memref<34x128xf32, #tpu.memory_space<vmem>>) attributes {dimension_semantics = [#tpu.dimension_semantics<parallel>, #tpu.dimension_semantics<parallel>, #tpu.dimension_semantics<arbitrary>], iteration_bounds = array<i64: 1, 1, 1>, scalar_prefetch = 0 : i64, scratch_operands = 1 : i64, tpu.core_type = #tpu.core_type<tc>, window_params = [{transform_indices = @transform_0, window_bounds = array<i64: 34, 512>}, {transform_indices = @transform_1, window_bounds = array<i64: 512, 128>}, {transform_indices = @transform_2, window_bounds = array<i64: 1, 128>}, {transform_indices = @transform_3, window_bounds = array<i64: 34, 128>}, {transform_indices = @transform_4, window_bounds = array<i64: 34, 128>}]} {
    %c0_i32 = arith.constant 0 : i32
    %0 = arith.cmpi eq, %arg2, %c0_i32 : i32
    %1 = arith.extui %0 : i1 to i32
    %c0_i32_0 = arith.constant 0 : i32
    %2 = arith.cmpi ne, %1, %c0_i32_0 : i32
    scf.if %2 {
      %cst_10 = arith.constant 0.000000e+00 : f32
      %12 = vector.broadcast %cst_10 : f32 to vector<34x128xf32>
      %c0_11 = arith.constant 0 : index
      %c0_12 = arith.constant 0 : index
      %13 = vector.load %arg8[%c0_11, %c0_12] : memref<34x128xf32, #tpu.memory_space<vmem>>, vector<34x128xf32>
      tpu.vector_store %arg8[%c0_11, %c0_12], %12 {strides = array<i32>} : memref<34x128xf32, #tpu.memory_space<vmem>>, vector<34x128xf32>,
    } else {
    }
    %c0 = arith.constant 0 : index
    %c0_1 = arith.constant 0 : index
    %3 = vector.load %arg8[%c0, %c0_1] : memref<34x128xf32, #tpu.memory_space<vmem>>, vector<34x128xf32>
    %c0_2 = arith.constant 0 : index
    %c0_3 = arith.constant 0 : index
    %4 = vector.load %arg3[%c0_2, %c0_3] : memref<34x512xbf16, #tpu.memory_space<vmem>>, vector<34x512xbf16>
    %c0_4 = arith.constant 0 : index
    %c0_5 = arith.constant 0 : index
    %5 = vector.load %arg4[%c0_4, %c0_5] : memref<512x128xbf16, #tpu.memory_space<vmem>>, vector<512x128xbf16>
    %cst = arith.constant dense<0.000000e+00> : vector<34x128xf32>
    %6 = tpu.matmul %4, %5, %cst {dimension_numbers = #tpu.dot_dimension_numbers<[1], [0], [0], [1], [0, 0, 1, 1], [], []>} : vector<34x512xbf16>, vector<512x128xbf16>, vector<34x128xf32> -> vector<34x128xf32>
    %7 = arith.addf %3, %6 : vector<34x128xf32>
    %c0_6 = arith.constant 0 : index
    %c0_7 = arith.constant 0 : index
    %8 = vector.load %arg8[%c0_6, %c0_7] : memref<34x128xf32, #tpu.memory_space<vmem>>, vector<34x128xf32>
    tpu.vector_store %arg8[%c0_6, %c0_7], %7 {strides = array<i32>} : memref<34x128xf32, #tpu.memory_space<vmem>>, vector<34x128xf32>,
    %c0_i32_8 = arith.constant 0 : i32
    %9 = arith.cmpi eq, %arg2, %c0_i32_8 : i32
    %10 = arith.extui %9 : i1 to i32
    %c0_i32_9 = arith.constant 0 : i32
    %11 = arith.cmpi ne, %10, %c0_i32_9 : i32
    scf.if %11 {
      %c0_10 = arith.constant 0 : index
      %c0_11 = arith.constant 0 : index
      %12 = vector.load %arg8[%c0_10, %c0_11] : memref<34x128xf32, #tpu.memory_space<vmem>>, vector<34x128xf32>
      %c0_12 = arith.constant 0 : index
      %c0_13 = arith.constant 0 : index
      %13 = vector.load %arg5[%c0_12, %c0_13] : memref<1x128xf32, #tpu.memory_space<vmem>>, vector<1x128xf32>
      %14 = vector.broadcast %13 : vector<1x128xf32> to vector<34x128xf32>
      %15 = arith.addf %12, %14 : vector<34x128xf32>
      %c0_14 = arith.constant 0 : index
      %c0_15 = arith.constant 0 : index
      %16 = vector.load %arg6[%c0_14, %c0_15] : memref<34x128xbf16, #tpu.memory_space<vmem>>, vector<34x128xbf16>
      %17 = arith.extf %16 : vector<34x128xbf16> to vector<34x128xf32>
      %18 = arith.addf %15, %17 : vector<34x128xf32>
      %19 = arith.truncf %18 : vector<34x128xf32> to vector<34x128xbf16>
      %c0_16 = arith.constant 0 : index
      %c0_17 = arith.constant 0 : index
      %20 = vector.load %arg7[%c0_16, %c0_17] : memref<34x128xbf16, #tpu.memory_space<vmem>>, vector<34x128xbf16>
      tpu.vector_store %arg7[%c0_16, %c0_17], %19 {strides = array<i32>} : memref<34x128xbf16, #tpu.memory_space<vmem>>, vector<34x128xbf16>,
    } else {
    }
    return
  }
  func.func @transform_0(%arg0: i32, %arg1: i32, %arg2: i32) -> (i32, i32) {
    %c0_i32 = arith.constant 0 : i32
    return %arg0, %arg2 : i32, i32
  }
  func.func @transform_1(%arg0: i32, %arg1: i32, %arg2: i32) -> (i32, i32) {
    %c0_i32 = arith.constant 0 : i32
    return %arg2, %arg1 : i32, i32
  }
  func.func @transform_2(%arg0: i32, %arg1: i32, %arg2: i32) -> (i32, i32) {
    %c0_i32 = arith.constant 0 : i32
    %c0_i32_0 = arith.constant 0 : i32
    return %c0_i32, %arg1 : i32, i32
  }
  func.func @transform_3(%arg0: i32, %arg1: i32, %arg2: i32) -> (i32, i32) {
    %c0_i32 = arith.constant 0 : i32
    return %arg0, %arg1 : i32, i32
  }
  func.func @transform_4(%arg0: i32, %arg1: i32, %arg2: i32) -> (i32, i32) {
    %c0_i32 = arith.constant 0 : i32
    return %arg0, %arg1 : i32, i32
  }
}

module attributes {stable_mosaic.version = 11 : i64} {
  func.func @_linear_residual_kernel(%arg0: i32, %arg1: i32, %arg2: i32, %arg3: memref<34x128xbf16, #tpu.memory_space<vmem>>, %arg4: memref<128x128xbf16, #tpu.memory_space<vmem>>, %arg5: memref<1x128xf32, #tpu.memory_space<vmem>>, %arg6: memref<34x128xbf16, #tpu.memory_space<vmem>>, %arg7: memref<34x128xbf16, #tpu.memory_space<vmem>>, %arg8: memref<34x128xf32, #tpu.memory_space<vmem>>) attributes {dimension_semantics = [#tpu.dimension_semantics<parallel>, #tpu.dimension_semantics<parallel>, #tpu.dimension_semantics<arbitrary>], iteration_bounds = array<i64: 1, 1, 1>, scalar_prefetch = 0 : i64, scratch_operands = 1 : i64, tpu.core_type = #tpu.core_type<tc>, window_params = [{transform_indices = @transform_0, window_bounds = array<i64: 34, 128>}, {transform_indices = @transform_1, window_bounds = array<i64: 128, 128>}, {transform_indices = @transform_2, window_bounds = array<i64: 1, 128>}, {transform_indices = @transform_3, window_bounds = array<i64: 34, 128>}, {transform_indices = @transform_4, window_bounds = array<i64: 34, 128>}]} {
    %c0_i32 = arith.constant 0 : i32
    %0 = arith.cmpi eq, %arg2, %c0_i32 : i32
    %1 = arith.extui %0 : i1 to i32
    %c0_i32_0 = arith.constant 0 : i32
    %2 = arith.cmpi ne, %1, %c0_i32_0 : i32
    scf.if %2 {
      %cst_10 = arith.constant 0.000000e+00 : f32
      %12 = vector.broadcast %cst_10 : f32 to vector<34x128xf32>
      %c0_11 = arith.constant 0 : index
      %c0_12 = arith.constant 0 : index
      %13 = vector.load %arg8[%c0_11, %c0_12] : memref<34x128xf32, #tpu.memory_space<vmem>>, vector<34x128xf32>
      tpu.vector_store %arg8[%c0_11, %c0_12], %12 {strides = array<i32>} : memref<34x128xf32, #tpu.memory_space<vmem>>, vector<34x128xf32>,
    } else {
    }
    %c0 = arith.constant 0 : index
    %c0_1 = arith.constant 0 : index
    %3 = vector.load %arg8[%c0, %c0_1] : memref<34x128xf32, #tpu.memory_space<vmem>>, vector<34x128xf32>
    %c0_2 = arith.constant 0 : index
    %c0_3 = arith.constant 0 : index
    %4 = vector.load %arg3[%c0_2, %c0_3] : memref<34x128xbf16, #tpu.memory_space<vmem>>, vector<34x128xbf16>
    %c0_4 = arith.constant 0 : index
    %c0_5 = arith.constant 0 : index
    %5 = vector.load %arg4[%c0_4, %c0_5] : memref<128x128xbf16, #tpu.memory_space<vmem>>, vector<128x128xbf16>
    %cst = arith.constant dense<0.000000e+00> : vector<34x128xf32>
    %6 = tpu.matmul %4, %5, %cst {dimension_numbers = #tpu.dot_dimension_numbers<[1], [0], [0], [1], [0, 0, 1, 1], [], []>} : vector<34x128xbf16>, vector<128x128xbf16>, vector<34x128xf32> -> vector<34x128xf32>
    %7 = arith.addf %3, %6 : vector<34x128xf32>
    %c0_6 = arith.constant 0 : index
    %c0_7 = arith.constant 0 : index
    %8 = vector.load %arg8[%c0_6, %c0_7] : memref<34x128xf32, #tpu.memory_space<vmem>>, vector<34x128xf32>
    tpu.vector_store %arg8[%c0_6, %c0_7], %7 {strides = array<i32>} : memref<34x128xf32, #tpu.memory_space<vmem>>, vector<34x128xf32>,
    %c0_i32_8 = arith.constant 0 : i32
    %9 = arith.cmpi eq, %arg2, %c0_i32_8 : i32
    %10 = arith.extui %9 : i1 to i32
    %c0_i32_9 = arith.constant 0 : i32
    %11 = arith.cmpi ne, %10, %c0_i32_9 : i32
    scf.if %11 {
      %c0_10 = arith.constant 0 : index
      %c0_11 = arith.constant 0 : index
      %12 = vector.load %arg8[%c0_10, %c0_11] : memref<34x128xf32, #tpu.memory_space<vmem>>, vector<34x128xf32>
      %c0_12 = arith.constant 0 : index
      %c0_13 = arith.constant 0 : index
      %13 = vector.load %arg5[%c0_12, %c0_13] : memref<1x128xf32, #tpu.memory_space<vmem>>, vector<1x128xf32>
      %14 = vector.broadcast %13 : vector<1x128xf32> to vector<34x128xf32>
      %15 = arith.addf %12, %14 : vector<34x128xf32>
      %c0_14 = arith.constant 0 : index
      %c0_15 = arith.constant 0 : index
      %16 = vector.load %arg6[%c0_14, %c0_15] : memref<34x128xbf16, #tpu.memory_space<vmem>>, vector<34x128xbf16>
      %17 = arith.extf %16 : vector<34x128xbf16> to vector<34x128xf32>
      %18 = arith.addf %15, %17 : vector<34x128xf32>
      %19 = arith.truncf %18 : vector<34x128xf32> to vector<34x128xbf16>
      %c0_16 = arith.constant 0 : index
      %c0_17 = arith.constant 0 : index
      %20 = vector.load %arg7[%c0_16, %c0_17] : memref<34x128xbf16, #tpu.memory_space<vmem>>, vector<34x128xbf16>
      tpu.vector_store %arg7[%c0_16, %c0_17], %19 {strides = array<i32>} : memref<34x128xbf16, #tpu.memory_space<vmem>>, vector<34x128xbf16>,
    } else {
    }
    return
  }
  func.func @transform_0(%arg0: i32, %arg1: i32, %arg2: i32) -> (i32, i32) {
    %c0_i32 = arith.constant 0 : i32
    return %arg0, %arg2 : i32, i32
  }
  func.func @transform_1(%arg0: i32, %arg1: i32, %arg2: i32) -> (i32, i32) {
    %c0_i32 = arith.constant 0 : i32
    return %arg2, %arg1 : i32, i32
  }
  func.func @transform_2(%arg0: i32, %arg1: i32, %arg2: i32) -> (i32, i32) {
    %c0_i32 = arith.constant 0 : i32
    %c0_i32_0 = arith.constant 0 : i32
    return %c0_i32, %arg1 : i32, i32
  }
  func.func @transform_3(%arg0: i32, %arg1: i32, %arg2: i32) -> (i32, i32) {
    %c0_i32 = arith.constant 0 : i32
    return %arg0, %arg1 : i32, i32
  }
  func.func @transform_4(%arg0: i32, %arg1: i32, %arg2: i32) -> (i32, i32) {
    %c0_i32 = arith.constant 0 : i32
    return %arg0, %arg1 : i32, i32
  }
}

module attributes {stable_mosaic.version = 11 : i64} {
  func.func @_ln_linear_kernel(%arg0: i32, %arg1: i32, %arg2: memref<34x128xbf16, #tpu.memory_space<vmem>>, %arg3: memref<1x128xf32, #tpu.memory_space<vmem>>, %arg4: memref<1x128xf32, #tpu.memory_space<vmem>>, %arg5: memref<128x512xbf16, #tpu.memory_space<vmem>>, %arg6: memref<1x512xf32, #tpu.memory_space<vmem>>, %arg7: memref<34x512xbf16, #tpu.memory_space<vmem>>, %arg8: memref<34x128xbf16, #tpu.memory_space<vmem>>) attributes {dimension_semantics = [#tpu.dimension_semantics<parallel>, #tpu.dimension_semantics<arbitrary>], iteration_bounds = array<i64: 1, 1>, scalar_prefetch = 0 : i64, scratch_operands = 1 : i64, tpu.core_type = #tpu.core_type<tc>, window_params = [{transform_indices = @transform_0, window_bounds = array<i64: 34, 128>}, {pipeline_mode = #tpu.pipeline_mode<synchronous>, transform_indices = @transform_1, window_bounds = array<i64: 1, 128>}, {pipeline_mode = #tpu.pipeline_mode<synchronous>, transform_indices = @transform_2, window_bounds = array<i64: 1, 128>}, {transform_indices = @transform_3, window_bounds = array<i64: 128, 512>}, {transform_indices = @transform_4, window_bounds = array<i64: 1, 512>}, {transform_indices = @transform_5, window_bounds = array<i64: 34, 512>}]} {
    %c0_i32 = arith.constant 0 : i32
    %0 = arith.cmpi eq, %arg1, %c0_i32 : i32
    %1 = arith.extui %0 : i1 to i32
    %c0_i32_0 = arith.constant 0 : i32
    %2 = arith.cmpi ne, %1, %c0_i32_0 : i32
    scf.if %2 {
      %c0_10 = arith.constant 0 : index
      %c0_11 = arith.constant 0 : index
      %19 = vector.load %arg2[%c0_10, %c0_11] : memref<34x128xbf16, #tpu.memory_space<vmem>>, vector<34x128xbf16>
      %20 = arith.extf %19 : vector<34x128xbf16> to vector<34x128xf32>
      %cst_12 = arith.constant dense<0.000000e+00> : vector<34xf32>
      %21 = vector.multi_reduction <add>, %20, %cst_12 [1] : vector<34x128xf32> to vector<34xf32>
      %22 = vector.shape_cast %21 : vector<34xf32> to vector<34x1xf32>
      %cst_13 = arith.constant 1.280000e+02 : f32
      %23 = vector.broadcast %cst_13 : f32 to vector<34x1xf32>
      %24 = arith.divf %22, %23 : vector<34x1xf32>
      %25 = vector.broadcast %24 : vector<34x1xf32> to vector<34x128xf32>
      %26 = arith.subf %20, %25 : vector<34x128xf32>
      %27 = arith.mulf %26, %26 : vector<34x128xf32>
      %cst_14 = arith.constant dense<0.000000e+00> : vector<34xf32>
      %28 = vector.multi_reduction <add>, %27, %cst_14 [1] : vector<34x128xf32> to vector<34xf32>
      %29 = vector.shape_cast %28 : vector<34xf32> to vector<34x1xf32>
      %cst_15 = arith.constant 1.280000e+02 : f32
      %30 = vector.broadcast %cst_15 : f32 to vector<34x1xf32>
      %31 = arith.divf %29, %30 : vector<34x1xf32>
      %32 = vector.broadcast %24 : vector<34x1xf32> to vector<34x128xf32>
      %33 = arith.subf %20, %32 : vector<34x128xf32>
      %cst_16 = arith.constant 9.99999974E-6 : f32
      %34 = vector.broadcast %cst_16 : f32 to vector<34x1xf32>
      %35 = arith.addf %31, %34 : vector<34x1xf32>
      %36 = math.rsqrt %35 : vector<34x1xf32>
      %37 = vector.broadcast %36 : vector<34x1xf32> to vector<34x128xf32>
      %38 = arith.mulf %33, %37 : vector<34x128xf32>
      %c0_17 = arith.constant 0 : index
      %c0_18 = arith.constant 0 : index
      %39 = vector.load %arg3[%c0_17, %c0_18] : memref<1x128xf32, #tpu.memory_space<vmem>>, vector<1x128xf32>
      %40 = vector.broadcast %39 : vector<1x128xf32> to vector<34x128xf32>
      %41 = arith.mulf %38, %40 : vector<34x128xf32>
      %c0_19 = arith.constant 0 : index
      %c0_20 = arith.constant 0 : index
      %42 = vector.load %arg4[%c0_19, %c0_20] : memref<1x128xf32, #tpu.memory_space<vmem>>, vector<1x128xf32>
      %43 = vector.broadcast %42 : vector<1x128xf32> to vector<34x128xf32>
      %44 = arith.addf %41, %43 : vector<34x128xf32>
      %45 = arith.truncf %44 : vector<34x128xf32> to vector<34x128xbf16>
      %c0_21 = arith.constant 0 : index
      %c0_22 = arith.constant 0 : index
      %46 = vector.load %arg8[%c0_21, %c0_22] : memref<34x128xbf16, #tpu.memory_space<vmem>>, vector<34x128xbf16>
      tpu.vector_store %arg8[%c0_21, %c0_22], %45 {strides = array<i32>} : memref<34x128xbf16, #tpu.memory_space<vmem>>, vector<34x128xbf16>,
    } else {
    }
    %c0 = arith.constant 0 : index
    %c0_1 = arith.constant 0 : index
    %3 = vector.load %arg8[%c0, %c0_1] : memref<34x128xbf16, #tpu.memory_space<vmem>>, vector<34x128xbf16>
    %c0_2 = arith.constant 0 : index
    %c0_3 = arith.constant 0 : index
    %4 = vector.load %arg5[%c0_2, %c0_3] : memref<128x512xbf16, #tpu.memory_space<vmem>>, vector<128x512xbf16>
    %cst = arith.constant dense<0.000000e+00> : vector<34x512xf32>
    %5 = tpu.matmul %3, %4, %cst {dimension_numbers = #tpu.dot_dimension_numbers<[1], [0], [0], [1], [0, 0, 1, 1], [], []>} : vector<34x128xbf16>, vector<128x512xbf16>, vector<34x512xf32> -> vector<34x512xf32>
    %c0_4 = arith.constant 0 : index
    %c0_5 = arith.constant 0 : index
    %6 = vector.load %arg6[%c0_4, %c0_5] : memref<1x512xf32, #tpu.memory_space<vmem>>, vector<1x512xf32>
    %7 = vector.broadcast %6 : vector<1x512xf32> to vector<34x512xf32>
    %8 = arith.addf %5, %7 : vector<34x512xf32>
    %cst_6 = arith.constant 1.702000e+00 : f32
    %9 = vector.broadcast %cst_6 : f32 to vector<34x512xf32>
    %10 = arith.mulf %9, %8 : vector<34x512xf32>
    %11 = arith.negf %10 : vector<34x512xf32>
    %12 = math.exp %11 : vector<34x512xf32>
    %cst_7 = arith.constant 1.000000e+00 : f32
    %13 = vector.broadcast %cst_7 : f32 to vector<34x512xf32>
    %14 = arith.addf %13, %12 : vector<34x512xf32>
    %15 = arith.divf %13, %14 : vector<34x512xf32>
    %16 = arith.mulf %8, %15 : vector<34x512xf32>
    %17 = arith.truncf %16 : vector<34x512xf32> to vector<34x512xbf16>
    %c0_8 = arith.constant 0 : index
    %c0_9 = arith.constant 0 : index
    %18 = vector.load %arg7[%c0_8, %c0_9] : memref<34x512xbf16, #tpu.memory_space<vmem>>, vector<34x512xbf16>
    tpu.vector_store %arg7[%c0_8, %c0_9], %17 {strides = array<i32>} : memref<34x512xbf16, #tpu.memory_space<vmem>>, vector<34x512xbf16>,
    return
  }
  func.func @transform_0(%arg0: i32, %arg1: i32) -> (i32, i32) {
    %c0_i32 = arith.constant 0 : i32
    %c0_i32_0 = arith.constant 0 : i32
    return %arg0, %c0_i32 : i32, i32
  }
  func.func @transform_1(%arg0: i32, %arg1: i32) -> (i32, i32) {
    %c0_i32 = arith.constant 0 : i32
    %c0_i32_0 = arith.constant 0 : i32
    %c0_i32_1 = arith.constant 0 : i32
    return %c0_i32, %c0_i32_0 : i32, i32
  }
  func.func @transform_2(%arg0: i32, %arg1: i32) -> (i32, i32) {
    %c0_i32 = arith.constant 0 : i32
    %c0_i32_0 = arith.constant 0 : i32
    %c0_i32_1 = arith.constant 0 : i32
    return %c0_i32, %c0_i32_0 : i32, i32
  }
  func.func @transform_3(%arg0: i32, %arg1: i32) -> (i32, i32) {
    %c0_i32 = arith.constant 0 : i32
    %c0_i32_0 = arith.constant 0 : i32
    return %c0_i32, %arg1 : i32, i32
  }
  func.func @transform_4(%arg0: i32, %arg1: i32) -> (i32, i32) {
    %c0_i32 = arith.constant 0 : i32
    %c0_i32_0 = arith.constant 0 : i32
    return %c0_i32, %arg1 : i32, i32
  }
  func.func @transform_5(%arg0: i32, %arg1: i32) -> (i32, i32) {
    %c0_i32 = arith.constant 0 : i32
    return %arg0, %arg1 : i32, i32
  }
}

</mosaic_0001>

<bundles_post_ra>
// kernel: visual_transformer_forward.12
= control target key start
LH: loop header
LB: loop body
LE: loop exit
PB: predicated region body
PF: predicated region fallthrough
CT: control target
= control target key end

     0   :  { %s255_s1 = inlined_call_operand.vmem [shape: bf16[128,128], index: 1, kind: input, shape index: {}]   ;;  %s256_s0 = inlined_call_operand.vmem [shape: f32[32,128], index: 0, kind: input, shape index: {}]   ;;  %s257_s2 = inlined_call_operand.vmem [shape: bf16[32,128], index: 2, kind: output, shape index: {}]  }
   0x1   :  { %v178_v0 = vld [vmem:[%s255_s1 + $0x38] sm:$0xff]  ;;  %v177_v1 = vld [vmem:[%s255_s1 + $0x30] sm:$0xff]  ;;  %v176_v2 = vld [vmem:[%s255_s1 + $0x28] sm:$0xff] }
   0x2   :  { %93 = vmatpush.bf16.msra.mxu0 %v178_v0  ;;  %190 = vmatpush.bf16.msra.mxu1 %v178_v0  ;;  %v175_v3 = vld [vmem:[%s255_s1 + $0x20] sm:$0xff]  ;;  %v174_v4 = vld [vmem:[%s255_s1 + $0x18] sm:$0xff]  ;;  %v173_v5 = vld [vmem:[%s255_s1 + $0x10] sm:$0xff] }
   0x3   :  { %v172_v6 = vld [vmem:[%s255_s1 + $0x8] sm:$0xff]  ;;  %v171_v7 = vld [vmem:[%s255_s1] sm:$0xff]  ;;  %v25_v10 = vld [vmem:[%s256_s0 + $0x10] sm:$0xff] }
   0x4   :  { %v23_v8 = vld [vmem:[%s256_s0] sm:$0xff]  ;;  %v24_v9 = vld [vmem:[%s256_s0 + $0x8] sm:$0xff]  ;;  %v26_v11 = vld [vmem:[%s256_s0 + $0x18] sm:$0xff] }
   0x5   :  { %v27_v12 = vpack.c.bf16 %v24_v9, %v23_v8  ;;  %v28_v13 = vpack.c.bf16 %v26_v11, %v25_v10 }
   0x6   :  { %94 = vmatpush.bf16.msra.mxu0 %v177_v1  ;;  %191 = vmatpush.bf16.msra.mxu1 %v177_v1 }
   0xa   :  { %95 = vmatpush.bf16.msra.mxu0 %v176_v2  ;;  %192 = vmatpush.bf16.msra.mxu1 %v176_v2 }
   0xe   :  { %96 = vmatpush.bf16.msra.mxu0 %v175_v3  ;;  %193 = vmatpush.bf16.msra.mxu1 %v175_v3 }
  0x12   :  { %97 = vmatpush.bf16.msra.mxu0 %v174_v4  ;;  %194 = vmatpush.bf16.msra.mxu1 %v174_v4 }
  0x16   :  { %98 = vmatpush.bf16.msra.mxu0 %v173_v5  ;;  %195 = vmatpush.bf16.msra.mxu1 %v173_v5 }
  0x1a   :  { %99 = vmatpush.bf16.msra.mxu0 %v172_v6  ;;  %196 = vmatpush.bf16.msra.mxu1 %v172_v6 }
  0x1e   :  { %100 = vmatpush.bf16.msra.mxu0 %v171_v7  ;;  %197 = vmatpush.bf16.msra.mxu1 %v171_v7 }
  0x21   :  { %101 = vmatmul.bf16.vlgmr.msra.gmra.mxu0 %v27_v12  ;;  %106 = vmatmul.bf16.vlgmr.msra.gmra.mxu1 %v28_v13 }
  0x9e   :  { %v102_v14 = vpop.f32.mrf.mxu0  ;;  %v107_v15 = vpop.f32.mrf.mxu1 }
  0xa6   :  { %v104_v16 = vpop.f32.mrf.mxu0  ;;  %v109_v17 = vpop.f32.mrf.mxu1 }
  0xa7   :  { %v182_v18 = vpack.c.bf16 %v104_v16, %v102_v14  ;;  %v187_v19 = vpack.c.bf16 %v109_v17, %v107_v15 }
  0xa9   :  { %183 = vst [vmem:[%s257_s2] sm:$0xff] %v182_v18  }
  0xaa   :  { %189 = vst [vmem:[%s257_s2 + $0x8] sm:$0xff] %v187_v19  }

// kernel: visual_transformer_forward.14
= control target key start
LH: loop header
LB: loop body
LE: loop exit
PB: predicated region body
PF: predicated region fallthrough
CT: control target
= control target key end

     0   :  { %vm42_vm0 = vcmask 1041408   ;;  %v627_v9 = vmov 128.0   ;;  %s910_s0 = inlined_call_operand.vmem [shape: bf16[34,128], index: 0, kind: input, shape index: {}]   ;;  %s911_s1 = inlined_call_operand.vmem [shape: f32[1,128], index: 1, kind: input, shape index: {}]   ;;  %s912_s2 = inlined_call_operand.vmem [shape: f32[1,128], index: 2, kind: input, shape index: {}]   ;;  %s913_s3 = inlined_call_operand.vmem [shape: bf16[128,384], index: 3, kind: input, shape index: {}]   ;;  %s914_s4 = inlined_call_operand.vmem [shape: f32[1,384], index: 4, kind: input, shape index: {}]   ;;  %s915_s5 = inlined_call_operand.vmem [shape: bf16[34,384], index: 5, kind: output, shape index: {}]  }
   0x1   :  { %v602_v0 = vld [vmem:[%s910_s0 + $0x8] sm:$0xff]   ;;  %v585_v1 = vld [vmem:[%s910_s0] sm:$0xff]   ;;  %v28_v2 = vld [vmem:[%s910_s0 + $0x10] sm:$0x1]  ;;  %615 = vrcp.f32 %v627_v9 }
   0x2   :  { %v590_v3 = vunpack.c.l.bf16 %v602_v0  ;;  %v586_v4 = vunpack.c.l.bf16 %v585_v1  ;;  %v33_v5 = vunpack.c.l.bf16 %v28_v2  ;;  %v591_v7 = vunpack.c.h.bf16 %v602_v0  ;;  %v548_v37 = vld [vmem:[%s913_s3 + $0xa8] sm:$0xf]  ;;  %v582_v38 = vld [vmem:[%s913_s3 + $0xb0] sm:$0xf0]  ;;  %v581_v39 = vld [vmem:[%s913_s3 + $0xac] sm:$0xf] }
   0x3   :  { %v587_v8 = vunpack.c.h.bf16 %v585_v1  ;;  %v549_v40 = vor.u32 %v582_v38, %v548_v37  ;;  %v550_v41 = vld [vmem:[%s913_s3 + $0xb4] sm:$0xf0]  ;;  %v556_v42 = vld [vmem:[%s913_s3 + $0xb0] sm:$0xf]  ;;  %v583_v43 = vld [vmem:[%s913_s3 + $0xb8] sm:$0xf0] }
   0x4   :  { %38 = vadd.xlane.f32.xlu1 %v590_v3  ;;  %34 = vadd.xlane.f32.xlu0 %v586_v4  ;;  %v43_v6 = vsel %vm42_vm0, %v33_v5, 0.0  ;;  %v553_v44 = vor.u32 %v581_v39, %v550_v41  ;;  %v557_v45 = vor.u32 %v583_v43, %v556_v42  ;;  %v536_v46 = vld [vmem:[%s913_s3 + $0x90] sm:$0xf]  ;;  %v579_v47 = vld [vmem:[%s913_s3 + $0x98] sm:$0xf0] }
   0x5   :  { %44 = vadd.xlane.f32.xlu2 %v43_v6  ;;  %361 = vmatpush.bf16.msra.mxu0 %v549_v40  ;;  %v578_v48 = vld [vmem:[%s913_s3 + $0x94] sm:$0xf]  ;;  %v537_v49 = vor.u32 %v579_v47, %v536_v46  ;;  %v538_v50 = vld [vmem:[%s913_s3 + $0x9c] sm:$0xf0]  ;;  %v544_v51 = vld [vmem:[%s913_s3 + $0x98] sm:$0xf] }
   0x6   :  { %604 = vmatpush.bf16.msra.mxu3 %v549_v40  ;;  %384 = vmatpush.bf16.msra.mxu1 %v553_v44  ;;  %v580_v52 = vld [vmem:[%s913_s3 + $0xa0] sm:$0xf0]  ;;  %v541_v53 = vor.u32 %v578_v48, %v538_v50  ;;  %v524_v55 = vld [vmem:[%s913_s3 + $0x78] sm:$0xf]  ;;  %v575_v57 = vld [vmem:[%s913_s3 + $0x7c] sm:$0xf] }
   0x7   :  { %v616_v10 = vpop.eup %615  ;;  %407 = vmatpush.bf16.msra.mxu2 %v557_v45  ;;  %v545_v54 = vor.u32 %v580_v52, %v544_v51  ;;  %v576_v56 = vld [vmem:[%s913_s3 + $0x80] sm:$0xf0]  ;;  %v526_v59 = vld [vmem:[%s913_s3 + $0x84] sm:$0xf0]  ;;  %v532_v60 = vld [vmem:[%s913_s3 + $0x80] sm:$0xf] }
   0x8   :  { %v47_v11 = vmul.f32 128.0, %v616_v10  ;;  %vm51_vm1 = vweird.f32 %v616_v10  ;;  %v525_v58 = vor.u32 %v576_v56, %v524_v55  ;;  %v577_v61 = vld [vmem:[%s913_s3 + $0x88] sm:$0xf0]  ;;  %v529_v62 = vor.u32 %v575_v57, %v526_v59  ;;  %v512_v0 = vld [vmem:[%s913_s3 + $0x60] sm:$0xf] }
   0x9   :  { %362 = vmatpush.bf16.msra.mxu0 %v537_v49  ;;  %v533_v63 = vor.u32 %v577_v61, %v532_v60  ;;  %v573_v1 = vld [vmem:[%s913_s3 + $0x68] sm:$0xf0]  ;;  %v572_v2 = vld [vmem:[%s913_s3 + $0x64] sm:$0xf]  ;;  %v574_v6 = vld [vmem:[%s913_s3 + $0x70] sm:$0xf0] }
   0xa   :  { %v48_v12 = vsub.f32 1.0, %v47_v11  ;;  %605 = vmatpush.bf16.msra.mxu3 %v537_v49  ;;  %385 = vmatpush.bf16.msra.mxu1 %v541_v53  ;;  %v500_v9 = vld [vmem:[%s913_s3 + $0x48] sm:$0xf]  ;;  %v569_v11 = vld [vmem:[%s913_s3 + $0x4c] sm:$0xf] }
   0xb   :  { %408 = vmatpush.bf16.msra.mxu2 %v545_v54  ;;  %v476_v39 = vld [vmem:[%s913_s3 + $0x18] sm:$0xf]  ;;  %v564_v40 = vld [vmem:[%s913_s3 + $0x20] sm:$0xf0]  ;;  %v563_v41 = vld [vmem:[%s913_s3 + $0x1c] sm:$0xf] }
   0xc   :  { %40 = vadd.xlane.f32.xlu1 %v591_v7  ;;  %36 = vadd.xlane.f32.xlu0 %v587_v8  ;;  %v49_v13 = vmul.f32 %v616_v10, %v48_v12  ;;  %v477_v44 = vor.u32 %v564_v40, %v476_v39  ;;  %v478_v45 = vld [vmem:[%s913_s3 + $0x24] sm:$0xf0]  ;;  %v484_v46 = vld [vmem:[%s913_s3 + $0x20] sm:$0xf]  ;;  %v565_v47 = vld [vmem:[%s913_s3 + $0x28] sm:$0xf0] }
   0xd   :  { %363 = vmatpush.bf16.msra.mxu0 %v525_v58  ;;  %v481_v50 = vor.u32 %v563_v41, %v478_v45  ;;  %v485_v51 = vor.u32 %v565_v47, %v484_v46  ;;  %v464_v55 = vld [vmem:[%s913_s3] sm:$0xf]  ;;  %v560_v59 = vld [vmem:[%s913_s3 + $0x4] sm:$0xf]  ;;  %v466_v60 = vld [vmem:[%s913_s3 + $0xc] sm:$0xf0] }
   0xe   :  { %v50_v14 = vadd.f32 %v616_v10, %v49_v13  ;;  %606 = vmatpush.bf16.msra.mxu3 %v525_v58  ;;  %386 = vmatpush.bf16.msra.mxu1 %v529_v62  ;;  %v561_v58 = vld [vmem:[%s913_s3 + $0x8] sm:$0xf0]  ;;  %v472_v62 = vld [vmem:[%s913_s3 + $0x8] sm:$0xf]  ;;  %v614_v41 = vld [vmem:[%s912_s2] ss:$0 sm:$0xff] }
   0xf   :  { %409 = vmatpush.bf16.msra.mxu2 %v533_v63  ;;  %v562_v63 = vld [vmem:[%s913_s3 + $0x10] sm:$0xf0] }
  0x10   :  { %v668_v15 = vsel %vm51_vm1, %v616_v10, %v50_v14  ;;  %v570_v10 = vld [vmem:[%s913_s3 + $0x50] sm:$0xf0] }
  0x11   :  { %v501_v14 = vor.u32 %v570_v10, %v500_v9 }
  0x77   :  { %v39_v16 = vpop.xlane.xlu1 %38  ;;  %v35_v17 = vpop.xlane.xlu0 %34 }
  0x78   :  { %v55_v18 = vmul.f32 %v668_v15, %v39_v16  ;;  %v53_v19 = vmul.f32 %v668_v15, %v35_v17  ;;  %v45_v24 = vpop.xlane.xlu2 %44  ;;  %v502_v16 = vld [vmem:[%s913_s3 + $0x54] sm:$0xf0]  ;;  %v508_v17 = vld [vmem:[%s913_s3 + $0x50] sm:$0xf] }
  0x79   :  { %v57_v27 = vmul.f32 %v668_v15, %v45_v24 }
  0x7a   :  { %v672_v20 = vsub.f32 %v590_v3, %v55_v18  ;;  %v674_v21 = vsub.f32 %v586_v4, %v53_v19  ;;  %v513_v3 = vor.u32 %v573_v1, %v512_v0  ;;  %v514_v4 = vld [vmem:[%s913_s3 + $0x6c] sm:$0xf0]  ;;  %v571_v18 = vld [vmem:[%s913_s3 + $0x58] sm:$0xf0]  ;;  %v465_v1 = vor.u32 %v561_v58, %v464_v55 }
  0x7b   :  { %v687_v32 = vsub.f32 %v33_v5, %v57_v27  ;;  %v520_v5 = vld [vmem:[%s913_s3 + $0x68] sm:$0xf]  ;;  %v509_v24 = vor.u32 %v571_v18, %v508_v17  ;;  %v488_v27 = vld [vmem:[%s913_s3 + $0x30] sm:$0xf] }
  0x7c   :  { %v65_v22 = vmul.f32 %v672_v20, %v672_v20  ;;  %v63_v23 = vmul.f32 %v674_v21, %v674_v21  ;;  %364 = vmatpush.bf16.msra.mxu0 %v513_v3  ;;  %607 = vmatpush.bf16.msra.mxu3 %v513_v3  ;;  %v469_v3 = vor.u32 %v560_v59, %v466_v60 }
  0x7d   :  { %v67_v35 = vmul.f32 %v687_v32, %v687_v32 }
  0x7e   :  { %72 = vadd.xlane.f32.xlu1 %v65_v22  ;;  %68 = vadd.xlane.f32.xlu2 %v63_v23  ;;  %v505_v23 = vor.u32 %v569_v11, %v502_v16 }
  0x7f   :  { %v41_v25 = vpop.xlane.xlu1 %40  ;;  %v37_v26 = vpop.xlane.xlu0 %36  ;;  %v76_v36 = vsel %vm42_vm0, %v67_v35, 0.0  ;;  %v496_v35 = vld [vmem:[%s913_s3 + $0x38] sm:$0xf] }
  0x80   :  { %v56_v28 = vmul.f32 %v668_v15, %v41_v25  ;;  %v54_v29 = vmul.f32 %v668_v15, %v37_v26  ;;  %365 = vmatpush.bf16.msra.mxu0 %v501_v14  ;;  %608 = vmatpush.bf16.msra.mxu3 %v501_v14 }
  0x82   :  { %v683_v30 = vsub.f32 %v591_v7, %v56_v28  ;;  %v685_v31 = vsub.f32 %v587_v8, %v54_v29  ;;  %v517_v7 = vor.u32 %v572_v2, %v514_v4  ;;  %v521_v8 = vor.u32 %v574_v6, %v520_v5  ;;  %v567_v28 = vld [vmem:[%s913_s3 + $0x38] sm:$0xf0]  ;;  %v566_v29 = vld [vmem:[%s913_s3 + $0x34] sm:$0xf] }
  0x83   :  { %v473_v4 = vor.u32 %v562_v63, %v472_v62 }
  0x84   :  { %v66_v33 = vmul.f32 %v683_v30, %v683_v30  ;;  %v64_v34 = vmul.f32 %v685_v31, %v685_v31  ;;  %387 = vmatpush.bf16.msra.mxu1 %v517_v7  ;;  %410 = vmatpush.bf16.msra.mxu2 %v521_v8 }
  0x86   :  { %74 = vadd.xlane.f32.xlu2 %v66_v33  ;;  %70 = vadd.xlane.f32.xlu0 %v64_v34  ;;  %v490_v33 = vld [vmem:[%s913_s3 + $0x3c] sm:$0xf0]  ;;  %v489_v34 = vor.u32 %v567_v28, %v488_v27 }
  0x87   :  { %v493_v37 = vor.u32 %v566_v29, %v490_v33  ;;  %v613_v33 = vld [vmem:[%s911_s1] ss:$0 sm:$0xff] }
  0x88   :  { %388 = vmatpush.bf16.msra.mxu1 %v505_v23  ;;  %411 = vmatpush.bf16.msra.mxu2 %v509_v24 }
  0x89   :  { %366 = vmatpush.bf16.msra.mxu0 %v489_v34  ;;  %609 = vmatpush.bf16.msra.mxu3 %v489_v34 }
  0x8c   :  { %389 = vmatpush.bf16.msra.mxu1 %v493_v37 }
  0x8d   :  { %367 = vmatpush.bf16.msra.mxu0 %v477_v44  ;;  %610 = vmatpush.bf16.msra.mxu3 %v477_v44 }
  0x8e   :  { %77 = vadd.xlane.f32.xlu0 %v76_v36  ;;  %v568_v36 = vld [vmem:[%s913_s3 + $0x40] sm:$0xf0] }
  0x8f   :  { %v497_v38 = vor.u32 %v568_v36, %v496_v35 }
  0x90   :  { %390 = vmatpush.bf16.msra.mxu1 %v481_v50 }
  0x91   :  { %412 = vmatpush.bf16.msra.mxu2 %v497_v38  ;;  %368 = vmatpush.bf16.msra.mxu0 %v465_v1 }
  0x92   :  { %611 = vmatpush.bf16.msra.mxu3 %v465_v1 }
  0x94   :  { %391 = vmatpush.bf16.msra.mxu1 %v469_v3 }
  0x95   :  { %413 = vmatpush.bf16.msra.mxu2 %v485_v51 }
  0x99   :  { %414 = vmatpush.bf16.msra.mxu2 %v473_v4 }
  0xf1   :  { %v73_v12 = vpop.xlane.xlu1 %72  ;;  %v69_v13 = vpop.xlane.xlu2 %68 }
  0xf2   :  { %v81_v19 = vmul.f32 %v73_v12, %v668_v15  ;;  %v79_v22 = vmul.f32 %v69_v13, %v668_v15 }
  0xf4   :  { %v788_v25 = vadd.f32 1e-05, %v81_v19  ;;  %v790_v26 = vadd.f32 1e-05, %v79_v22 }
  0xf6   :  { %617 = vrsqrt.f32 %v788_v25  ;;  %vm115_vm2 = vweird.f32 %v788_v25  ;;  %vm95_vm6 = vweird.f32 %v790_v26 }
  0xf7   :  { %619 = vrsqrt.f32 %v790_v26 }
  0xf9   :  { %v75_v42 = vpop.xlane.xlu2 %74  ;;  %v71_v43 = vpop.xlane.xlu0 %70 }
  0xfa   :  { %v82_v48 = vmul.f32 %v75_v42, %v668_v15  ;;  %v80_v49 = vmul.f32 %v71_v43, %v668_v15 }
  0xfc   :  { %v618_v52 = vpop.eup %617  ;;  %v87_v53 = vadd.f32 1e-05, %v82_v48  ;;  %v832_v54 = vadd.f32 1e-05, %v80_v49 }
  0xfd   :  { %v620_v56 = vpop.eup %619  ;;  %v110_v57 = vmul.f32 %v618_v52, %v788_v25  ;;  %vm116_vm3 = vweird.f32 %v618_v52 }
  0xfe   :  { %v90_v61 = vmul.f32 %v620_v56, %v790_v26  ;;  %621 = vrsqrt.f32 %v87_v53  ;;  %vm857_vm4 = vmor %vm115_vm2, %vm116_vm3  ;;  %vm96_vm5 = vweird.f32 %v620_v56  ;;  %vm125_vm8 = vweird.f32 %v87_v53 }
  0xff   :  { %v111_v0 = vmul.f32 %v618_v52, %v110_v57  ;;  %623 = vrsqrt.f32 %v832_v54  ;;  %vm97_vm7 = vmor %vm95_vm6, %vm96_vm5  ;;  %vm105_vm12 = vweird.f32 %v832_v54 }
 0x100   :  { %v91_v2 = vmul.f32 %v620_v56, %v90_v61 }
 0x101   :  { %v112_v5 = vmul.f32 0.5, %v111_v0  ;;  %v78_v6 = vpop.xlane.xlu0 %77 }
 0x102   :  { %v92_v7 = vmul.f32 0.5, %v91_v2  ;;  %v83_v8 = vmul.f32 %v78_v6, %v668_v15 }
 0x103   :  { %v113_v9 = vsub.f32 1.5, %v112_v5 }
 0x104   :  { %v622_v10 = vpop.eup %621  ;;  %v93_v11 = vsub.f32 1.5, %v92_v7  ;;  %v88_v12 = vadd.f32 1e-05, %v83_v8 }
 0x105   :  { %v624_v13 = vpop.eup %623  ;;  %v114_v14 = vmul.f32 %v618_v52, %v113_v9  ;;  %v120_v16 = vmul.f32 %v622_v10, %v87_v53  ;;  %vm126_vm9 = vweird.f32 %v622_v10 }
 0x106   :  { %v94_v18 = vmul.f32 %v620_v56, %v93_v11  ;;  %v100_v15 = vmul.f32 %v624_v13, %v832_v54  ;;  %625 = vrsqrt.f32 %v88_v12  ;;  %vm127_vm10 = vmor %vm125_vm8, %vm126_vm9  ;;  %vm106_vm11 = vweird.f32 %v624_v13 }
 0x107   :  { %v121_v19 = vmul.f32 %v622_v10, %v120_v16  ;;  %v118_v23 = vsel %vm857_vm4, %v618_v52, %v114_v14  ;;  %vm107_vm13 = vmor %vm105_vm12, %vm106_vm11  ;;  %vm135_vm14 = vweird.f32 %v88_v12 }
 0x108   :  { %v101_v22 = vmul.f32 %v624_v13, %v100_v15  ;;  %v98_v25 = vsel %vm97_vm7, %v620_v56, %v94_v18  ;;  %v141_v34 = vmul.f32 %v118_v23, %v672_v20 }
 0x109   :  { %v122_v24 = vmul.f32 0.5, %v121_v19  ;;  %v139_v35 = vmul.f32 %v98_v25, %v674_v21 }
 0x10a   :  { %v102_v27 = vmul.f32 0.5, %v101_v22  ;;  %v150_v42 = vmul.f32 %v613_v33, %v141_v34 }
 0x10b   :  { %v123_v28 = vsub.f32 1.5, %v122_v24  ;;  %v148_v44 = vmul.f32 %v613_v33, %v139_v35 }
 0x10c   :  { %v626_v29 = vpop.eup %625  ;;  %v103_v26 = vsub.f32 1.5, %v102_v27  ;;  %v159_v49 = vadd.f32 %v614_v41, %v150_v42 }
 0x10d   :  { %v124_v36 = vmul.f32 %v622_v10, %v123_v28  ;;  %v130_v37 = vmul.f32 %v626_v29, %v88_v12  ;;  %vm136_vm15 = vweird.f32 %v626_v29  ;;  %v157_v51 = vadd.f32 %v614_v41, %v148_v44 }
 0x10e   :  { %v104_v38 = vmul.f32 %v624_v13, %v103_v26  ;;  %vm137_vm0 = vmor %vm135_vm14, %vm136_vm15 }
 0x10f   :  { %v128_v39 = vsel %vm127_vm10, %v622_v10, %v124_v36  ;;  %v131_v40 = vmul.f32 %v626_v29, %v130_v37 }
 0x110   :  { %v142_v20 = vmul.f32 %v128_v39, %v683_v30  ;;  %v108_v43 = vsel %vm107_vm13, %v624_v13, %v104_v38 }
 0x111   :  { %v140_v21 = vmul.f32 %v108_v43, %v685_v31  ;;  %v132_v45 = vmul.f32 0.5, %v131_v40 }
 0x112   :  { %v151_v46 = vmul.f32 %v613_v33, %v142_v20 }
 0x113   :  { %v149_v47 = vmul.f32 %v613_v33, %v140_v21  ;;  %v133_v48 = vsub.f32 1.5, %v132_v45 }
 0x114   :  { %v160_v50 = vadd.f32 %v614_v41, %v151_v46 }
 0x115   :  { %v158_v52 = vadd.f32 %v614_v41, %v149_v47  ;;  %v134_v53 = vmul.f32 %v626_v29, %v133_v48 }
 0x116   :  { %v600_v54 = vpack.c.bf16 %v160_v50, %v159_v49 }
 0x117   :  { %v595_v55 = vpack.c.bf16 %v158_v52, %v157_v51  ;;  %v138_v56 = vsel %vm137_vm0, %v626_v29, %v134_v53 }
 0x118   :  { %603 = vst [vmem:[#allocation2 + $0x8] sm:$0xff] %v600_v54   ;;  %v143_v30 = vmul.f32 %v138_v56, %v687_v32  ;;  %v209_v32 = vld [vmem:[%s914_s4] sm:$0x7] }
 0x119   :  { %596 = vst [vmem:[#allocation2] sm:$0xff] %v595_v55   ;;  %v211_v0 = vperm.slane %v209_v32, 0  ;;  %v212_v1 = vperm.slane %v209_v32, 1  ;;  %v213_v7 = vperm.slane %v209_v32, 2 }
 0x11a   :  { %v152_v57 = vmul.f32 %v613_v33, %v143_v30 }
 0x11c   :  { %v161_v31 = vadd.f32 %v614_v41, %v152_v57 }
 0x11e   :  { %v166_v58 = vpack.c.bf16 %v161_v31, %v161_v31 }
 0x11f   :  { %v559_v59 = vld [vmem:[#allocation2 + $0x8] sm:$0xff] }
 0x120   :  { %171 = vst [vmem:[#allocation2 + $0x10] sm:$0x1] %v166_v58  ;;  %v558_v60 = vld [vmem:[#allocation2] sm:$0xff]  ;;  %374 = vmatmul.bf16.vlgmr.msra.gmra.mxu3 %v559_v59 }
 0x121   :  { %369 = vmatmul.bf16.vlgmr.msra.gmra.mxu0 %v558_v60  ;;  %392 = vmatmul.bf16.vlgmr.msra.gmra.mxu1 %v558_v60 }
 0x122   :  { %415 = vmatmul.bf16.vlgmr.msra.gmra.mxu2 %v558_v60 }
 0x127   :  { %v176_v61 = vld [vmem:[#allocation2 + $0x10] sm:$0x1] }
 0x128   :  { %v226_v62 = vunpack.c.l.b16 %v176_v61 }
 0x12a   :  { %v229_v63 = vpack.c.b16 %v226_v62, %v226_v62 }
 0x130   :  { %379 = vmatmul.bf16.gmra.mxu3 %v229_v63 }
 0x131   :  { %397 = vmatmul.bf16.gmra.mxu1 %v559_v59 }
 0x132   :  { %420 = vmatmul.bf16.gmra.mxu2 %v559_v59 }
 0x141   :  { %402 = vmatmul.bf16.gmra.mxu1 %v229_v63 }
 0x142   :  { %425 = vmatmul.bf16.gmra.mxu2 %v229_v63 }
 0x19e   :  { %v370_v2 = vpop.f32.mrf.mxu0  ;;  %v393_v3 = vpop.f32.mrf.mxu1 }
 0x19f   :  { %v371_v4 = vadd.f32 %v370_v2, %v211_v0  ;;  %v394_v5 = vadd.f32 %v393_v3, %v212_v1 }
 0x1a1   :  { %v430_v6 = vpack.c.bf16 %v394_v5, %v371_v4 }
 0x1a3   :  { %440 = vst [vmem:[%s915_s5] sm:$0xff] %v430_v6  ;;  %v375_v8 = vpop.f32.mrf.mxu3 }
 0x1a4   :  { %v376_v23 = vadd.f32 %v375_v8, %v211_v0 }
 0x1a5   :  { %v416_v9 = vpop.f32.mrf.mxu2 }
 0x1a6   :  { %v417_v10 = vadd.f32 %v416_v9, %v213_v7  ;;  %v372_v11 = vpop.f32.mrf.mxu0  ;;  %v395_v12 = vpop.f32.mrf.mxu1 }
 0x1a7   :  { %v373_v13 = vadd.f32 %v372_v11, %v211_v0  ;;  %v396_v14 = vadd.f32 %v395_v12, %v212_v1 }
 0x1a8   :  { %v431_v16 = vpack.c.bf16 %v417_v10, %v417_v10 }
 0x1a9   :  { %v432_v17 = vpack.c.bf16 %v396_v14, %v373_v13 }
 0x1aa   :  { %441 = vst [vmem:[%s915_s5 + $0x8] sm:$0xf] %v431_v16 }
 0x1ab   :  { %442 = vst [vmem:[%s915_s5 + $0xc] sm:$0xff] %v432_v17  ;;  %v377_v18 = vpop.f32.mrf.mxu3 }
 0x1ac   :  { %v378_v26 = vadd.f32 %v377_v18, %v211_v0 }
 0x1ad   :  { %v418_v15 = vpop.f32.mrf.mxu2 }
 0x1ae   :  { %v419_v19 = vadd.f32 %v418_v15, %v213_v7  ;;  %v398_v22 = vpop.f32.mrf.mxu1 }
 0x1af   :  { %v399_v24 = vadd.f32 %v398_v22, %v212_v1 }
 0x1b0   :  { %v433_v25 = vpack.c.bf16 %v419_v19, %v419_v19 }
 0x1b1   :  { %v434_v27 = vpack.c.bf16 %v399_v24, %v376_v23 }
 0x1b2   :  { %443 = vst [vmem:[%s915_s5 + $0x14] sm:$0xf] %v433_v25 }
 0x1b3   :  { %444 = vst [vmem:[%s915_s5 + $0x18] sm:$0xff] %v434_v27  ;;  %v380_v28 = vpop.f32.mrf.mxu3 }
 0x1b4   :  { %v381_v42 = vadd.f32 %v380_v28, %v211_v0 }
 0x1b5   :  { %v421_v29 = vpop.f32.mrf.mxu2 }
 0x1b6   :  { %v422_v33 = vadd.f32 %v421_v29, %v213_v7  ;;  %v400_v34 = vpop.f32.mrf.mxu1 }
 0x1b7   :  { %v401_v35 = vadd.f32 %v400_v34, %v212_v1 }
 0x1b8   :  { %v435_v36 = vpack.c.bf16 %v422_v33, %v422_v33 }
 0x1b9   :  { %v436_v37 = vpack.c.bf16 %v401_v35, %v378_v26 }
 0x1ba   :  { %445 = vst [vmem:[%s915_s5 + $0x20] sm:$0xf] %v435_v36 }
 0x1bb   :  { %446 = vst [vmem:[%s915_s5 + $0x24] sm:$0xff] %v436_v37  ;;  %v382_v38 = vpop.f32.mrf.mxu3 }
 0x1bd   :  { %v423_v39 = vpop.f32.mrf.mxu2 }
 0x1be   :  { %v424_v40 = vadd.f32 %v423_v39, %v213_v7  ;;  %v403_v41 = vpop.f32.mrf.mxu1 }
 0x1bf   :  { %v404_v20 = vadd.f32 %v403_v41, %v212_v1 }
 0x1c0   :  { %v437_v43 = vpack.c.bf16 %v424_v40, %v424_v40 }
 0x1c1   :  { %v438_v44 = vpack.c.bf16 %v404_v20, %v381_v42 }
 0x1c2   :  { %447 = vst [vmem:[%s915_s5 + $0x2c] sm:$0xf] %v437_v43 }
 0x1c3   :  { %448 = vst [vmem:[%s915_s5 + $0x30] sm:$0x11] %v438_v44 }
 0x1c5   :  { %v426_v21 = vpop.f32.mrf.mxu2 }
 0x1c6   :  { %v427_v45 = vadd.f32 %v426_v21, %v213_v7  ;;  %v405_v46 = vpop.f32.mrf.mxu1 }
 0x1c8   :  { %v439_v47 = vpack.c.bf16 %v427_v45, %v427_v45 }
 0x1ca   :  { %449 = vst [vmem:[%s915_s5 + $0x38] sm:$0x1] %v439_v47 }
 0x1cd   :  { %v428_v48 = vpop.f32.mrf.mxu2 }

// kernel: visual_transformer_forward.13
= control target key start
LH: loop header
LB: loop body
LE: loop exit
PB: predicated region body
PF: predicated region fallthrough
CT: control target
= control target key end

     0   :  { %s522_s21 = smov 0   ;;  %s594_s0 = inlined_call_operand.vmem [shape: bf16[2,16,128], index: 0, kind: input, shape index: {}]   ;;  %s595_s1 = inlined_call_operand.vmem [shape: f32[1,128], index: 1, kind: input, shape index: {}]   ;;  %s596_s2 = inlined_call_operand.vmem [shape: f32[1,128], index: 2, kind: input, shape index: {}]   ;;  %s597_s3 = inlined_call_operand.vmem [shape: f32[16,128], index: 3, kind: input, shape index: {}]   ;;  %s598_s4 = inlined_call_operand.vmem [shape: f32[1,128], index: 4, kind: input, shape index: {}]   ;;  %s599_s5 = inlined_call_operand.vmem [shape: f32[1,128], index: 5, kind: input, shape index: {}]   ;;  %s600_s6 = inlined_call_operand.vmem [shape: bf16[2,17,128], index: 6, kind: output, shape index: {}]  }
   0x1 LB: > { %s443_s22 = sadd.s32 4294967295, %s484_s21   ;;  %p447_p0 = scmp.ge.s32.totalorder %s484_s21, 1  ;;  %s484_s21 = sphi %s522_s21, %s16_s21  }
   0x2   : > { %p212_p1 = scmp.lt.s32.totalorder %s484_s21, 3 }
   0x4   : > { %p213_p2 = pnand %p447_p0, %p212_p1 }
   0x5   : > { %p242_p3 = scmp.lt.s32.totalorder (!%p213_p2), %s443_s22, 1 }
   0x6   : > { %216 = sbr.rel (%p213_p2) target bundleno = 309 (0x135), region = 44 }
   0xb   : > { %v254_v0 = vld [vmem:[%s595_s1] sm:$0x1]  ;;  %vm265_vm0 = vcmask 1040384   ;;  %s604_s22 = smov (!%p242_p3, %s443_s22), 1  ;;  %v262_v6 = vld [vmem:[%s597_s3 + $0x8] sm:$0xff]  ;;  %v486_v11 = vmov 128.0  }
   0xc   : > { %v255_v1 = vld [vmem:[%s596_s2] sm:$0x1]  ;;  %s453_s27 = sshll.u32 %s604_s22, 3  ;;  %470 = vrcp.f32 %v486_v11  ;;  %s458_s11 = smul.u32 12, %s604_s22  ;;  %vm299_vm5 = vsmask.f32 256 }
   0xd   : > { %v256_v2 = vadd.f32 %v255_v1, %v254_v0  ;;  %s246_s30 = scalar_lea.vmem %s594_s0, %s453_s27  ;;  %v261_v5 = vld [vmem:[%s597_s3] sm:$0xff]  ;;  %vm568_vm7 = vmand %vm265_vm0, %vm299_vm5  ;;  %vm378_vm13 = vcmask 1043456   ;;  %vm379_vm14 = vsmask.f32 7938 }
   0xe   : > { %v455_v4 = vld [vmem:[%s246_s30] sm:$0xff]   ;;  %s564_s18 = scalar_lea.vmem %s600_s6, %s458_s11  ;;  %vm380_vm15 = vmand %vm378_vm13, %vm379_vm14 }
   0xf   : > { %v266_v3 = vsel %vm265_vm0, %v256_v2, 0.0  ;;  %v456_v7 = vunpack.c.l.bf16 %v455_v4  ;;  %v457_v8 = vunpack.c.h.bf16 %v455_v4  ;;  %v252_v49 = vld [vmem:[%s598_s4] sm:$0x1] }
  0x10   : > { %267 = vadd.xlane.f32.xlu0 %v266_v3  ;;  %v253_v53 = vld [vmem:[%s599_s5] sm:$0x1] }
  0x11   : > { %v263_v9 = vadd.f32 %v456_v7, %v261_v5  ;;  %v264_v10 = vadd.f32 %v457_v8, %v262_v6  ;;  %v301_v61 = vld [vmem:[%s564_s18] sm:$0x1] }
  0x12   : > { %v471_v12 = vpop.eup %470  ;;  %v468_v62 = vld [vmem:[%s598_s4] ss:$0 sm:$0xff] }
  0x13   : > { %306 = vadd.xlane.f32.xlu1 %v264_v10  ;;  %v270_v13 = vmul.f32 128.0, %v471_v12  ;;  %vm274_vm1 = vweird.f32 %v471_v12 }
  0x15   : > { %v271_v14 = vsub.f32 1.0, %v270_v13 }
  0x17   : > { %v272_v15 = vmul.f32 %v471_v12, %v271_v14 }
  0x18   : > { %304 = vadd.xlane.f32.xlu0 %v263_v9 }
  0x19   : > { %v273_v16 = vadd.f32 %v471_v12, %v272_v15 }
  0x1b   : > { %v275_v17 = vsel %vm274_vm1, %v471_v12, %v273_v16 }
  0x83   : > { %v268_v18 = vpop.xlane.xlu0 %267 }
  0x84   : > { %v276_v19 = vmul.f32 %v275_v17, %v268_v18 }
  0x86   : > { %v277_v20 = vsub.f32 %v256_v2, %v276_v19  ;;  %v307_v24 = vpop.xlane.xlu1 %306  ;;  %v469_v2 = vld [vmem:[%s599_s5] ss:$0 sm:$0xff] }
  0x87   : > { %v309_v27 = vmul.f32 %v307_v24, %v275_v17 }
  0x88   : > { %v278_v21 = vmul.f32 %v277_v20, %v277_v20 }
  0x89   : > { %v550_v29 = vsub.f32 %v264_v10, %v309_v27 }
  0x8a   : > { %v279_v22 = vsel %vm265_vm0, %v278_v21, 0.0  ;;  %vm356_vm0 = vsmask.f32 4368 }
  0x8b   : > { %280 = vadd.xlane.f32.xlu1 %v279_v22  ;;  %v305_v23 = vpop.xlane.xlu0 %304  ;;  %v313_v30 = vmul.f32 %v550_v29, %v550_v29  ;;  %vm357_vm1 = vmor %vm299_vm5, %vm356_vm0 }
  0x8c   : > { %v308_v25 = vmul.f32 %v305_v23, %v275_v17 }
  0x8e   : > { %v310_v26 = vsub.f32 %v263_v9, %v308_v25  ;;  %v385_v25 = vld [vmem:[%s564_s18 + $0x8] sm:$0x1] }
  0x90   : > { %v312_v28 = vmul.f32 %v310_v26, %v310_v26 }
  0x92   : > { %314 = vadd.xlane.f32.xlu2 %v312_v28 }
  0x9a   : > { %316 = vadd.xlane.f32.xlu2 %v313_v30 }
  0xfe   : > { %v281_v31 = vpop.xlane.xlu1 %280 }
  0xff   : > { %v282_v32 = vmul.f32 %v281_v31, %v275_v17 }
 0x101   : > { %v283_v33 = vadd.f32 1e-05, %v282_v32 }
 0x103   : > { %472 = vrsqrt.f32 %v283_v33  ;;  %vm290_vm3 = vweird.f32 %v283_v33 }
 0x105   : > { %v315_v34 = vpop.xlane.xlu2 %314 }
 0x106   : > { %v318_v35 = vmul.f32 %v315_v34, %v275_v17 }
 0x108   : > { %v320_v36 = vadd.f32 1e-05, %v318_v35 }
 0x109   : > { %v473_v37 = vpop.eup %472 }
 0x10a   : > { %v285_v38 = vmul.f32 %v473_v37, %v283_v33  ;;  %474 = vrsqrt.f32 %v320_v36  ;;  %vm291_vm2 = vweird.f32 %v473_v37  ;;  %vm328_vm8 = vweird.f32 %v320_v36 }
 0x10b   : > { %vm292_vm4 = vmor %vm290_vm3, %vm291_vm2 }
 0x10c   : > { %v286_v39 = vmul.f32 %v473_v37, %v285_v38 }
 0x10d   : > { %v317_v40 = vpop.xlane.xlu2 %316 }
 0x10e   : > { %v287_v41 = vmul.f32 0.5, %v286_v39  ;;  %v319_v42 = vmul.f32 %v317_v40, %v275_v17 }
 0x110   : > { %v475_v43 = vpop.eup %474  ;;  %v288_v44 = vsub.f32 1.5, %v287_v41  ;;  %v321_v45 = vadd.f32 1e-05, %v319_v42 }
 0x111   : > { %v323_v46 = vmul.f32 %v475_v43, %v320_v36  ;;  %vm329_vm6 = vweird.f32 %v475_v43 }
 0x112   : > { %v289_v47 = vmul.f32 %v473_v37, %v288_v44  ;;  %476 = vrsqrt.f32 %v321_v45  ;;  %vm330_vm9 = vmor %vm328_vm8, %vm329_vm6  ;;  %vm338_vm11 = vweird.f32 %v321_v45 }
 0x113   : > { %v324_v48 = vmul.f32 %v475_v43, %v323_v46 }
 0x114   : > { %v293_v50 = vsel %vm292_vm4, %v473_v37, %v289_v47 }
 0x115   : > { %v294_v51 = vmul.f32 %v293_v50, %v277_v20  ;;  %v325_v52 = vmul.f32 0.5, %v324_v48 }
 0x117   : > { %v295_v54 = vmul.f32 %v294_v51, %v252_v49  ;;  %v326_v55 = vsub.f32 1.5, %v325_v52 }
 0x118   : > { %v477_v56 = vpop.eup %476 }
 0x119   : > { %v296_v58 = vadd.f32 %v295_v54, %v253_v53  ;;  %v327_v59 = vmul.f32 %v475_v43, %v326_v55  ;;  %v333_v60 = vmul.f32 %v477_v56, %v321_v45  ;;  %vm339_vm10 = vweird.f32 %v477_v56 }
 0x11a   : > { %vm340_vm12 = vmor %vm338_vm11, %vm339_vm10 }
 0x11b   : > { %v297_v63 = vpack.c.bf16 %v296_v58, %v296_v58  ;;  %v331_v0 = vsel %vm330_vm9, %v475_v43, %v327_v59  ;;  %v334_v1 = vmul.f32 %v477_v56, %v333_v60 }
 0x11c   : > { %v342_v3 = vmul.f32 %v331_v0, %v310_v26 }
 0x11d   : > { %v302_v4 = vsel %vm568_vm7, %v297_v63, %v301_v61  ;;  %v335_v5 = vmul.f32 0.5, %v334_v1 }
 0x11e   : > { %303 = vst [vmem:[%s564_s18] sm:$0x1] %v302_v4  ;;  %v347_v6 = vmul.f32 %v468_v62, %v342_v3 }
 0x11f   : > { %v336_v7 = vsub.f32 1.5, %v335_v5 }
 0x120   : > { %v352_v8 = vadd.f32 %v469_v2, %v347_v6 }
 0x121   : > { %v337_v9 = vmul.f32 %v477_v56, %v336_v7 }
 0x122   : > { %v354_v10 = vpack.c.bf16 %v352_v8, %v352_v8 }
 0x123   : > { %v341_v11 = vsel %vm340_vm12, %v477_v56, %v337_v9 }
 0x124   : > { %v359_v12 = vshrl.u32 %v354_v10, 16  ;;  %v343_v13 = vmul.f32 %v341_v11, %v550_v29  ;;  %v362_v15 = vshll.u32 %v354_v10, 16 }
 0x125   : > { %v381_v19 = vld [vmem:[%s564_s18] sm:$0xf] }
 0x126   : > { %v361_v14 = vrot.slane %v359_v12, 7  ;;  %v348_v16 = vmul.f32 %v468_v62, %v343_v13 }
 0x128   : > { %v364_v17 = vor.u32 %v362_v15, %v361_v14  ;;  %v353_v18 = vadd.f32 %v469_v2, %v348_v16  ;;  %v365_v26 = vrot.slane %v361_v14, 4 }
 0x12a   : > { %v382_v20 = vsel %vm380_vm15, %v364_v17, %v381_v19  ;;  %v355_v21 = vpack.c.bf16 %v353_v18, %v353_v18 }
 0x12b   : > { %383 = vst [vmem:[%s564_s18] sm:$0xf] %v382_v20 }
 0x12c   : > { %v367_v22 = vshrl.u32 %v355_v21, 16  ;;  %v370_v24 = vshll.u32 %v355_v21, 16 }
 0x12e   : > { %v369_v23 = vrot.slane %v367_v22, 7 }
 0x130   : > { %v372_v27 = vor.u32 %v370_v24, %v369_v23  ;;  %v374_v28 = vrot.slane %v369_v23, 4 }
 0x132   : > { %v373_v29 = vsel %vm357_vm1, %v365_v26, %v372_v27  ;;  %v386_v30 = vsel %vm568_vm7, %v374_v28, %v385_v25 }
 0x133   : > { %384 = vst [vmem:[%s564_s18 + $0x4] sm:$0xf] %v373_v29 }
 0x134   : > { %387 = vst [vmem:[%s564_s18 + $0x8] sm:$0x1] %v386_v30 }
 0x135 PF: > { %s16_s21 = sadd.s32 1, %s484_s21  }
 0x136   : > { %p13_p4 = scmp.ge.s32.totalorder %s16_s21, 4  }
 0x138   :  { %15 = sbr.rel (!%p13_p4) target bundleno = 1 (0x1), region = 74 }

// kernel: visual_transformer_forward.15
= control target key start
LH: loop header
LB: loop body
LE: loop exit
PB: predicated region body
PF: predicated region fallthrough
CT: control target
= control target key end

     0   :  { %s1270_s12 = smov 0   ;;  %s1272_s13 = smov 0   ;;  %s1526_s0 = inlined_call_operand.vmem [shape: bf16[2,17,384], index: 0, kind: input, shape index: {}, may-alias: {0,1,2}]   ;;  %s1527_s1 = inlined_call_operand.vmem [shape: bf16[2,17,384], index: 1, kind: input, shape index: {}, may-alias: {0,1,2}]   ;;  %s1528_s2 = inlined_call_operand.vmem [shape: bf16[2,17,384], index: 2, kind: input, shape index: {}, may-alias: {0,1,2}]   ;;  %s1529_s3 = inlined_call_operand.vmem [shape: bf16[2,17,128], index: 3, kind: output, shape index: {}]  }
   0x1   :  { %s1274_s14 = smov 0   ;;  %s1276_s15 = smov 0  }
   0x2   :  { %s1278_s16 = smov 0  }
   0x3 LB: > { %s25_s17 = sadd.s32 1, %s1240_s15  ;;  %p41_p1 = scmp.ne.s32.totalorder %s1232_s13, %s1228_s12  ;;  %s1244_s16 = sphi %s1278_s16, %s13_s16   ;;  %s1240_s15 = sphi %s1276_s15, %s1534_s15   ;;  %s1236_s14 = sphi %s1274_s14, %s1533_s14   ;;  %s1232_s13 = sphi %s1272_s13, %s1532_s13   ;;  %s1228_s12 = sphi %s1270_s12, %s1531_s12  }
   0x4   : > { %p27_p0 = scmp.ge.s32.totalorder %s25_s17, 2  ;;  %p42_p2 = scmp.eq.s32.totalorder %s1244_s16, 0 }
   0x5   : > { %s34_s20 = sadd.s32 1, %s1232_s13  ;;  %p1063_p5 = scmp.ge.s32.totalorder %s1244_s16, 2 }
   0x6   : > { %s1536_s17 = smov (%p27_p0, %s25_s17), 0  ;;  %p1301_p3 = por %p42_p2, %p41_p1 }
   0x7   : > { %s29_s19 = ssub.s32 %s1240_s15, %s1536_s17  ;;  %155 = sbr.rel (%p1063_p5) target bundleno = 36 (0x24), region = 16 }
   0x8   : > { %p32_p4 = scmp.eq.s32.totalorder %s29_s19, 0 }
   0xa   : > { %s1309_s21 = scalar_select %p32_p4, %s1232_s13, %s34_s20  }
   0xc   : > { %158 = sbr.rel (!%p1301_p3) target bundleno = 20 (0x14), region = 20  ;;  %s160_s22 = sand.u32 (%p1301_p3), 1, %s1232_s13  }
   0xd   : > { %s1109_s23 = smul.u32 (%p1301_p3), 36, %s1240_s15 }
   0xe   : > { %s1108_s24 = smul.u32 (%p1301_p3), 12, %s160_s22 }
   0xf   : > { %s166_s27 = scalar_lea.vmem (%p1301_p3), %s1526_s0, %s1109_s23 }
  0x10   : > { %v183_v0 = vld [vmem:[%s166_s27] sm:$0xf] (%p1301_p3)  ;;  %v185_v1 = vld [vmem:[%s166_s27 + $0xc] sm:$0xf] (%p1301_p3)  ;;  %s162_s28 = scalar_lea.vmem (%p1301_p3), [#allocation2], %s1108_s24 }
  0x11   : > { %184 = vst [vmem:[%s162_s28] sm:$0xf] %v183_v0  ;;  %v187_v2 = vld [vmem:[%s166_s27 + $0x18] sm:$0xf] }
  0x12   : > { %186 = vst [vmem:[%s162_s28 + $0x4] sm:$0xf] %v185_v1 }
  0x13   : > { %188 = vst [vmem:[%s162_s28 + $0x8] sm:$0xf] %v187_v2 }
  0x14 PF: > { %218 = sbr.rel (!%p1301_p3) target bundleno = 28 (0x1c), region = 61  ;;  %s220_s29 = sand.u32 (%p1301_p3), 1, %s1232_s13  }
  0x15   : > { %s1065_s30 = smul.u32 (%p1301_p3), 36, %s1240_s15 }
  0x16   : > { %s1110_s4 = smul.u32 (%p1301_p3), 12, %s220_s29 }
  0x17   : > { %s971_s7 = scalar_lea.vmem (%p1301_p3), %s1527_s1, %s1065_s30 }
  0x18   : > { %v1066_v3 = vld [vmem:[%s971_s7 + $0x4] sm:$0xf] (%p1301_p3)  ;;  %v1067_v4 = vld [vmem:[%s971_s7 + $0x10] sm:$0xf] (%p1301_p3)  ;;  %s222_s8 = scalar_lea.vmem (%p1301_p3), [#allocation3], %s1110_s4 }
  0x19   : > { %245 = vst [vmem:[%s222_s8] sm:$0xf] %v1066_v3  ;;  %v1068_v5 = vld [vmem:[%s971_s7 + $0x1c] sm:$0xf] }
  0x1a   : > { %247 = vst [vmem:[%s222_s8 + $0x4] sm:$0xf] %v1067_v4 }
  0x1b   : > { %249 = vst [vmem:[%s222_s8 + $0x8] sm:$0xf] %v1068_v5 }
  0x1c PF: > { %279 = sbr.rel (!%p1301_p3) target bundleno = 36 (0x24), region = 102  ;;  %s281_s9 = sand.u32 (%p1301_p3), 1, %s1232_s13  }
  0x1d   : > { %s1069_s10 = smul.u32 (%p1301_p3), 36, %s1240_s15 }
  0x1e   : > { %s1111_s11 = smul.u32 (%p1301_p3), 12, %s281_s9 }
  0x1f   : > { %s978_s22 = scalar_lea.vmem (%p1301_p3), %s1528_s2, %s1069_s10 }
  0x20   : > { %v1070_v6 = vld [vmem:[%s978_s22 + $0x8] sm:$0xf] (%p1301_p3)  ;;  %v1071_v7 = vld [vmem:[%s978_s22 + $0x14] sm:$0xf] (%p1301_p3)  ;;  %s283_s23 = scalar_lea.vmem (%p1301_p3), [#allocation4], %s1111_s11 }
  0x21   : > { %306 = vst [vmem:[%s283_s23] sm:$0xf] %v1070_v6  ;;  %v1072_v8 = vld [vmem:[%s978_s22 + $0x20] sm:$0xf] }
  0x22   : > { %308 = vst [vmem:[%s283_s23 + $0x4] sm:$0xf] %v1071_v7 }
  0x23   : > { %310 = vst [vmem:[%s283_s23 + $0x8] sm:$0xf] %v1072_v8 }
  0x24 PF: > { %p1073_p6 = scmp.ge.s32.totalorder %s1244_s16, 1  ;;  %p339_p7 = scmp.lt.s32.totalorder %s1244_s16, 3 }
  0x26   : > { %p340_p8 = pnand %p1073_p6, %p339_p7 }
  0x27   : > { %s346_s18 = sand.u32 (!%p340_p8), 1, %s1228_s12   ;;  %s1246_s26 = smov (!%p340_p8), 96  }
  0x28   : > { %343 = sbr.rel (%p340_p8) target bundleno = 1258 (0x4ea), region = 143  ;;  %s1247_s27 = smov (!%p340_p8), 64  }
  0x29   : > { %s1336_s24 = smul.u32 (!%p340_p8), 12, %s346_s18  ;;  %s1249_s29 = smov (!%p340_p8), 32  }
  0x2a   : > { %p396_p9 = scmp.lt.s32.totalorder (!%p340_p8), %s1236_s14, 1 }
  0x2b   : > { %s355_s25 = scalar_lea.vmem (!%p340_p8), [#allocation3], %s1336_s24  ;;  %s348_s12 = scalar_lea.vmem (!%p340_p8), [#allocation2], %s1336_s24 }
  0x2c   : > { %s362_s28 = scalar_lea.vmem (!%p340_p8), [#allocation4], %s1336_s24 }
  0x2d   : > { %v410_v9 = vld [vmem:[%s355_s25 + $0x8] sm:$0x1]  ;;  %vm430_vm0 = vcmask 261120   ;;  %v1343_v13 = vld [vmem:[%s355_s25] sm:$0xff]  ;;  %v407_v16 = vld [vmem:[%s348_s12 + $0x8] sm:$0x1] }
  0x2e   : > { %v427_v10 = vunpack.c.l.b16 %v410_v9  ;;  %v438_v14 = vsel %vm430_vm0, %v1343_v13, 0  ;;  %v1348_v15 = vld [vmem:[%s348_s12] sm:$0xff]  ;;  %v419_v17 = vunpack.c.l.b16 %v407_v16  ;;  %553 = vrot.lane.b32.xlu2 %v1343_v13, %s1246_s26  ;;  %vm461_vm1 = vcmask 138240   ;;  %v413_v39 = vld [vmem:[%s362_s28 + $0x8] sm:$0x1]  ;;  %v1379_v48 = vld [vmem:[%s362_s28] sm:$0xff] }
  0x2f   : > { %vm468_vm2 = vcmask 131072   ;;  %vm513_vm3 = vcmask 1040384   ;;  %v503_v40 = vunpack.c.l.b16 %v413_v39  ;;  %v1248_v43 = vmov 0   ;;  %s1538_s14 = smov (!%p396_p9, %s1236_s14), 1 }
  0x30   : > { %v1339_v11 = vpack.c.b16 %v427_v10, %v427_v10  ;;  %v1352_v18 = vpack.c.b16 %v419_v17, %v419_v17  ;;  %v1372_v44 = vsel %vm513_vm3, 65535, %v1248_v43  ;;  %s1113_s30 = smul.u32 12, %s1538_s14  ;;  %vm540_vm4 = vcmask 257024  }
  0x31   : > { %v1375_v46 = vpack.c.b16 %v503_v40, %v503_v40  ;;  %vm543_vm5 = vcmask 253952   ;;  %vm544_vm6 = vsmask.f32 256  ;;  %vm669_vm8 = vcmask 519424  }
  0x32   : > { %v441_v12 = vsel %vm430_vm0, %v1339_v11, 0  ;;  %s1418_s6 = scalar_lea.vmem %s1529_s3, %s1113_s30  ;;  %vm545_vm7 = vmand %vm543_vm5, %vm544_vm6  ;;  %vm672_vm9 = vcmask 516352   ;;  %vm797_vm11 = vcmask 781824   ;;  %vm800_vm12 = vcmask 778752  }
  0x33   : > { %449 = vmatpush.bf16.xpose.msra.mxu0 %v441_v12  ;;  %v517_v47 = vand.u32 %v1372_v44, %v1375_v46  ;;  %vm673_vm10 = vmand %vm672_vm9, %vm544_vm6  ;;  %vm925_vm14 = vcmask 1044224   ;;  %vm928_vm15 = vcmask 1041152  }
  0x34   : > { %vm801_vm13 = vmand %vm800_vm12, %vm544_vm6 }
  0x35   : > { %525 = vmatpush.bf16.msra.mxu1 %v517_v47 }
  0x39   : > { %526 = vmatpush.bf16.msra.mxu1 %v1379_v48 }
  0x3b   : > { %450 = vmatpush.bf16.xpose.msra.mxu0 %v438_v14 }
  0x42   : > { %1083 = vmatmul.msk.bf16.vlgmr.msra.gmra.mxu0 %vm430_vm0, %v1348_v15 }
  0x52   : > { %1084 = vmatmul.msk.bf16.gmra.mxu0 %vm430_vm0, %v1352_v18 }
  0x88   : > { %v554_v54 = vpop.permute.xlu2 %553 }
  0x89   : > { %v564_v56 = vsel %vm430_vm0, %v554_v54, 0 }
  0xbf   : > { %v452_v19 = vpop.f32.mrf.mxu0 }
  0xc0   : > { %v462_v20 = vsel %vm461_vm1, %v452_v19, -inf }
  0xc1   : > { %463 = vmax.xlane.f32.xlu0 %v462_v20 }
  0xc7   : > { %v454_v21 = vpop.f32.mrf.mxu0 }
  0xc8   : > { %v465_v22 = vsel %vm461_vm1, %v454_v21, -inf }
  0xc9   : > { %466 = vmax.xlane.f32.xlu0 %v465_v22 }
  0xcf   : > { %v457_v23 = vpop.f32.mrf.mxu0 }
  0xd0   : > { %v469_v24 = vsel %vm468_vm2, %v457_v23, -inf }
  0xd1   : > { %470 = vmax.xlane.f32.xlu1 %v469_v24 }
  0xd7   : > { %v459_v25 = vpop.f32.mrf.mxu0 }
  0xd8   : > { %v546_v25 = vld [vmem:[%s1418_s6 + $0x8] sm:$0x1] }
  0xdd   : > { %549 = vrot.lane.b32.xlu0 %v1348_v15, %s1246_s26 }
  0xe5   : > { %683 = vrot.lane.b32.xlu0 %v1339_v11, %s1247_s27 }
  0xea   : > { %555 = vrot.lane.b32.xlu1 %v1339_v11, %s1246_s26 }
  0xed   : > { %681 = vrot.lane.b32.xlu0 %v1343_v13, %s1247_s27 }
 0x134   : > { %v464_v26 = vpop.xlane.xlu0 %463 }
 0x135   : > { %v472_v27 = vsub.f32 %v452_v19, %v464_v26 }
 0x137   : > { %v475_v28 = vmul.f32 1.442695, %v472_v27 }
 0x139   : > { %1158 = vpow2.f32 %v475_v28 }
 0x13c   : > { %v467_v29 = vpop.xlane.xlu0 %466 }
 0x13d   : > { %v473_v30 = vsub.f32 %v454_v21, %v467_v29 }
 0x13f   : > { %v1159_v31 = vpop.eup %1158  ;;  %v477_v32 = vmul.f32 1.442695, %v473_v30 }
 0x140   : > { %v481_v33 = vsel %vm461_vm1, %v1159_v31, 0.0 }
 0x141   : > { %1160 = vpow2.f32 %v477_v32  ;;  %482 = vadd.xlane.f32.xlu2 %v481_v33 }
 0x144   : > { %v471_v34 = vpop.xlane.xlu1 %470 }
 0x145   : > { %v474_v35 = vsub.f32 %v457_v23, %v471_v34 }
 0x147   : > { %v1161_v36 = vpop.eup %1160  ;;  %v479_v37 = vmul.f32 1.442695, %v474_v35 }
 0x148   : > { %v484_v38 = vsel %vm461_vm1, %v1161_v36, 0.0 }
 0x149   : > { %1162 = vpow2.f32 %v479_v37  ;;  %485 = vadd.xlane.f32.xlu0 %v484_v38 }
 0x14f   : > { %v1163_v41 = vpop.eup %1162  ;;  %v550_v42 = vpop.permute.xlu0 %549 }
 0x150   : > { %v487_v45 = vsel %vm468_vm2, %v1163_v41, 0.0 }
 0x151   : > { %488 = vadd.xlane.f32.xlu1 %v487_v45 }
 0x157   : > { %v684_v49 = vpop.permute.xlu0 %683 }
 0x158   : > { %v695_v50 = vsel %vm430_vm0, %v684_v49, 0 }
 0x159   : > { %551 = vrot.lane.b32.xlu2 %v1352_v18, %s1246_s26  ;;  %703 = vmatpush.bf16.xpose.msrb.mxu1 %v695_v50 }
 0x15c   : > { %v556_v51 = vpop.permute.xlu1 %555 }
 0x15d   : > { %811 = vrot.lane.b32.xlu0 %v1339_v11, %s1249_s29  ;;  %v567_v52 = vsel %vm430_vm0, %v556_v51, 0 }
 0x15e   : > { %575 = vmatpush.bf16.xpose.msra.mxu2 %v567_v52 }
 0x15f   : > { %v682_v53 = vpop.permute.xlu0 %681 }
 0x160   : > { %v692_v55 = vsel %vm430_vm0, %v682_v53, 0 }
 0x161   : > { %809 = vrot.lane.b32.xlu2 %v1343_v13, %s1249_s29  ;;  %704 = vmatpush.bf16.xpose.msrb.mxu1 %v692_v55 }
 0x165   : > { %677 = vrot.lane.b32.xlu0 %v1348_v15, %s1247_s27 }
 0x166   : > { %576 = vmatpush.bf16.xpose.msra.mxu2 %v564_v56 }
 0x169   : > { %807 = vrot.lane.b32.xlu2 %v1352_v18, %s1249_s29 }
 0x16a   : > { %805 = vrot.lane.b32.xlu1 %v1348_v15, %s1249_s29 }
 0x16d   : > { %1091 = vmatmul.msk.bf16.vlgmr.msra.gmra.mxu2 %vm430_vm0, %v550_v42  ;;  %679 = vrot.lane.b32.xlu0 %v1352_v18, %s1247_s27 }
 0x1b4   : > { %v483_v57 = vpop.xlane.xlu2 %482 }
 0x1b5   : > { %1164 = vrcp.f32 %v483_v57 }
 0x1bb   : > { %v1165_v60 = vpop.eup %1164 }
 0x1bc   : > { %v552_v58 = vpop.permute.xlu2 %551  ;;  %v486_v59 = vpop.xlane.xlu0 %485  ;;  %v493_v62 = vmul.f32 %v1165_v60, %v1159_v31 }
 0x1bd   : > { %1166 = vrcp.f32 %v486_v59  ;;  %1092 = vmatmul.msk.bf16.gmra.mxu2 %vm430_vm0, %v552_v58 }
 0x1c3   : > { %v1167_v61 = vpop.eup %1166 }
 0x1c4   : > { %v494_v63 = vmul.f32 %v1167_v61, %v1161_v36  ;;  %v489_v0 = vpop.xlane.xlu1 %488  ;;  %v810_v6 = vpop.permute.xlu2 %809 }
 0x1c5   : > { %1168 = vrcp.f32 %v489_v0  ;;  %v820_v8 = vsel %vm430_vm0, %v810_v6, 0 }
 0x1c6   : > { %v496_v1 = vpack.c.bf16 %v494_v63, %v493_v62 }
 0x1c8   : > { %1089 = vmatmul.msk.bf16.vlgmr.msra.gmra.mxu1 %vm461_vm1, %v496_v1 }
 0x1cb   : > { %v1169_v2 = vpop.eup %1168 }
 0x1cc   : > { %v495_v5 = vmul.f32 %v1169_v2, %v1163_v41  ;;  %v808_v11 = vpop.permute.xlu2 %807 }
 0x1ce   : > { %v497_v7 = vpack.c.bf16 %v495_v5, %v495_v5 }
 0x1cf   : > { %v812_v3 = vpop.permute.xlu0 %811 }
 0x1d0   : > { %v823_v4 = vsel %vm430_vm0, %v812_v3, 0 }
 0x1d1   : > { %831 = vmatpush.bf16.xpose.msrb.mxu0 %v823_v4 }
 0x1d7   : > { %v678_v10 = vpop.permute.xlu0 %677 }
 0x1d8   : > { %1090 = vmatmul.msk.bf16.gmra.mxu1 %vm461_vm1, %v497_v7 }
 0x1d9   : > { %832 = vmatpush.bf16.xpose.msrb.mxu0 %v820_v8 }
 0x1dc   : > { %v806_v9 = vpop.permute.xlu1 %805 }
 0x1df   : > { %v680_v14 = vpop.permute.xlu0 %679 }
 0x1e0   : > { %1099 = vmatmul.msk.bf16.vlgmr.msrb.gmra.mxu0 %vm430_vm0, %v806_v9 }
 0x1e8   : > { %1095 = vmatmul.msk.bf16.vlgmr.msrb.gmra.mxu1 %vm430_vm0, %v678_v10 }
 0x1f0   : > { %v578_v12 = vpop.f32.mrf.mxu2  ;;  %1100 = vmatmul.msk.bf16.gmra.mxu0 %vm430_vm0, %v808_v11 }
 0x1f1   : > { %v587_v13 = vsel %vm461_vm1, %v578_v12, -inf }
 0x1f2   : > { %588 = vmax.xlane.f32.xlu0 %v587_v13 }
 0x1f8   : > { %v580_v15 = vpop.f32.mrf.mxu2  ;;  %1096 = vmatmul.msk.bf16.gmra.mxu1 %vm430_vm0, %v680_v14  ;;  %vm929_vm0 = vmand %vm928_vm15, %vm544_vm6 }
 0x1f9   : > { %v590_v16 = vsel %vm461_vm1, %v580_v15, -inf }
 0x1fa   : > { %591 = vmax.xlane.f32.xlu2 %v590_v16 }
 0x240   : > { %v583_v17 = vpop.f32.mrf.mxu2 }
 0x241   : > { %v593_v18 = vsel %vm468_vm2, %v583_v17, -inf }
 0x242   : > { %594 = vmax.xlane.f32.xlu1 %v593_v18 }
 0x245   : > { %v528_v19 = vpop.f32.mrf.mxu1 }
 0x246   : > { %v537_v20 = vpack.c.bf16 %v528_v19, %v528_v19 }
 0x248   : > { %541 = vst.msk [vmem:[%s1418_s6] sm:$0xf] %vm540_vm4, %v537_v20  ;;  %v585_v21 = vpop.f32.mrf.mxu2 }
 0x24d   : > { %v530_v22 = vpop.f32.mrf.mxu1 }
 0x24e   : > { %v538_v23 = vpack.c.bf16 %v530_v22, %v530_v22 }
 0x250   : > { %542 = vst.msk [vmem:[%s1418_s6 + $0x4] sm:$0xf] %vm540_vm4, %v538_v23 }
 0x255   : > { %v533_v24 = vpop.f32.mrf.mxu1 }
 0x256   : > { %v539_v26 = vpack.c.bf16 %v533_v24, %v533_v24 }
 0x258   : > { %v547_v27 = vsel %vm545_vm7, %v539_v26, %v546_v25 }
 0x259   : > { %548 = vst [vmem:[%s1418_s6 + $0x8] sm:$0x1] %v547_v27 }
 0x25d   : > { %v535_v28 = vpop.f32.mrf.mxu1  ;;  %v834_v29 = vpop.f32.mrf.mxu0 }
 0x25e   : > { %v843_v30 = vsel %vm461_vm1, %v834_v29, -inf }
 0x25f   : > { %844 = vmax.xlane.f32.xlu0 %v843_v30 }
 0x265   : > { %v589_v31 = vpop.xlane.xlu0 %588  ;;  %v1426_v32 = vpop.f32.mrf.mxu0 }
 0x266   : > { %v596_v33 = vsub.f32 %v578_v12, %v589_v31  ;;  %v846_v34 = vsel %vm461_vm1, %v1426_v32, -inf  ;;  %v706_v36 = vpop.f32.mrf.mxu1 }
 0x267   : > { %847 = vmax.xlane.f32.xlu2 %v846_v34  ;;  %v715_v51 = vsel %vm461_vm1, %v706_v36, -inf }
 0x268   : > { %v599_v35 = vmul.f32 1.442695, %v596_v33 }
 0x26a   : > { %1170 = vpow2.f32 %v599_v35 }
 0x26d   : > { %v1430_v37 = vpop.f32.mrf.mxu0  ;;  %v592_v47 = vpop.xlane.xlu2 %591 }
 0x26e   : > { %v849_v38 = vsel %vm468_vm2, %v1430_v37, -inf  ;;  %v1438_v40 = vpop.f32.mrf.mxu1  ;;  %v597_v49 = vsub.f32 %v580_v15, %v592_v47 }
 0x26f   : > { %850 = vmax.xlane.f32.xlu1 %v849_v38  ;;  %v718_v55 = vsel %vm461_vm1, %v1438_v40, -inf }
 0x270   : > { %v1434_v39 = vpop.eup %1170  ;;  %v601_v50 = vmul.f32 1.442695, %v597_v49 }
 0x271   : > { %v605_v42 = vsel %vm461_vm1, %v1434_v39, 0.0 }
 0x272   : > { %1172 = vpow2.f32 %v601_v50 }
 0x273   : > { %624 = vrot.lane.b32.xlu0 %v1375_v46, %s1246_s26 }
 0x275   : > { %v841_v41 = vpop.f32.mrf.mxu0 }
 0x276   : > { %v711_v43 = vpop.f32.mrf.mxu1 }
 0x277   : > { %606 = vadd.xlane.f32.xlu1 %v605_v42  ;;  %v721_v52 = vsel %vm468_vm2, %v711_v43, -inf }
 0x278   : > { %v1173_v53 = vpop.eup %1172 }
 0x279   : > { %v608_v54 = vsel %vm461_vm1, %v1173_v53, 0.0 }
 0x27e   : > { %v713_v45 = vpop.f32.mrf.mxu1 }
 0x27f   : > { %622 = vrot.lane.b32.xlu2 %v1379_v48, %s1246_s26 }
 0x29d   : > { %716 = vmax.xlane.f32.xlu0 %v715_v51 }
 0x2a5   : > { %722 = vmax.xlane.f32.xlu0 %v721_v52 }
 0x2a8   : > { %609 = vadd.xlane.f32.xlu2 %v608_v54 }
 0x2b0   : > { %719 = vmax.xlane.f32.xlu2 %v718_v55 }
 0x2b5   : > { %v595_v56 = vpop.xlane.xlu1 %594 }
 0x2b6   : > { %v598_v57 = vsub.f32 %v583_v17, %v595_v56 }
 0x2b8   : > { %v603_v58 = vmul.f32 1.442695, %v598_v57 }
 0x2b9   : > { %880 = vrot.lane.b32.xlu0 %v1375_v46, %s1249_s29 }
 0x2ba   : > { %1174 = vpow2.f32 %v603_v58 }
 0x2c0   : > { %v1175_v59 = vpop.eup %1174 }
 0x2c1   : > { %v611_v60 = vsel %vm468_vm2, %v1175_v59, 0.0 }
 0x2c2   : > { %612 = vadd.xlane.f32.xlu1 %v611_v60 }
 0x2c8   : > { %750 = vrot.lane.b32.xlu2 %v1379_v48, %s1247_s27 }
 0x2d2   : > { %v845_v61 = vpop.xlane.xlu0 %844 }
 0x2d3   : > { %v852_v62 = vsub.f32 %v834_v29, %v845_v61 }
 0x2d5   : > { %v855_v0 = vmul.f32 1.442695, %v852_v62 }
 0x2d7   : > { %1176 = vpow2.f32 %v855_v0 }
 0x2da   : > { %v848_v63 = vpop.xlane.xlu2 %847 }
 0x2db   : > { %v853_v38 = vsub.f32 %v1426_v32, %v848_v63 }
 0x2dd   : > { %v1455_v4 = vpop.eup %1176 }
 0x2de   : > { %v861_v5 = vsel %vm461_vm1, %v1455_v4, 0.0 }
 0x2e2   : > { %v623_v3 = vpop.permute.xlu2 %622  ;;  %v851_v6 = vpop.xlane.xlu1 %850 }
 0x2e3   : > { %v854_v14 = vsub.f32 %v1430_v37, %v851_v6 }
 0x2e5   : > { %v625_v1 = vpop.permute.xlu0 %624  ;;  %v859_v18 = vmul.f32 1.442695, %v854_v14 }
 0x2e6   : > { %v634_v2 = vand.u32 %v625_v1, %v1372_v44 }
 0x2e8   : > { %642 = vmatpush.bf16.msra.mxu3 %v634_v2 }
 0x2ea   : > { %v607_v10 = vpop.xlane.xlu1 %606 }
 0x2ec   : > { %643 = vmatpush.bf16.msra.mxu3 %v623_v3 }
 0x2f1   : > { %862 = vadd.xlane.f32.xlu2 %v861_v5 }
 0x310   : > { %v717_v7 = vpop.xlane.xlu0 %716 }
 0x311   : > { %v724_v8 = vsub.f32 %v706_v36, %v717_v7 }
 0x313   : > { %v727_v9 = vmul.f32 1.442695, %v724_v8 }
 0x315   : > { %1178 = vpow2.f32 %v727_v9 }
 0x316   : > { %1180 = vrcp.f32 %v607_v10 }
 0x318   : > { %v723_v11 = vpop.xlane.xlu0 %722 }
 0x319   : > { %v726_v12 = vsub.f32 %v711_v43, %v723_v11 }
 0x31b   : > { %v1179_v13 = vpop.eup %1178  ;;  %v731_v15 = vmul.f32 1.442695, %v726_v12  ;;  %v610_v16 = vpop.xlane.xlu2 %609 }
 0x31c   : > { %1182 = vrcp.f32 %v610_v16  ;;  %v733_v17 = vsel %vm461_vm1, %v1179_v13, 0.0  ;;  %v1181_v19 = vpop.eup %1180 }
 0x31d   : > { %1184 = vpow2.f32 %v731_v15  ;;  %734 = vadd.xlane.f32.xlu1 %v733_v17  ;;  %v617_v23 = vmul.f32 %v1181_v19, %v1434_v39  ;;  %v857_v39 = vmul.f32 1.442695, %v853_v38  ;;  %v674_v15 = vld [vmem:[%s1418_s6 + $0x8] sm:$0x1] }
 0x31e   : > { %1186 = vpow2.f32 %v859_v18 }
 0x322   : > { %v1183_v20 = vpop.eup %1182 }
 0x323   : > { %v1185_v21 = vpop.eup %1184  ;;  %v720_v22 = vpop.xlane.xlu2 %719  ;;  %v618_v24 = vmul.f32 %v1183_v20, %v1173_v53 }
 0x324   : > { %v725_v25 = vsub.f32 %v1438_v40, %v720_v22  ;;  %v739_v26 = vsel %vm468_vm2, %v1185_v21, 0.0  ;;  %v1465_v29 = vpop.eup %1186 }
 0x325   : > { %740 = vadd.xlane.f32.xlu2 %v739_v26  ;;  %v620_v27 = vpack.c.bf16 %v618_v24, %v617_v23  ;;  %v867_v30 = vsel %vm468_vm2, %v1465_v29, 0.0 }
 0x326   : > { %v729_v28 = vmul.f32 1.442695, %v725_v25 }
 0x327   : > { %1093 = vmatmul.msk.bf16.vlgmr.msra.gmra.mxu3 %vm461_vm1, %v620_v27 }
 0x328   : > { %1188 = vpow2.f32 %v729_v28 }
 0x32b   : > { %v881_v42 = vpop.permute.xlu0 %880 }
 0x32c   : > { %v890_v43 = vand.u32 %v881_v42, %v1372_v44 }
 0x32d   : > { %868 = vadd.xlane.f32.xlu2 %v867_v30 }
 0x32e   : > { %v1189_v31 = vpop.eup %1188  ;;  %898 = vmatpush.bf16.msrb.mxu2 %v890_v43 }
 0x32f   : > { %v736_v33 = vsel %vm461_vm1, %v1189_v31, 0.0 }
 0x330   : > { %737 = vadd.xlane.f32.xlu0 %v736_v33 }
 0x335   : > { %v613_v34 = vpop.xlane.xlu1 %612 }
 0x336   : > { %1190 = vrcp.f32 %v613_v34  ;;  %752 = vrot.lane.b32.xlu1 %v1375_v46, %s1247_s27  ;;  %v751_v46 = vpop.permute.xlu2 %750 }
 0x337   : > { %1192 = vpow2.f32 %v857_v39 }
 0x33c   : > { %v1191_v35 = vpop.eup %1190 }
 0x33d   : > { %v619_v36 = vmul.f32 %v1191_v35, %v1175_v59  ;;  %v1193_v40 = vpop.eup %1192 }
 0x33e   : > { %v864_v41 = vsel %vm461_vm1, %v1193_v40, 0.0 }
 0x33f   : > { %v621_v37 = vpack.c.bf16 %v619_v36, %v619_v36 }
 0x341   : > { %1094 = vmatmul.msk.bf16.gmra.mxu3 %vm461_vm1, %v621_v37 }
 0x344   : > { %878 = vrot.lane.b32.xlu0 %v1379_v48, %s1249_s29 }
 0x360   : > { %865 = vadd.xlane.f32.xlu1 %v864_v41 }
 0x364   : > { %v863_v49 = vpop.xlane.xlu2 %862 }
 0x390   : > { %v735_v45 = vpop.xlane.xlu1 %734 }
 0x398   : > { %v741_v56 = vpop.xlane.xlu2 %740 }
 0x3a0   : > { %v869_v8 = vpop.xlane.xlu2 %868 }
 0x3a3   : > { %v738_v47 = vpop.xlane.xlu0 %737 }
 0x3a4   : > { %1194 = vrcp.f32 %v738_v47 }
 0x3a5   : > { %1196 = vrcp.f32 %v735_v45 }
 0x3a6   : > { %1198 = vrcp.f32 %v741_v56 }
 0x3a7   : > { %1200 = vrcp.f32 %v863_v49 }
 0x3a8   : > { %v753_v50 = vpop.permute.xlu1 %752 }
 0x3a9   : > { %v762_v48 = vand.u32 %v753_v50, %v1372_v44 }
 0x3aa   : > { %v1195_v32 = vpop.eup %1194  ;;  %v645_v51 = vpop.f32.mrf.mxu3 }
 0x3ab   : > { %v1197_v52 = vpop.eup %1196  ;;  %v654_v53 = vpack.c.bf16 %v645_v51, %v645_v51  ;;  %770 = vmatpush.bf16.msrb.mxu3 %v762_v48  ;;  %v746_v54 = vmul.f32 %v1195_v32, %v1189_v31 }
 0x3ac   : > { %v745_v55 = vmul.f32 %v1197_v52, %v1179_v13  ;;  %v1199_v58 = vpop.eup %1198 }
 0x3ad   : > { %660 = vrot.lane.b32.xlu2 %v654_v53, %s1249_s29  ;;  %v747_v61 = vmul.f32 %v1199_v58, %v1185_v21  ;;  %v1201_v3 = vpop.eup %1200 }
 0x3ae   : > { %v748_v57 = vpack.c.bf16 %v746_v54, %v745_v55  ;;  %v873_v6 = vmul.f32 %v1201_v3, %v1455_v4 }
 0x3af   : > { %771 = vmatpush.bf16.msrb.mxu3 %v751_v46  ;;  %v749_v44 = vpack.c.bf16 %v747_v61, %v747_v61 }
 0x3b2   : > { %1097 = vmatmul.msk.bf16.vlgmr.msrb.gmra.mxu3 %vm461_vm1, %v748_v57  ;;  %v647_v60 = vpop.f32.mrf.mxu3 }
 0x3b3   : > { %v655_v1 = vpack.c.bf16 %v647_v60, %v647_v60 }
 0x3b6   : > { %v879_v59 = vpop.permute.xlu0 %878 }
 0x3b7   : > { %899 = vmatpush.bf16.msrb.mxu2 %v879_v59 }
 0x3c2   : > { %1098 = vmatmul.msk.bf16.gmra.mxu3 %vm461_vm1, %v749_v44 }
 0x3c4   : > { %v650_v62 = vpop.f32.mrf.mxu3 }
 0x3c5   : > { %v656_v63 = vpack.c.bf16 %v650_v62, %v650_v62 }
 0x3c7   : > { %664 = vrot.lane.b32.xlu0 %v656_v63, %s1249_s29 }
 0x3cc   : > { %v652_v0 = vpop.f32.mrf.mxu3 }
 0x3cf   : > { %662 = vrot.lane.b32.xlu0 %v655_v1, %s1249_s29 }
 0x3d3   : > { %v866_v2 = vpop.xlane.xlu1 %865 }
 0x3d4   : > { %1202 = vrcp.f32 %v866_v2 }
 0x3d5   : > { %1204 = vrcp.f32 %v869_v8 }
 0x3da   : > { %v1203_v5 = vpop.eup %1202 }
 0x3db   : > { %v874_v7 = vmul.f32 %v1203_v5, %v1193_v40  ;;  %v1205_v10 = vpop.eup %1204 }
 0x3dc   : > { %v875_v11 = vmul.f32 %v1205_v10, %v1465_v29 }
 0x3dd   : > { %v876_v9 = vpack.c.bf16 %v874_v7, %v873_v6 }
 0x3de   : > { %v877_v12 = vpack.c.bf16 %v875_v11, %v875_v11 }
 0x3df   : > { %1101 = vmatmul.msk.bf16.vlgmr.msrb.gmra.mxu2 %vm461_vm1, %v876_v9 }
 0x3ef   : > { %1102 = vmatmul.msk.bf16.gmra.mxu2 %vm461_vm1, %v877_v12 }
 0x407   : > { %v661_v13 = vpop.permute.xlu2 %660 }
 0x408   : > { %670 = vst.msk [vmem:[%s1418_s6] sm:$0xf] %vm669_vm8, %v661_v13 }
 0x435   : > { %v773_v4 = vpop.f32.mrf.mxu3 }
 0x436   : > { %v782_v14 = vpack.c.bf16 %v773_v4, %v773_v4 }
 0x438   : > { %788 = vrot.lane.b32.xlu0 %v782_v14, %s1247_s27 }
 0x439   : > { %v665_v16 = vpop.permute.xlu0 %664 }
 0x43a   : > { %v675_v17 = vsel %vm673_vm10, %v665_v16, %v674_v15 }
 0x43b   : > { %676 = vst [vmem:[%s1418_s6 + $0x8] sm:$0x1] %v675_v17 }
 0x43d   : > { %v775_v18 = vpop.f32.mrf.mxu3 }
 0x43e   : > { %v783_v19 = vpack.c.bf16 %v775_v18, %v775_v18 }
 0x440   : > { %790 = vrot.lane.b32.xlu0 %v783_v19, %s1247_s27 }
 0x441   : > { %v663_v20 = vpop.permute.xlu0 %662 }
 0x442   : > { %671 = vst.msk [vmem:[%s1418_s6 + $0x4] sm:$0xf] %vm669_vm8, %v663_v20  ;;  %v802_v34 = vld [vmem:[%s1418_s6 + $0x8] sm:$0x1] }
 0x445   : > { %v778_v21 = vpop.f32.mrf.mxu3 }
 0x446   : > { %v784_v22 = vpack.c.bf16 %v778_v21, %v778_v21 }
 0x448   : > { %792 = vrot.lane.b32.xlu1 %v784_v22, %s1247_s27 }
 0x44d   : > { %v780_v23 = vpop.f32.mrf.mxu3 }
 0x462   : > { %v901_v24 = vpop.f32.mrf.mxu2 }
 0x463   : > { %v910_v25 = vpack.c.bf16 %v901_v24, %v901_v24 }
 0x465   : > { %916 = vrot.lane.b32.xlu2 %v910_v25, %s1246_s26 }
 0x46a   : > { %v903_v26 = vpop.f32.mrf.mxu2 }
 0x46b   : > { %v911_v27 = vpack.c.bf16 %v903_v26, %v903_v26 }
 0x46d   : > { %918 = vrot.lane.b32.xlu0 %v911_v27, %s1246_s26 }
 0x472   : > { %v906_v28 = vpop.f32.mrf.mxu2 }
 0x473   : > { %v912_v29 = vpack.c.bf16 %v906_v28, %v906_v28 }
 0x475   : > { %920 = vrot.lane.b32.xlu1 %v912_v29, %s1246_s26 }
 0x47a   : > { %v908_v30 = vpop.f32.mrf.mxu2 }
 0x4aa   : > { %v789_v31 = vpop.permute.xlu0 %788 }
 0x4ab   : > { %798 = vst.msk [vmem:[%s1418_s6] sm:$0xf] %vm797_vm11, %v789_v31 }
 0x4b2   : > { %v791_v33 = vpop.permute.xlu0 %790 }
 0x4b3   : > { %799 = vst.msk [vmem:[%s1418_s6 + $0x4] sm:$0xf] %vm797_vm11, %v791_v33 }
 0x4ba   : > { %v793_v35 = vpop.permute.xlu1 %792 }
 0x4bb   : > { %v803_v36 = vsel %vm801_vm13, %v793_v35, %v802_v34 }
 0x4bc   : > { %804 = vst [vmem:[%s1418_s6 + $0x8] sm:$0x1] %v803_v36 }
 0x4bf   : > { %v917_v37 = vpop.permute.xlu2 %916 }
 0x4c0   : > { %926 = vst.msk [vmem:[%s1418_s6] sm:$0xf] %vm925_vm14, %v917_v37 }
 0x4c3   : > { %v930_v39 = vld [vmem:[%s1418_s6 + $0x8] sm:$0x1] }
 0x4df   : > { %v919_v38 = vpop.permute.xlu0 %918 }
 0x4e0   : > { %927 = vst.msk [vmem:[%s1418_s6 + $0x4] sm:$0xf] %vm925_vm14, %v919_v38 }
 0x4e7   : > { %v921_v40 = vpop.permute.xlu1 %920 }
 0x4e8   : > { %v931_v41 = vsel %vm929_vm0, %v921_v40, %v930_v39 }
 0x4e9   : > { %932 = vst [vmem:[%s1418_s6 + $0x8] sm:$0x1] %v931_v41 }
 0x4ea PF: > { %s13_s16 = sadd.s32 1, %s1244_s16   ;;  %s1531_s12 = smov %s1232_s13 }
 0x4eb   : > { %p10_p10 = scmp.ge.s32.totalorder %s13_s16, 4   ;;  %s1532_s13 = smov %s1309_s21 }
 0x4ec   : > { %s1533_s14 = smov %s1240_s15  ;;  %s1534_s15 = smov %s1536_s17 }
 0x4ed   :  { %12 = sbr.rel (!%p10_p10) target bundleno = 3 (0x3), region = 206 }

// kernel: visual_transformer_forward.16
= control target key start
LH: loop header
LB: loop body
LE: loop exit
PB: predicated region body
PF: predicated region fallthrough
CT: control target
= control target key end

     0   :  { %v283_v2 = vmov 0.0   ;;  %s363_s1 = inlined_call_operand.vmem [shape: bf16[128,128], index: 1, kind: input, shape index: {}]   ;;  %s364_s2 = inlined_call_operand.vmem [shape: f32[1,128], index: 2, kind: input, shape index: {}]   ;;  %s365_s0 = inlined_call_operand.vmem [shape: bf16[34,128], index: 0, kind: input, shape index: {}]   ;;  %s366_s3 = inlined_call_operand.vmem [shape: bf16[34,128], index: 3, kind: input, shape index: {}]   ;;  %s367_s4 = inlined_call_operand.vmem [shape: bf16[34,128], index: 4, kind: output, shape index: {}]  }
   0x1   :  { %v244_v0 = vld [vmem:[%s363_s1 + $0x38] sm:$0xff]  ;;  %v243_v1 = vld [vmem:[%s363_s1 + $0x30] sm:$0xff]  ;;  %25 = vst [vmem:[#allocation2 + $0x18] sm:$0x3] %v283_v2  ;;  %v242_v3 = vld [vmem:[%s363_s1 + $0x28] sm:$0xff] }
   0x2   :  { %116 = vmatpush.bf16.msra.mxu0 %v244_v0  ;;  %265 = vmatpush.bf16.msra.mxu1 %v244_v0  ;;  %v241_v4 = vld [vmem:[%s363_s1 + $0x20] sm:$0xff]  ;;  %v240_v5 = vld [vmem:[%s363_s1 + $0x18] sm:$0xff]  ;;  %v239_v6 = vld [vmem:[%s363_s1 + $0x10] sm:$0xff] }
   0x3   :  { %266 = vmatpush.bf16.msra.mxu2 %v244_v0  ;;  %v238_v7 = vld [vmem:[%s363_s1 + $0x8] sm:$0xff]  ;;  %v35_v8 = vld [vmem:[%s365_s0 + $0x10] sm:$0x1]  ;;  %v237_v9 = vld [vmem:[%s363_s1] sm:$0xff] }
   0x4   :  { %v61_v10 = vunpack.c.l.b16 %v35_v8  ;;  %v235_v11 = vld [vmem:[%s365_s0] sm:$0xff]  ;;  %v236_v12 = vld [vmem:[%s365_s0 + $0x8] sm:$0xff]  ;;  %v170_v34 = vld [vmem:[%s366_s3 + $0x10] sm:$0x1] }
   0x5   :  { %v246_v16 = vld [vmem:[%s366_s3] sm:$0xff]   ;;  %v263_v18 = vld [vmem:[%s366_s3 + $0x8] sm:$0xff]   ;;  %v175_v40 = vunpack.c.l.bf16 %v170_v34 }
   0x6   :  { %117 = vmatpush.bf16.msra.mxu0 %v243_v1  ;;  %267 = vmatpush.bf16.msra.mxu1 %v243_v1  ;;  %v64_v13 = vpack.c.b16 %v61_v10, %v61_v10  ;;  %v282_v17 = vld [vmem:[%s364_s2] ss:$0 sm:$0xff]  ;;  %v247_v20 = vunpack.c.l.bf16 %v246_v16  ;;  %v251_v22 = vunpack.c.l.bf16 %v263_v18  ;;  %v248_v25 = vunpack.c.h.bf16 %v246_v16 }
   0x7   :  { %268 = vmatpush.bf16.msra.mxu2 %v243_v1  ;;  %v252_v27 = vunpack.c.h.bf16 %v263_v18 }
   0x8   :  { %v30_v19 = vld [vmem:[#allocation2 + $0x18] sm:$0x3] }
   0xa   :  { %118 = vmatpush.bf16.msra.mxu0 %v242_v3  ;;  %269 = vmatpush.bf16.msra.mxu1 %v242_v3 }
   0xb   :  { %270 = vmatpush.bf16.msra.mxu2 %v242_v3 }
   0xe   :  { %119 = vmatpush.bf16.msra.mxu0 %v241_v4  ;;  %271 = vmatpush.bf16.msra.mxu1 %v241_v4 }
   0xf   :  { %272 = vmatpush.bf16.msra.mxu2 %v241_v4 }
  0x12   :  { %120 = vmatpush.bf16.msra.mxu0 %v240_v5  ;;  %273 = vmatpush.bf16.msra.mxu1 %v240_v5 }
  0x13   :  { %274 = vmatpush.bf16.msra.mxu2 %v240_v5 }
  0x16   :  { %121 = vmatpush.bf16.msra.mxu0 %v239_v6  ;;  %275 = vmatpush.bf16.msra.mxu1 %v239_v6 }
  0x17   :  { %276 = vmatpush.bf16.msra.mxu2 %v239_v6 }
  0x1a   :  { %122 = vmatpush.bf16.msra.mxu0 %v238_v7  ;;  %277 = vmatpush.bf16.msra.mxu1 %v238_v7 }
  0x1b   :  { %278 = vmatpush.bf16.msra.mxu2 %v238_v7 }
  0x1e   :  { %123 = vmatpush.bf16.msra.mxu0 %v237_v9  ;;  %279 = vmatpush.bf16.msra.mxu1 %v237_v9 }
  0x1f   :  { %280 = vmatpush.bf16.msra.mxu2 %v237_v9 }
  0x21   :  { %124 = vmatmul.bf16.vlgmr.msra.gmra.mxu0 %v235_v11  ;;  %129 = vmatmul.bf16.vlgmr.msra.gmra.mxu1 %v236_v12 }
  0x22   :  { %134 = vmatmul.bf16.vlgmr.msra.gmra.mxu2 %v64_v13 }
  0x9e   :  { %v125_v14 = vpop.f32.mrf.mxu0  ;;  %v130_v15 = vpop.f32.mrf.mxu1 }
  0x9f   :  { %v161_v28 = vadd.f32 %v282_v17, %v125_v14  ;;  %v163_v29 = vadd.f32 %v282_v17, %v130_v15 }
  0xa1   :  { %v176_v32 = vadd.f32 %v247_v20, %v161_v28  ;;  %v178_v33 = vadd.f32 %v251_v22, %v163_v29 }
  0xa5   :  { %v135_v21 = vpop.f32.mrf.mxu2 }
  0xa6   :  { %v143_v23 = vadd.f32 %v135_v21, %v30_v19  ;;  %v127_v24 = vpop.f32.mrf.mxu0  ;;  %v132_v26 = vpop.f32.mrf.mxu1 }
  0xa7   :  { %v162_v30 = vadd.f32 %v282_v17, %v127_v24  ;;  %v164_v31 = vadd.f32 %v282_v17, %v132_v26 }
  0xa8   :  { %148 = vst [vmem:[#allocation2 + $0x18] sm:$0x3] %v143_v23 }
  0xa9   :  { %v177_v35 = vadd.f32 %v248_v25, %v162_v30  ;;  %v179_v36 = vadd.f32 %v252_v27, %v164_v31 }
  0xab   :  { %v256_v37 = vpack.c.bf16 %v177_v35, %v176_v32  ;;  %v261_v38 = vpack.c.bf16 %v179_v36, %v178_v33 }
  0xad   :  { %v137_v39 = vpop.f32.mrf.mxu2  ;;  %257 = vst [vmem:[%s367_s4] sm:$0xff] %v256_v37  }
  0xae   :  { %264 = vst [vmem:[%s367_s4 + $0x8] sm:$0xff] %v261_v38  }
  0xaf   :  { %v156_v41 = vld [vmem:[#allocation2 + $0x18] sm:$0x3] }
  0xb0   :  { %v165_v42 = vadd.f32 %v282_v17, %v156_v41 }
  0xb2   :  { %v180_v43 = vadd.f32 %v175_v40, %v165_v42 }
  0xb4   :  { %v185_v44 = vpack.c.bf16 %v180_v43, %v180_v43 }
  0xb6   :  { %190 = vst [vmem:[%s367_s4 + $0x10] sm:$0x1] %v185_v44 }

// kernel: visual_transformer_forward.18
= control target key start
LH: loop header
LB: loop body
LE: loop exit
PB: predicated region body
PF: predicated region fallthrough
CT: control target
= control target key end

     0   :  { %s918_s1 = inlined_call_operand.vmem [shape: bf16[512,128], index: 1, kind: input, shape index: {}]   ;;  %s919_s0 = inlined_call_operand.vmem [shape: bf16[34,512], index: 0, kind: input, shape index: {}]   ;;  %s920_s2 = inlined_call_operand.vmem [shape: f32[1,128], index: 2, kind: input, shape index: {}]   ;;  %s921_s3 = inlined_call_operand.vmem [shape: bf16[34,128], index: 3, kind: input, shape index: {}]   ;;  %s922_s4 = inlined_call_operand.vmem [shape: bf16[34,128], index: 4, kind: output, shape index: {}]  }
   0x1   :  { %v674_v0 = vld [vmem:[%s918_s1 + $0x38] sm:$0xff]  ;;  %v673_v4 = vld [vmem:[%s918_s1 + $0x30] sm:$0xff]  ;;  %v672_v8 = vld [vmem:[%s918_s1 + $0x28] sm:$0xff] }
   0x2   :  { %v682_v1 = vld [vmem:[%s918_s1 + $0x78] sm:$0xff]  ;;  %351 = vmatpush.bf16.msra.mxu0 %v674_v0  ;;  %v681_v5 = vld [vmem:[%s918_s1 + $0x70] sm:$0xff]  ;;  %v680_v9 = vld [vmem:[%s918_s1 + $0x68] sm:$0xff] }
   0x3   :  { %v690_v2 = vld [vmem:[%s918_s1 + $0xb8] sm:$0xff]  ;;  %374 = vmatpush.bf16.msra.mxu1 %v682_v1  ;;  %v689_v6 = vld [vmem:[%s918_s1 + $0xb0] sm:$0xff]  ;;  %v688_v10 = vld [vmem:[%s918_s1 + $0xa8] sm:$0xff] }
   0x4   :  { %v698_v3 = vld [vmem:[%s918_s1 + $0xf8] sm:$0xff]  ;;  %397 = vmatpush.bf16.msra.mxu2 %v690_v2  ;;  %v697_v7 = vld [vmem:[%s918_s1 + $0xf0] sm:$0xff]  ;;  %v696_v11 = vld [vmem:[%s918_s1 + $0xe8] sm:$0xff]  ;;  %v721_v2 = vmov 0.0  }
   0x5   :  { %420 = vmatpush.bf16.msra.mxu3 %v698_v3  ;;  %v671_v12 = vld [vmem:[%s918_s1 + $0x20] sm:$0xff]  ;;  %v670_v16 = vld [vmem:[%s918_s1 + $0x18] sm:$0xff]  ;;  %v669_v20 = vld [vmem:[%s918_s1 + $0x10] sm:$0xff]  ;;  %25 = vst [vmem:[#allocation2 + $0x18] sm:$0x3] %v721_v2 }
   0x6   :  { %352 = vmatpush.bf16.msra.mxu0 %v673_v4  ;;  %v679_v13 = vld [vmem:[%s918_s1 + $0x60] sm:$0xff]  ;;  %v678_v17 = vld [vmem:[%s918_s1 + $0x58] sm:$0xff]  ;;  %v677_v21 = vld [vmem:[%s918_s1 + $0x50] sm:$0xff] }
   0x7   :  { %375 = vmatpush.bf16.msra.mxu1 %v681_v5  ;;  %v687_v14 = vld [vmem:[%s918_s1 + $0xa0] sm:$0xff]  ;;  %v686_v18 = vld [vmem:[%s918_s1 + $0x98] sm:$0xff]  ;;  %v685_v22 = vld [vmem:[%s918_s1 + $0x90] sm:$0xff] }
   0x8   :  { %398 = vmatpush.bf16.msra.mxu2 %v689_v6  ;;  %v695_v15 = vld [vmem:[%s918_s1 + $0xe0] sm:$0xff]  ;;  %v694_v19 = vld [vmem:[%s918_s1 + $0xd8] sm:$0xff]  ;;  %v693_v23 = vld [vmem:[%s918_s1 + $0xd0] sm:$0xff] }
   0x9   :  { %421 = vmatpush.bf16.msra.mxu3 %v697_v7  ;;  %v668_v24 = vld [vmem:[%s918_s1 + $0x8] sm:$0xff]  ;;  %v667_v28 = vld [vmem:[%s918_s1] sm:$0xff]  ;;  %v661_v33 = vld [vmem:[%s919_s0 + $0xc] sm:$0xf0] }
   0xa   :  { %353 = vmatpush.bf16.msra.mxu0 %v672_v8  ;;  %v676_v25 = vld [vmem:[%s918_s1 + $0x48] sm:$0xff]  ;;  %v675_v29 = vld [vmem:[%s918_s1 + $0x40] sm:$0xff]  ;;  %v503_v35 = vld [vmem:[%s919_s0 + $0x10] sm:$0xf0] }
   0xb   :  { %376 = vmatpush.bf16.msra.mxu1 %v680_v9  ;;  %v684_v26 = vld [vmem:[%s918_s1 + $0x88] sm:$0xff]  ;;  %v683_v30 = vld [vmem:[%s918_s1 + $0x80] sm:$0xff]  ;;  %v662_v37 = vld [vmem:[%s919_s0 + $0x14] sm:$0xf0] }
   0xc   :  { %399 = vmatpush.bf16.msra.mxu2 %v688_v10  ;;  %v692_v27 = vld [vmem:[%s918_s1 + $0xc8] sm:$0xff]  ;;  %v691_v31 = vld [vmem:[%s918_s1 + $0xc0] sm:$0xff]  ;;  %v511_v39 = vld [vmem:[%s919_s0 + $0x18] sm:$0xf0] }
   0xd   :  { %422 = vmatpush.bf16.msra.mxu3 %v696_v11  ;;  %v501_v32 = vld [vmem:[%s919_s0] sm:$0xf]  ;;  %v659_v34 = vld [vmem:[%s919_s0 + $0x4] sm:$0xf]  ;;  %v509_v36 = vld [vmem:[%s919_s0 + $0x8] sm:$0xf] }
   0xe   :  { %354 = vmatpush.bf16.msra.mxu0 %v671_v12  ;;  %v660_v38 = vld [vmem:[%s919_s0 + $0xc] sm:$0xf]  ;;  %v502_v40 = vor.u32 %v661_v33, %v501_v32  ;;  %v506_v41 = vor.u32 %v659_v34, %v503_v35  ;;  %v510_v42 = vor.u32 %v662_v37, %v509_v36  ;;  %v517_v44 = vld [vmem:[%s919_s0 + $0x20] sm:$0xf]  ;;  %v665_v45 = vld [vmem:[%s919_s0 + $0x2c] sm:$0xf0] }
   0xf   :  { %377 = vmatpush.bf16.msra.mxu1 %v679_v13  ;;  %v514_v43 = vor.u32 %v660_v38, %v511_v39  ;;  %v663_v46 = vld [vmem:[%s919_s0 + $0x24] sm:$0xf]  ;;  %v519_v47 = vld [vmem:[%s919_s0 + $0x30] sm:$0xf0]  ;;  %v525_v48 = vld [vmem:[%s919_s0 + $0x28] sm:$0xf]  ;;  %v518_v52 = vor.u32 %v665_v45, %v517_v44 }
  0x10   :  { %400 = vmatpush.bf16.msra.mxu2 %v687_v14  ;;  %v666_v49 = vld [vmem:[%s919_s0 + $0x34] sm:$0xf0]  ;;  %v664_v50 = vld [vmem:[%s919_s0 + $0x2c] sm:$0xf]  ;;  %v527_v51 = vld [vmem:[%s919_s0 + $0x38] sm:$0xf0]  ;;  %v522_v53 = vor.u32 %v663_v46, %v519_v47 }
  0x11   :  { %423 = vmatpush.bf16.msra.mxu3 %v695_v15  ;;  %v526_v54 = vor.u32 %v666_v49, %v525_v48  ;;  %v530_v55 = vor.u32 %v664_v50, %v527_v51  ;;  %v39_v56 = vld [vmem:[%s919_s0 + $0x40] sm:$0x11]  ;;  %v40_v57 = vld [vmem:[%s919_s0 + $0x48] sm:$0x11] }
  0x12   :  { %355 = vmatpush.bf16.msra.mxu0 %v670_v16  ;;  %v131_v58 = vunpack.c.l.b16 %v39_v56  ;;  %v132_v59 = vunpack.c.h.b16 %v39_v56  ;;  %v133_v60 = vunpack.c.l.b16 %v40_v57  ;;  %v134_v61 = vunpack.c.h.b16 %v40_v57  ;;  %v720_v15 = vld [vmem:[%s920_s2] ss:$0 sm:$0xff]  ;;  %v717_v38 = vld [vmem:[%s921_s3 + $0x8] sm:$0xff]  }
  0x13   :  { %378 = vmatpush.bf16.msra.mxu1 %v678_v17  ;;  %v700_v16 = vld [vmem:[%s921_s3] sm:$0xff]   ;;  %v706_v45 = vunpack.c.h.bf16 %v717_v38 }
  0x14   :  { %401 = vmatpush.bf16.msra.mxu2 %v686_v18  ;;  %v143_v62 = vpack.c.b16 %v131_v58, %v131_v58  ;;  %v144_v63 = vpack.c.b16 %v132_v59, %v132_v59  ;;  %v145_v0 = vpack.c.b16 %v133_v60, %v133_v60  ;;  %v146_v1 = vpack.c.b16 %v134_v61, %v134_v61  ;;  %v474_v61 = vld [vmem:[%s921_s3 + $0x10] sm:$0x1] }
  0x15   :  { %424 = vmatpush.bf16.msra.mxu3 %v694_v19 }
  0x16   :  { %356 = vmatpush.bf16.msra.mxu0 %v669_v20 }
  0x17   :  { %379 = vmatpush.bf16.msra.mxu1 %v677_v21  ;;  %v701_v21 = vunpack.c.l.bf16 %v700_v16 }
  0x18   :  { %402 = vmatpush.bf16.msra.mxu2 %v685_v22 }
  0x19   :  { %425 = vmatpush.bf16.msra.mxu3 %v693_v23  ;;  %v702_v23 = vunpack.c.h.bf16 %v700_v16 }
  0x1a   :  { %357 = vmatpush.bf16.msra.mxu0 %v668_v24 }
  0x1b   :  { %380 = vmatpush.bf16.msra.mxu1 %v676_v25 }
  0x1c   :  { %403 = vmatpush.bf16.msra.mxu2 %v684_v26 }
  0x1d   :  { %426 = vmatpush.bf16.msra.mxu3 %v692_v27 }
  0x1e   :  { %358 = vmatpush.bf16.msra.mxu0 %v667_v28 }
  0x1f   :  { %381 = vmatpush.bf16.msra.mxu1 %v675_v29 }
  0x20   :  { %404 = vmatpush.bf16.msra.mxu2 %v683_v30 }
  0x21   :  { %427 = vmatpush.bf16.msra.mxu3 %v691_v31  ;;  %359 = vmatmul.bf16.vlgmr.msra.gmra.mxu0 %v502_v40 }
  0x22   :  { %382 = vmatmul.bf16.vlgmr.msra.gmra.mxu1 %v506_v41 }
  0x23   :  { %405 = vmatmul.bf16.vlgmr.msra.gmra.mxu2 %v510_v42 }
  0x24   :  { %428 = vmatmul.bf16.vlgmr.msra.gmra.mxu3 %v514_v43  ;;  %v705_v43 = vunpack.c.l.bf16 %v717_v38 }
  0x31   :  { %364 = vmatmul.bf16.gmra.mxu0 %v518_v52 }
  0x32   :  { %387 = vmatmul.bf16.gmra.mxu1 %v522_v53 }
  0x33   :  { %410 = vmatmul.bf16.gmra.mxu2 %v526_v54 }
  0x34   :  { %433 = vmatmul.bf16.gmra.mxu3 %v530_v55  ;;  %v30_v55 = vld [vmem:[#allocation2 + $0x18] sm:$0x3] }
  0x41   :  { %369 = vmatmul.bf16.gmra.mxu0 %v143_v62  ;;  %v479_v62 = vunpack.c.l.bf16 %v474_v61 }
  0x42   :  { %392 = vmatmul.bf16.gmra.mxu1 %v144_v63 }
  0x43   :  { %415 = vmatmul.bf16.gmra.mxu2 %v145_v0 }
  0x44   :  { %438 = vmatmul.bf16.gmra.mxu3 %v146_v1 }
  0x9e   :  { %v360_v3 = vpop.f32.mrf.mxu0 }
  0x9f   :  { %v383_v4 = vpop.f32.mrf.mxu1 }
  0xa0   :  { %v384_v5 = vadd.f32 %v383_v4, %v360_v3 }
  0xa6   :  { %v406_v6 = vpop.f32.mrf.mxu2  ;;  %v362_v9 = vpop.f32.mrf.mxu0 }
  0xa7   :  { %v429_v7 = vpop.f32.mrf.mxu3  ;;  %v407_v8 = vadd.f32 %v406_v6, %v384_v5  ;;  %v385_v10 = vpop.f32.mrf.mxu1 }
  0xa8   :  { %v386_v12 = vadd.f32 %v385_v10, %v362_v9 }
  0xa9   :  { %v430_v11 = vadd.f32 %v429_v7, %v407_v8 }
  0xab   :  { %v465_v22 = vadd.f32 %v720_v15, %v430_v11 }
  0xad   :  { %v480_v28 = vadd.f32 %v701_v21, %v465_v22 }
  0xae   :  { %v408_v13 = vpop.f32.mrf.mxu2  ;;  %v365_v18 = vpop.f32.mrf.mxu0 }
  0xaf   :  { %v431_v14 = vpop.f32.mrf.mxu3  ;;  %v409_v17 = vadd.f32 %v408_v13, %v386_v12  ;;  %v388_v19 = vpop.f32.mrf.mxu1 }
  0xb0   :  { %v389_v24 = vadd.f32 %v388_v19, %v365_v18 }
  0xb1   :  { %v432_v20 = vadd.f32 %v431_v14, %v409_v17 }
  0xb3   :  { %v466_v25 = vadd.f32 %v720_v15, %v432_v20 }
  0xb5   :  { %v481_v29 = vadd.f32 %v702_v23, %v466_v25 }
  0xb6   :  { %v411_v26 = vpop.f32.mrf.mxu2  ;;  %v367_v31 = vpop.f32.mrf.mxu0 }
  0xb7   :  { %v434_v27 = vpop.f32.mrf.mxu3  ;;  %v412_v30 = vadd.f32 %v411_v26, %v389_v24  ;;  %v390_v32 = vpop.f32.mrf.mxu1  ;;  %v710_v33 = vpack.c.bf16 %v481_v29, %v480_v28 }
  0xb8   :  { %v391_v35 = vadd.f32 %v390_v32, %v367_v31 }
  0xb9   :  { %v435_v34 = vadd.f32 %v434_v27, %v412_v30  ;;  %711 = vst [vmem:[%s922_s4] sm:$0xff] %v710_v33  }
  0xbb   :  { %v467_v44 = vadd.f32 %v720_v15, %v435_v34 }
  0xbd   :  { %v482_v50 = vadd.f32 %v705_v43, %v467_v44 }
  0xbe   :  { %v413_v36 = vpop.f32.mrf.mxu2  ;;  %v370_v40 = vpop.f32.mrf.mxu0 }
  0xbf   :  { %v436_v37 = vpop.f32.mrf.mxu3  ;;  %v414_v39 = vadd.f32 %v413_v36, %v391_v35  ;;  %v393_v41 = vpop.f32.mrf.mxu1 }
  0xc0   :  { %v394_v46 = vadd.f32 %v393_v41, %v370_v40 }
  0xc1   :  { %v437_v42 = vadd.f32 %v436_v37, %v414_v39 }
  0xc3   :  { %v468_v47 = vadd.f32 %v720_v15, %v437_v42 }
  0xc5   :  { %v483_v51 = vadd.f32 %v706_v45, %v468_v47 }
  0xc6   :  { %v416_v48 = vpop.f32.mrf.mxu2  ;;  %v372_v53 = vpop.f32.mrf.mxu0 }
  0xc7   :  { %v439_v49 = vpop.f32.mrf.mxu3  ;;  %v417_v52 = vadd.f32 %v416_v48, %v394_v46  ;;  %v395_v54 = vpop.f32.mrf.mxu1  ;;  %v715_v56 = vpack.c.bf16 %v483_v51, %v482_v50 }
  0xc9   :  { %v440_v57 = vadd.f32 %v439_v49, %v417_v52  ;;  %718 = vst [vmem:[%s922_s4 + $0x8] sm:$0xff] %v715_v56  }
  0xcb   :  { %v447_v58 = vadd.f32 %v440_v57, %v30_v55 }
  0xcd   :  { %452 = vst [vmem:[#allocation2 + $0x18] sm:$0x3] %v447_v58 }
  0xce   :  { %v418_v59 = vpop.f32.mrf.mxu2 }
  0xcf   :  { %v441_v60 = vpop.f32.mrf.mxu3 }
  0xd4   :  { %v460_v63 = vld [vmem:[#allocation2 + $0x18] sm:$0x3] }
  0xd5   :  { %v469_v0 = vadd.f32 %v720_v15, %v460_v63 }
  0xd7   :  { %v484_v1 = vadd.f32 %v479_v62, %v469_v0 }
  0xd9   :  { %v489_v2 = vpack.c.bf16 %v484_v1, %v484_v1 }
  0xdb   :  { %494 = vst [vmem:[%s922_s4 + $0x10] sm:$0x1] %v489_v2 }

// kernel: visual_transformer_forward.17
= control target key start
LH: loop header
LB: loop body
LE: loop exit
PB: predicated region body
PF: predicated region fallthrough
CT: control target
= control target key end

     0   :  { %vm42_vm0 = vcmask 1041408   ;;  %v1236_v9 = vmov 128.0   ;;  %s1964_s0 = inlined_call_operand.vmem [shape: bf16[34,128], index: 0, kind: input, shape index: {}]   ;;  %s1965_s1 = inlined_call_operand.vmem [shape: f32[1,128], index: 1, kind: input, shape index: {}]   ;;  %s1966_s2 = inlined_call_operand.vmem [shape: f32[1,128], index: 2, kind: input, shape index: {}]   ;;  %s1967_s3 = inlined_call_operand.vmem [shape: bf16[128,512], index: 3, kind: input, shape index: {}]   ;;  %s1968_s4 = inlined_call_operand.vmem [shape: f32[1,512], index: 4, kind: input, shape index: {}]   ;;  %s1969_s5 = inlined_call_operand.vmem [shape: bf16[34,512], index: 5, kind: output, shape index: {}]  }
   0x1   :  { %v1139_v0 = vld [vmem:[%s1964_s0 + $0x8] sm:$0xff]   ;;  %v1122_v1 = vld [vmem:[%s1964_s0] sm:$0xff]   ;;  %v28_v2 = vld [vmem:[%s1964_s0 + $0x10] sm:$0x1]  ;;  %1144 = vrcp.f32 %v1236_v9 }
   0x2   :  { %v1127_v3 = vunpack.c.l.bf16 %v1139_v0  ;;  %v1123_v4 = vunpack.c.l.bf16 %v1122_v1  ;;  %v33_v5 = vunpack.c.l.bf16 %v28_v2  ;;  %v1128_v7 = vunpack.c.h.bf16 %v1139_v0  ;;  %v1053_v37 = vld [vmem:[%s1967_s3 + $0xe0] sm:$0xf]  ;;  %v1119_v38 = vld [vmem:[%s1967_s3 + $0xec] sm:$0xf0]  ;;  %v1117_v39 = vld [vmem:[%s1967_s3 + $0xe4] sm:$0xf] }
   0x3   :  { %v1124_v8 = vunpack.c.h.bf16 %v1122_v1  ;;  %v1054_v40 = vor.u32 %v1119_v38, %v1053_v37  ;;  %v1055_v41 = vld [vmem:[%s1967_s3 + $0xf0] sm:$0xf0]  ;;  %v1061_v42 = vld [vmem:[%s1967_s3 + $0xe8] sm:$0xf]  ;;  %v1120_v43 = vld [vmem:[%s1967_s3 + $0xf4] sm:$0xf0] }
   0x4   :  { %38 = vadd.xlane.f32.xlu1 %v1127_v3  ;;  %34 = vadd.xlane.f32.xlu0 %v1123_v4  ;;  %v43_v6 = vsel %vm42_vm0, %v33_v5, 0.0  ;;  %v1058_v44 = vor.u32 %v1117_v39, %v1055_v41  ;;  %v1062_v45 = vor.u32 %v1120_v43, %v1061_v42  ;;  %v1118_v46 = vld [vmem:[%s1967_s3 + $0xec] sm:$0xf]  ;;  %v1063_v47 = vld [vmem:[%s1967_s3 + $0xf8] sm:$0xf0] }
   0x5   :  { %44 = vadd.xlane.f32.xlu2 %v43_v6  ;;  %395 = vmatpush.bf16.msra.mxu0 %v1054_v40  ;;  %v1066_v48 = vor.u32 %v1118_v46, %v1063_v47  ;;  %v1037_v49 = vld [vmem:[%s1967_s3 + $0xc0] sm:$0xf]  ;;  %v1115_v50 = vld [vmem:[%s1967_s3 + $0xcc] sm:$0xf0]  ;;  %v1113_v51 = vld [vmem:[%s1967_s3 + $0xc4] sm:$0xf] }
   0x6   :  { %418 = vmatpush.bf16.msra.mxu1 %v1058_v44  ;;  %441 = vmatpush.bf16.msra.mxu2 %v1062_v45  ;;  %v1038_v52 = vor.u32 %v1115_v50, %v1037_v49  ;;  %v1039_v53 = vld [vmem:[%s1967_s3 + $0xd0] sm:$0xf0]  ;;  %v1045_v54 = vld [vmem:[%s1967_s3 + $0xc8] sm:$0xf]  ;;  %v1116_v55 = vld [vmem:[%s1967_s3 + $0xd4] sm:$0xf0] }
   0x7   :  { %v1145_v10 = vpop.eup %1144  ;;  %464 = vmatpush.bf16.msra.mxu3 %v1066_v48  ;;  %v1042_v56 = vor.u32 %v1113_v51, %v1039_v53  ;;  %v1046_v57 = vor.u32 %v1116_v55, %v1045_v54  ;;  %v1114_v58 = vld [vmem:[%s1967_s3 + $0xcc] sm:$0xf]  ;;  %v1047_v59 = vld [vmem:[%s1967_s3 + $0xd8] sm:$0xf0]  ;;  %v1021_v61 = vld [vmem:[%s1967_s3 + $0xa0] sm:$0xf] }
   0x8   :  { %v47_v11 = vmul.f32 128.0, %v1145_v10  ;;  %vm51_vm1 = vweird.f32 %v1145_v10  ;;  %v1050_v60 = vor.u32 %v1114_v58, %v1047_v59  ;;  %v1111_v62 = vld [vmem:[%s1967_s3 + $0xac] sm:$0xf0]  ;;  %v1109_v63 = vld [vmem:[%s1967_s3 + $0xa4] sm:$0xf] }
   0x9   :  { %396 = vmatpush.bf16.msra.mxu0 %v1038_v52  ;;  %v1022_v0 = vor.u32 %v1111_v62, %v1021_v61  ;;  %v1023_v1 = vld [vmem:[%s1967_s3 + $0xb0] sm:$0xf0]  ;;  %v1029_v2 = vld [vmem:[%s1967_s3 + $0xa8] sm:$0xf]  ;;  %v1110_v6 = vld [vmem:[%s1967_s3 + $0xac] sm:$0xf] }
   0xa   :  { %v48_v12 = vsub.f32 1.0, %v47_v11  ;;  %419 = vmatpush.bf16.msra.mxu1 %v1042_v56  ;;  %442 = vmatpush.bf16.msra.mxu2 %v1046_v57  ;;  %v1005_v9 = vld [vmem:[%s1967_s3 + $0x80] sm:$0xf]  ;;  %v1105_v11 = vld [vmem:[%s1967_s3 + $0x84] sm:$0xf] }
   0xb   :  { %465 = vmatpush.bf16.msra.mxu3 %v1050_v60  ;;  %v1102_v40 = vld [vmem:[%s1967_s3 + $0x6c] sm:$0xf]  ;;  %v999_v41 = vld [vmem:[%s1967_s3 + $0x78] sm:$0xf0]  ;;  %v973_v45 = vld [vmem:[%s1967_s3 + $0x40] sm:$0xf] }
   0xc   :  { %40 = vadd.xlane.f32.xlu1 %v1128_v7  ;;  %36 = vadd.xlane.f32.xlu0 %v1124_v8  ;;  %v49_v13 = vmul.f32 %v1145_v10, %v48_v12  ;;  %v1002_v42 = vor.u32 %v1102_v40, %v999_v41  ;;  %v1099_v46 = vld [vmem:[%s1967_s3 + $0x4c] sm:$0xf0]  ;;  %v1097_v47 = vld [vmem:[%s1967_s3 + $0x44] sm:$0xf]  ;;  %v975_v48 = vld [vmem:[%s1967_s3 + $0x50] sm:$0xf0] }
   0xd   :  { %397 = vmatpush.bf16.msra.mxu0 %v1022_v0  ;;  %v974_v49 = vor.u32 %v1099_v46, %v973_v45  ;;  %v981_v50 = vld [vmem:[%s1967_s3 + $0x48] sm:$0xf]  ;;  %v1100_v51 = vld [vmem:[%s1967_s3 + $0x54] sm:$0xf0]  ;;  %v1098_v52 = vld [vmem:[%s1967_s3 + $0x4c] sm:$0xf]  ;;  %v978_v53 = vor.u32 %v1097_v47, %v975_v48 }
   0xe   :  { %v50_v14 = vadd.f32 %v1145_v10, %v49_v13  ;;  %v1007_v13 = vld [vmem:[%s1967_s3 + $0x90] sm:$0xf0]  ;;  %v982_v54 = vor.u32 %v1100_v51, %v981_v50  ;;  %v983_v55 = vld [vmem:[%s1967_s3 + $0x58] sm:$0xf0]  ;;  %v957_v57 = vld [vmem:[%s1967_s3 + $0x20] sm:$0xf] }
   0xf   :  { %v986_v56 = vor.u32 %v1098_v52, %v983_v55  ;;  %v1095_v58 = vld [vmem:[%s1967_s3 + $0x2c] sm:$0xf0]  ;;  %v1093_v59 = vld [vmem:[%s1967_s3 + $0x24] sm:$0xf]  ;;  %v965_v0 = vld [vmem:[%s1967_s3 + $0x28] sm:$0xf] }
  0x10   :  { %v1277_v15 = vsel %vm51_vm1, %v1145_v10, %v50_v14  ;;  %v1107_v10 = vld [vmem:[%s1967_s3 + $0x8c] sm:$0xf0]  ;;  %v1013_v14 = vld [vmem:[%s1967_s3 + $0x88] sm:$0xf]  ;;  %v958_v62 = vor.u32 %v1095_v58, %v957_v57  ;;  %v1142_v57 = vld [vmem:[%s1965_s1] ss:$0 sm:$0xff] }
  0x11   :  { %v1006_v12 = vor.u32 %v1107_v10, %v1005_v9 }
  0x13   :  { %398 = vmatpush.bf16.msra.mxu0 %v1006_v12  ;;  %v941_v12 = vld [vmem:[%s1967_s3] sm:$0xf] }
  0x77   :  { %v39_v16 = vpop.xlane.xlu1 %38  ;;  %v35_v17 = vpop.xlane.xlu0 %34 }
  0x78   :  { %v55_v18 = vmul.f32 %v1277_v15, %v39_v16  ;;  %v53_v19 = vmul.f32 %v1277_v15, %v35_v17  ;;  %v45_v24 = vpop.xlane.xlu2 %44  ;;  %v1108_v16 = vld [vmem:[%s1967_s3 + $0x94] sm:$0xf0]  ;;  %v1010_v17 = vor.u32 %v1105_v11, %v1007_v13 }
  0x79   :  { %v57_v27 = vmul.f32 %v1277_v15, %v45_v24  ;;  %v989_v24 = vld [vmem:[%s1967_s3 + $0x60] sm:$0xf] }
  0x7a   :  { %v1281_v20 = vsub.f32 %v1127_v3, %v55_v18  ;;  %v1283_v21 = vsub.f32 %v1123_v4, %v53_v19  ;;  %v1112_v3 = vld [vmem:[%s1967_s3 + $0xb4] sm:$0xf0]  ;;  %v1026_v4 = vor.u32 %v1109_v63, %v1023_v1  ;;  %v1014_v18 = vor.u32 %v1108_v16, %v1013_v14  ;;  %v1106_v19 = vld [vmem:[%s1967_s3 + $0x8c] sm:$0xf]  ;;  %v959_v63 = vld [vmem:[%s1967_s3 + $0x30] sm:$0xf0] }
  0x7b   :  { %v1296_v32 = vsub.f32 %v33_v5, %v57_v27  ;;  %v1030_v5 = vor.u32 %v1112_v3, %v1029_v2  ;;  %v1096_v1 = vld [vmem:[%s1967_s3 + $0x34] sm:$0xf0]  ;;  %v1091_v16 = vld [vmem:[%s1967_s3 + $0xc] sm:$0xf0] }
  0x7c   :  { %v65_v22 = vmul.f32 %v1281_v20, %v1281_v20  ;;  %v63_v23 = vmul.f32 %v1283_v21, %v1283_v21  ;;  %420 = vmatpush.bf16.msra.mxu1 %v1026_v4  ;;  %v962_v4 = vor.u32 %v1093_v59, %v959_v63 }
  0x7d   :  { %v67_v35 = vmul.f32 %v1296_v32, %v1296_v32  ;;  %443 = vmatpush.bf16.msra.mxu2 %v1030_v5  ;;  %v966_v5 = vor.u32 %v1096_v1, %v965_v0  ;;  %v1143_v1 = vld [vmem:[%s1966_s2] ss:$0 sm:$0xff] }
  0x7e   :  { %72 = vadd.xlane.f32.xlu1 %v65_v22  ;;  %68 = vadd.xlane.f32.xlu2 %v63_v23  ;;  %v1015_v22 = vld [vmem:[%s1967_s3 + $0x98] sm:$0xf0] }
  0x7f   :  { %v41_v25 = vpop.xlane.xlu1 %40  ;;  %v37_v26 = vpop.xlane.xlu0 %36  ;;  %v76_v36 = vsel %vm42_vm0, %v67_v35, 0.0  ;;  %v1018_v23 = vor.u32 %v1106_v19, %v1015_v22  ;;  %v1104_v35 = vld [vmem:[%s1967_s3 + $0x74] sm:$0xf0]  ;;  %v949_v22 = vld [vmem:[%s1967_s3 + $0x8] sm:$0xf] }
  0x80   :  { %v56_v28 = vmul.f32 %v1277_v15, %v41_v25  ;;  %v54_v29 = vmul.f32 %v1277_v15, %v37_v26  ;;  %421 = vmatpush.bf16.msra.mxu1 %v1010_v17  ;;  %v1103_v25 = vld [vmem:[%s1967_s3 + $0x6c] sm:$0xf0]  ;;  %v1101_v26 = vld [vmem:[%s1967_s3 + $0x64] sm:$0xf] }
  0x81   :  { %444 = vmatpush.bf16.msra.mxu2 %v1014_v18  ;;  %v1089_v17 = vld [vmem:[%s1967_s3 + $0x4] sm:$0xf]  ;;  %v943_v18 = vld [vmem:[%s1967_s3 + $0x10] sm:$0xf0] }
  0x82   :  { %v1292_v30 = vsub.f32 %v1128_v7, %v56_v28  ;;  %v1294_v31 = vsub.f32 %v1124_v8, %v54_v29  ;;  %v1031_v7 = vld [vmem:[%s1967_s3 + $0xb8] sm:$0xf0]  ;;  %v990_v29 = vor.u32 %v1103_v25, %v989_v24  ;;  %v942_v25 = vor.u32 %v1091_v16, %v941_v12 }
  0x83   :  { %v1034_v8 = vor.u32 %v1110_v6, %v1031_v7  ;;  %v1094_v6 = vld [vmem:[%s1967_s3 + $0x2c] sm:$0xf]  ;;  %v967_v7 = vld [vmem:[%s1967_s3 + $0x38] sm:$0xf0] }
  0x84   :  { %v66_v33 = vmul.f32 %v1292_v30, %v1292_v30  ;;  %v64_v34 = vmul.f32 %v1294_v31, %v1294_v31  ;;  %399 = vmatpush.bf16.msra.mxu0 %v990_v29  ;;  %v946_v29 = vor.u32 %v1089_v17, %v943_v18 }
  0x85   :  { %466 = vmatpush.bf16.msra.mxu3 %v1034_v8  ;;  %v970_v8 = vor.u32 %v1094_v6, %v967_v7 }
  0x86   :  { %74 = vadd.xlane.f32.xlu2 %v66_v33  ;;  %70 = vadd.xlane.f32.xlu0 %v64_v34  ;;  %v991_v33 = vld [vmem:[%s1967_s3 + $0x70] sm:$0xf0]  ;;  %v997_v34 = vld [vmem:[%s1967_s3 + $0x68] sm:$0xf] }
  0x87   :  { %v994_v38 = vor.u32 %v1101_v26, %v991_v33  ;;  %v998_v39 = vor.u32 %v1104_v35, %v997_v34  ;;  %v1090_v26 = vld [vmem:[%s1967_s3 + $0xc] sm:$0xf] }
  0x88   :  { %400 = vmatpush.bf16.msra.mxu0 %v974_v49 }
  0x89   :  { %467 = vmatpush.bf16.msra.mxu3 %v1018_v23  ;;  %422 = vmatpush.bf16.msra.mxu1 %v994_v38  ;;  %v1092_v23 = vld [vmem:[%s1967_s3 + $0x14] sm:$0xf0] }
  0x8a   :  { %445 = vmatpush.bf16.msra.mxu2 %v998_v39  ;;  %v950_v33 = vor.u32 %v1092_v23, %v949_v22 }
  0x8c   :  { %401 = vmatpush.bf16.msra.mxu0 %v958_v62 }
  0x8d   :  { %468 = vmatpush.bf16.msra.mxu3 %v1002_v42  ;;  %423 = vmatpush.bf16.msra.mxu1 %v978_v53 }
  0x8e   :  { %77 = vadd.xlane.f32.xlu0 %v76_v36  ;;  %446 = vmatpush.bf16.msra.mxu2 %v982_v54 }
  0x90   :  { %402 = vmatpush.bf16.msra.mxu0 %v942_v25 }
  0x91   :  { %469 = vmatpush.bf16.msra.mxu3 %v986_v56  ;;  %424 = vmatpush.bf16.msra.mxu1 %v962_v4 }
  0x92   :  { %447 = vmatpush.bf16.msra.mxu2 %v966_v5 }
  0x95   :  { %470 = vmatpush.bf16.msra.mxu3 %v970_v8  ;;  %425 = vmatpush.bf16.msra.mxu1 %v946_v29 }
  0x96   :  { %448 = vmatpush.bf16.msra.mxu2 %v950_v33 }
  0xf1   :  { %v73_v27 = vpop.xlane.xlu1 %72  ;;  %v69_v28 = vpop.xlane.xlu2 %68 }
  0xf2   :  { %v81_v36 = vmul.f32 %v73_v27, %v1277_v15  ;;  %v79_v37 = vmul.f32 %v69_v28, %v1277_v15  ;;  %v951_v27 = vld [vmem:[%s1967_s3 + $0x18] sm:$0xf0] }
  0xf3   :  { %v954_v34 = vor.u32 %v1090_v26, %v951_v27 }
  0xf4   :  { %v1427_v43 = vadd.f32 1e-05, %v81_v36  ;;  %v1429_v44 = vadd.f32 1e-05, %v79_v37 }
  0xf5   :  { %471 = vmatpush.bf16.msra.mxu3 %v954_v34 }
  0xf6   :  { %1146 = vrsqrt.f32 %v1427_v43  ;;  %vm115_vm2 = vweird.f32 %v1427_v43  ;;  %vm95_vm6 = vweird.f32 %v1429_v44 }
  0xf7   :  { %1148 = vrsqrt.f32 %v1429_v44 }
  0xf9   :  { %v75_v60 = vpop.xlane.xlu2 %74  ;;  %v71_v61 = vpop.xlane.xlu0 %70 }
  0xfa   :  { %v82_v2 = vmul.f32 %v75_v60, %v1277_v15  ;;  %v80_v3 = vmul.f32 %v71_v61, %v1277_v15 }
  0xfc   :  { %v1147_v9 = vpop.eup %1146  ;;  %v87_v10 = vadd.f32 1e-05, %v82_v2  ;;  %v1483_v11 = vadd.f32 1e-05, %v80_v3 }
  0xfd   :  { %v1149_v13 = vpop.eup %1148  ;;  %v110_v14 = vmul.f32 %v1147_v9, %v1427_v43  ;;  %vm116_vm3 = vweird.f32 %v1147_v9 }
  0xfe   :  { %v90_v19 = vmul.f32 %v1149_v13, %v1429_v44  ;;  %1150 = vrsqrt.f32 %v87_v10  ;;  %vm1514_vm4 = vmor %vm115_vm2, %vm116_vm3  ;;  %vm96_vm5 = vweird.f32 %v1149_v13  ;;  %vm125_vm8 = vweird.f32 %v87_v10 }
  0xff   :  { %v111_v24 = vmul.f32 %v1147_v9, %v110_v14  ;;  %1152 = vrsqrt.f32 %v1483_v11  ;;  %vm97_vm7 = vmor %vm95_vm6, %vm96_vm5  ;;  %vm105_vm12 = vweird.f32 %v1483_v11 }
 0x100   :  { %v91_v28 = vmul.f32 %v1149_v13, %v90_v19 }
 0x101   :  { %v112_v35 = vmul.f32 0.5, %v111_v24  ;;  %v78_v36 = vpop.xlane.xlu0 %77 }
 0x102   :  { %v92_v37 = vmul.f32 0.5, %v91_v28  ;;  %v83_v38 = vmul.f32 %v78_v36, %v1277_v15 }
 0x103   :  { %v113_v39 = vsub.f32 1.5, %v112_v35 }
 0x104   :  { %v1151_v40 = vpop.eup %1150  ;;  %v93_v41 = vsub.f32 1.5, %v92_v37  ;;  %v88_v42 = vadd.f32 1e-05, %v83_v38 }
 0x105   :  { %v1153_v45 = vpop.eup %1152  ;;  %v114_v46 = vmul.f32 %v1147_v9, %v113_v39  ;;  %v120_v47 = vmul.f32 %v1151_v40, %v87_v10  ;;  %vm126_vm9 = vweird.f32 %v1151_v40 }
 0x106   :  { %v94_v49 = vmul.f32 %v1149_v13, %v93_v41  ;;  %v100_v15 = vmul.f32 %v1153_v45, %v1483_v11  ;;  %1154 = vrsqrt.f32 %v88_v42  ;;  %vm127_vm10 = vmor %vm125_vm8, %vm126_vm9  ;;  %vm106_vm11 = vweird.f32 %v1153_v45 }
 0x107   :  { %v121_v50 = vmul.f32 %v1151_v40, %v120_v47  ;;  %v118_v51 = vsel %vm1514_vm4, %v1147_v9, %v114_v46  ;;  %vm107_vm13 = vmor %vm105_vm12, %vm106_vm11  ;;  %vm135_vm14 = vweird.f32 %v88_v42 }
 0x108   :  { %v101_v43 = vmul.f32 %v1153_v45, %v100_v15  ;;  %v98_v53 = vsel %vm97_vm7, %v1149_v13, %v94_v49  ;;  %v141_v58 = vmul.f32 %v118_v51, %v1281_v20 }
 0x109   :  { %v122_v52 = vmul.f32 0.5, %v121_v50  ;;  %v139_v59 = vmul.f32 %v98_v53, %v1283_v21 }
 0x10a   :  { %v102_v54 = vmul.f32 0.5, %v101_v43  ;;  %v150_v2 = vmul.f32 %v1142_v57, %v141_v58 }
 0x10b   :  { %v123_v55 = vsub.f32 1.5, %v122_v52  ;;  %v148_v4 = vmul.f32 %v1142_v57, %v139_v59 }
 0x10c   :  { %v1155_v56 = vpop.eup %1154  ;;  %v103_v44 = vsub.f32 1.5, %v102_v54  ;;  %v159_v9 = vadd.f32 %v1143_v1, %v150_v2 }
 0x10d   :  { %v124_v60 = vmul.f32 %v1151_v40, %v123_v55  ;;  %v130_v61 = vmul.f32 %v1155_v56, %v88_v42  ;;  %vm136_vm15 = vweird.f32 %v1155_v56  ;;  %v157_v11 = vadd.f32 %v1143_v1, %v148_v4 }
 0x10e   :  { %v104_v62 = vmul.f32 %v1153_v45, %v103_v44  ;;  %vm137_vm0 = vmor %vm135_vm14, %vm136_vm15 }
 0x10f   :  { %v128_v63 = vsel %vm127_vm10, %v1151_v40, %v124_v60  ;;  %v131_v0 = vmul.f32 %v1155_v56, %v130_v61 }
 0x110   :  { %v142_v20 = vmul.f32 %v128_v63, %v1292_v30  ;;  %v108_v3 = vsel %vm107_vm13, %v1153_v45, %v104_v62 }
 0x111   :  { %v140_v21 = vmul.f32 %v108_v3, %v1294_v31  ;;  %v132_v5 = vmul.f32 0.5, %v131_v0 }
 0x112   :  { %v151_v6 = vmul.f32 %v1142_v57, %v142_v20 }
 0x113   :  { %v149_v7 = vmul.f32 %v1142_v57, %v140_v21  ;;  %v133_v8 = vsub.f32 1.5, %v132_v5 }
 0x114   :  { %v160_v10 = vadd.f32 %v1143_v1, %v151_v6 }
 0x115   :  { %v158_v12 = vadd.f32 %v1143_v1, %v149_v7  ;;  %v134_v13 = vmul.f32 %v1155_v56, %v133_v8 }
 0x116   :  { %v1137_v14 = vpack.c.bf16 %v160_v10, %v159_v9 }
 0x117   :  { %v1132_v16 = vpack.c.bf16 %v158_v12, %v157_v11  ;;  %v138_v17 = vsel %vm137_vm0, %v1155_v56, %v134_v13 }
 0x118   :  { %1140 = vst [vmem:[#allocation2 + $0x8] sm:$0xff] %v1137_v14   ;;  %v143_v30 = vmul.f32 %v138_v17, %v1296_v32  ;;  %v209_v32 = vld [vmem:[%s1968_s4] sm:$0xf] }
 0x119   :  { %1133 = vst [vmem:[#allocation2] sm:$0xff] %v1132_v16   ;;  %v1537_v27 = vperm.slane %v209_v32, 0  ;;  %v1539_v28 = vperm.slane %v209_v32, 1  ;;  %v1549_v38 = vperm.slane %v209_v32, 2  ;;  %v1551_v39 = vperm.slane %v209_v32, 3 }
 0x11a   :  { %v152_v18 = vmul.f32 %v1142_v57, %v143_v30 }
 0x11c   :  { %v161_v31 = vadd.f32 %v1143_v1, %v152_v18 }
 0x11e   :  { %v166_v19 = vpack.c.bf16 %v161_v31, %v161_v31 }
 0x11f   :  { %v1088_v23 = vld [vmem:[#allocation2 + $0x8] sm:$0xff] }
 0x120   :  { %171 = vst [vmem:[#allocation2 + $0x10] sm:$0x1] %v166_v19  ;;  %v1087_v22 = vld [vmem:[#allocation2] sm:$0xff] }
 0x121   :  { %403 = vmatmul.bf16.vlgmr.msra.gmra.mxu0 %v1087_v22  ;;  %426 = vmatmul.bf16.vlgmr.msra.gmra.mxu1 %v1087_v22 }
 0x122   :  { %449 = vmatmul.bf16.vlgmr.msra.gmra.mxu2 %v1087_v22  ;;  %472 = vmatmul.bf16.vlgmr.msra.gmra.mxu3 %v1087_v22 }
 0x127   :  { %v176_v24 = vld [vmem:[#allocation2 + $0x10] sm:$0x1] }
 0x128   :  { %v228_v25 = vunpack.c.l.b16 %v176_v24 }
 0x12a   :  { %v231_v26 = vpack.c.b16 %v228_v25, %v228_v25 }
 0x131   :  { %408 = vmatmul.bf16.gmra.mxu0 %v1088_v23  ;;  %431 = vmatmul.bf16.gmra.mxu1 %v1088_v23 }
 0x132   :  { %454 = vmatmul.bf16.gmra.mxu2 %v1088_v23  ;;  %477 = vmatmul.bf16.gmra.mxu3 %v1088_v23 }
 0x141   :  { %413 = vmatmul.bf16.gmra.mxu0 %v231_v26  ;;  %436 = vmatmul.bf16.gmra.mxu1 %v231_v26 }
 0x142   :  { %459 = vmatmul.bf16.gmra.mxu2 %v231_v26  ;;  %482 = vmatmul.bf16.gmra.mxu3 %v231_v26 }
 0x19e   :  { %v404_v29 = vpop.f32.mrf.mxu0  ;;  %v427_v33 = vpop.f32.mrf.mxu1 }
 0x19f   :  { %v1542_v34 = vadd.f32 %v404_v29, %v1537_v27  ;;  %v1545_v35 = vadd.f32 %v427_v33, %v1539_v28 }
 0x1a1   :  { %v1067_v36 = vmul.f32 -1.702, %v1542_v34  ;;  %v1068_v37 = vmul.f32 -1.702, %v1545_v35 }
 0x1a3   :  { %v527_v40 = vmul.f32 1.442695, %v1067_v36  ;;  %v529_v41 = vmul.f32 1.442695, %v1068_v37 }
 0x1a5   :  { %1156 = vpow2.f32 %v527_v40  ;;  %v450_v42 = vpop.f32.mrf.mxu2  ;;  %v473_v45 = vpop.f32.mrf.mxu3 }
 0x1a6   :  { %1158 = vpow2.f32 %v529_v41  ;;  %v1554_v46 = vadd.f32 %v450_v42, %v1549_v38  ;;  %v1557_v47 = vadd.f32 %v473_v45, %v1551_v39  ;;  %v406_v48 = vpop.f32.mrf.mxu0  ;;  %v429_v49 = vpop.f32.mrf.mxu1 }
 0x1a7   :  { %v1560_v15 = vadd.f32 %v406_v48, %v1537_v27  ;;  %v1563_v50 = vadd.f32 %v429_v49, %v1539_v28 }
 0x1a8   :  { %v1069_v43 = vmul.f32 -1.702, %v1554_v46  ;;  %v1070_v51 = vmul.f32 -1.702, %v1557_v47 }
 0x1a9   :  { %v1071_v52 = vmul.f32 -1.702, %v1560_v15  ;;  %v1072_v53 = vmul.f32 -1.702, %v1563_v50 }
 0x1aa   :  { %v531_v54 = vmul.f32 1.442695, %v1069_v43  ;;  %v533_v55 = vmul.f32 1.442695, %v1070_v51 }
 0x1ab   :  { %v1157_v56 = vpop.eup %1156  ;;  %v535_v44 = vmul.f32 1.442695, %v1071_v52  ;;  %v537_v60 = vmul.f32 1.442695, %v1072_v53 }
 0x1ac   :  { %v1159_v57 = vpop.eup %1158  ;;  %v567_v58 = vadd.f32 1.0, %v1157_v56  ;;  %1160 = vpow2.f32 %v531_v54 }
 0x1ad   :  { %v1569_v59 = vadd.f32 1.0, %v1159_v57  ;;  %1162 = vpow2.f32 %v533_v55  ;;  %v452_v61 = vpop.f32.mrf.mxu2  ;;  %v475_v0 = vpop.f32.mrf.mxu3 }
 0x1ae   :  { %1164 = vrcp.f32 %v567_v58  ;;  %v409_v62 = vpop.f32.mrf.mxu0  ;;  %v1573_v63 = vadd.f32 %v452_v61, %v1549_v38  ;;  %v596_v1 = vand.u32 2147483647, %v567_v58  ;;  %v598_v2 = vand.u32 2147483648, %v567_v58  ;;  %v432_v11 = vpop.f32.mrf.mxu1 }
 0x1af   :  { %1166 = vrcp.f32 %v1569_v59  ;;  %v611_v3 = vand.u32 2147483647, %v1569_v59  ;;  %v613_v4 = vand.u32 2147483648, %v1569_v59  ;;  %v1581_v7 = vadd.f32 %v475_v0, %v1551_v39 }
 0x1b0   :  { %1168 = vpow2.f32 %v535_v44  ;;  %v1073_v21 = vmul.f32 -1.702, %v1573_v63  ;;  %vm592_vm1 = vweird.f32 %v567_v58  ;;  %vm607_vm2 = vweird.f32 %v1569_v59 }
 0x1b1   :  { %1170 = vpow2.f32 %v537_v60  ;;  %v1587_v10 = vadd.f32 %v409_v62, %v1537_v27  ;;  %vm1589_vm3 = vcmp.eq.f32.partialorder %v596_v1, 8.507059e+37  ;;  %v599_v16 = vor.u32 1.1754944e-38, %v598_v2 }
 0x1b2   :  { %v1161_v20 = vpop.eup %1160  ;;  %vm1595_vm4 = vcmp.eq.f32.partialorder %v611_v3, 8.507059e+37  ;;  %v614_v31 = vor.u32 1.1754944e-38, %v613_v4  ;;  %v539_v19 = vmul.f32 1.442695, %v1073_v21  ;;  %v1074_v24 = vmul.f32 -1.702, %v1581_v7 }
 0x1b3   :  { %v1163_v5 = vpop.eup %1162  ;;  %v1578_v6 = vadd.f32 1.0, %v1161_v20  ;;  %v1602_v25 = vadd.f32 %v432_v11, %v1539_v28  ;;  %v1075_v29 = vmul.f32 -1.702, %v1587_v10 }
 0x1b4   :  { %v1165_v8 = vpop.eup %1164  ;;  %v1584_v9 = vadd.f32 1.0, %v1163_v5  ;;  %v541_v57 = vmul.f32 1.442695, %v1074_v24 }
 0x1b5   :  { %v1167_v12 = vpop.eup %1166  ;;  %v588_v13 = vmul.f32 %v1165_v8, %v567_v58  ;;  %1172 = vrcp.f32 %v1578_v6  ;;  %vm593_vm5 = vweird.f32 %v1165_v8  ;;  %v626_v32 = vand.u32 2147483647, %v1578_v6  ;;  %v455_v21 = vpop.f32.mrf.mxu2 }
 0x1b6   :  { %v1169_v17 = vpop.eup %1168  ;;  %v603_v30 = vmul.f32 %v1167_v12, %v1569_v59  ;;  %1174 = vrcp.f32 %v1584_v9  ;;  %v628_v36 = vand.u32 2147483648, %v1578_v6  ;;  %v1611_v41 = vpop.f32.mrf.mxu0  ;;  %vm608_vm6 = vweird.f32 %v1167_v12  ;;  %vm594_vm8 = vmor %vm592_vm1, %vm593_vm5 }
 0x1b7   :  { %v1171_v22 = vpop.eup %1170  ;;  %v589_v23 = vsub.f32 1.0, %v588_v13  ;;  %v1607_v37 = vadd.f32 1.0, %v1169_v17  ;;  %vm622_vm7 = vweird.f32 %v1578_v6  ;;  %1176 = vpow2.f32 %v539_v19  ;;  %vm609_vm11 = vmor %vm607_vm2, %vm608_vm6  ;;  %v478_v5 = vpop.f32.mrf.mxu3 }
 0x1b8   :  { %v604_v26 = vsub.f32 1.0, %v603_v30  ;;  %v1609_v40 = vadd.f32 1.0, %v1171_v22  ;;  %v641_v49 = vand.u32 2147483647, %v1584_v9  ;;  %v643_v43 = vand.u32 2147483648, %v1584_v9  ;;  %v1644_v17 = vpop.f32.mrf.mxu1 }
 0x1b9   :  { %v590_v33 = vmul.f32 %v1165_v8, %v589_v23  ;;  %1178 = vrcp.f32 %v1607_v37  ;;  %vm1620_vm9 = vcmp.eq.f32.partialorder %v626_v32, 8.507059e+37  ;;  %vm637_vm10 = vweird.f32 %v1584_v9 }
 0x1ba   :  { %v605_v42 = vmul.f32 %v1167_v12, %v604_v26  ;;  %v629_v56 = vor.u32 1.1754944e-38, %v628_v36  ;;  %1180 = vrcp.f32 %v1609_v40  ;;  %vm1635_vm12 = vcmp.eq.f32.partialorder %v641_v49, 8.507059e+37 }
 0x1bb   :  { %v1173_v45 = vpop.eup %1172  ;;  %v591_v48 = vadd.f32 %v1165_v8, %v590_v33  ;;  %v644_v59 = vor.u32 1.1754944e-38, %v643_v43  ;;  %1182 = vpow2.f32 %v541_v57  ;;  %vm652_vm0 = vweird.f32 %v1607_v37 }
 0x1bc   :  { %v606_v51 = vadd.f32 %v1167_v12, %v605_v42  ;;  %v618_v52 = vmul.f32 %v1173_v45, %v1578_v6  ;;  %v1175_v54 = vpop.eup %1174  ;;  %vm623_vm13 = vweird.f32 %v1173_v45  ;;  %v658_v30 = vand.u32 2147483648, %v1607_v37 }
 0x1bd   :  { %v595_v55 = vsel %vm594_vm8, %v1165_v8, %v591_v48  ;;  %v633_v61 = vmul.f32 %v1175_v54, %v1584_v9  ;;  %v1177_v2 = vpop.eup %1176  ;;  %vm638_vm14 = vweird.f32 %v1175_v54  ;;  %vm624_vm15 = vmor %vm622_vm7, %vm623_vm13  ;;  %v543_v18 = vmul.f32 1.442695, %v1075_v29 }
 0x1be   :  { %v600_v58 = vsel %vm1589_vm3, %v599_v16, %v595_v55  ;;  %v610_v44 = vsel %vm609_vm11, %v1167_v12, %v606_v51  ;;  %v619_v60 = vsub.f32 1.0, %v618_v52  ;;  %v1641_v11 = vadd.f32 1.0, %v1177_v2  ;;  %vm639_vm1 = vmor %vm637_vm10, %vm638_vm14 }
 0x1bf   :  { %v887_v62 = vmul.f32 %v600_v58, %v1542_v34  ;;  %v615_v0 = vsel %vm1595_vm4, %v614_v31, %v610_v44  ;;  %v634_v4 = vsub.f32 1.0, %v633_v61  ;;  %v1179_v8 = vpop.eup %1178  ;;  %v656_v34 = vand.u32 2147483647, %v1607_v37  ;;  %v1652_v31 = vpop.f32.mrf.mxu0 }
 0x1c0   :  { %v888_v20 = vmul.f32 %v615_v0, %v1545_v35  ;;  %v620_v3 = vmul.f32 %v1173_v45, %v619_v60  ;;  %v648_v16 = vmul.f32 %v1179_v8, %v1607_v37  ;;  %v1181_v35 = vpop.eup %1180  ;;  %1184 = vrcp.f32 %v1641_v11  ;;  %v1687_v44 = vpop.f32.mrf.mxu2 }
 0x1c1   :  { %v635_v14 = vmul.f32 %v1175_v54, %v634_v4  ;;  %v663_v24 = vmul.f32 %v1181_v35, %v1609_v40  ;;  %vm653_vm2 = vweird.f32 %v1179_v8  ;;  %vm1663_vm3 = vcmp.eq.f32.partialorder %v656_v34, 8.507059e+37  ;;  %v1689_v60 = vpop.f32.mrf.mxu3  ;;  %v1702_v2 = vpop.f32.mrf.mxu1 }
 0x1c2   :  { %v907_v12 = vpack.c.bf16 %v888_v20, %v887_v62  ;;  %v621_v13 = vadd.f32 %v1173_v45, %v620_v3  ;;  %v649_v23 = vsub.f32 1.0, %v648_v16  ;;  %v671_v32 = vand.u32 2147483647, %v1609_v40  ;;  %vm654_vm5 = vmor %vm652_vm0, %vm653_vm2 }
 0x1c3   :  { %v636_v22 = vadd.f32 %v1175_v54, %v635_v14  ;;  %v664_v42 = vsub.f32 1.0, %v663_v24  ;;  %vm668_vm4 = vweird.f32 %v1181_v35  ;;  %v673_v9 = vand.u32 2147483648, %v1609_v40 }
 0x1c4   :  { %917 = vst [vmem:[%s1969_s5] sm:$0xff] %v907_v12  ;;  %v625_v19 = vsel %vm624_vm15, %v1173_v45, %v621_v13  ;;  %v650_v36 = vmul.f32 %v1179_v8, %v649_v23  ;;  %v1183_v45 = vpop.eup %1182  ;;  %1186 = vpow2.f32 %v543_v18  ;;  %vm667_vm6 = vweird.f32 %v1609_v40 }
 0x1c5   :  { %v630_v6 = vsel %vm1620_vm9, %v629_v56, %v625_v19  ;;  %v640_v33 = vsel %vm639_vm1, %v1175_v54, %v636_v22  ;;  %v665_v51 = vmul.f32 %v1181_v35, %v664_v42  ;;  %v1673_v52 = vadd.f32 1.0, %v1183_v45  ;;  %vm669_vm7 = vmor %vm667_vm6, %vm668_vm4 }
 0x1c6   :  { %v889_v29 = vmul.f32 %v630_v6, %v1554_v46  ;;  %v645_v48 = vsel %vm1635_vm12, %v644_v59, %v640_v33  ;;  %v651_v43 = vadd.f32 %v1179_v8, %v650_v36  ;;  %v1675_v53 = vpop.eup %1184  ;;  %v659_v46 = vor.u32 1.1754944e-38, %v658_v30 }
 0x1c7   :  { %v890_v49 = vmul.f32 %v645_v48, %v1557_v47  ;;  %v1076_v54 = vmul.f32 -1.702, %v1602_v25  ;;  %v1683_v55 = vadd.f32 %v455_v21, %v1549_v38  ;;  %v666_v57 = vadd.f32 %v1181_v35, %v665_v51  ;;  %v416_v62 = vpop.f32.mrf.mxu0 }
 0x1c8   :  { %v655_v47 = vsel %vm654_vm5, %v1179_v8, %v651_v43  ;;  %v678_v58 = vmul.f32 %v1675_v53, %v1641_v11  ;;  %v674_v40 = vor.u32 1.1754944e-38, %v673_v9  ;;  %1188 = vrcp.f32 %v1673_v52 }
 0x1c9   :  { %v908_v56 = vpack.c.bf16 %v890_v49, %v889_v29  ;;  %v660_v37 = vsel %vm1663_vm3, %v659_v46, %v655_v47  ;;  %v1696_v61 = vadd.f32 %v478_v5, %v1551_v39  ;;  %v670_v1 = vsel %vm669_vm7, %v1181_v35, %v666_v57  ;;  %v1742_v29 = vpop.f32.mrf.mxu2  ;;  %v1744_v33 = vpop.f32.mrf.mxu3 }
 0x1ca   :  { %v891_v0 = vmul.f32 %v660_v37, %v1560_v15  ;;  %vm672_vm8 = vcmp.eq.f32.partialorder %v671_v32, 8.507059e+37  ;;  %v679_v59 = vsub.f32 1.0, %v678_v58  ;;  %v1187_v20 = vpop.eup %1186  ;;  %v545_v4 = vmul.f32 1.442695, %v1076_v54  ;;  %v439_v9 = vpop.f32.mrf.mxu1 }
 0x1cb   :  { %918 = vst [vmem:[%s1969_s5 + $0x8] sm:$0xff] %v908_v56  ;;  %v675_v3 = vsel %vm672_vm8, %v674_v40, %v670_v1  ;;  %v1077_v21 = vmul.f32 -1.702, %v1683_v55  ;;  %v686_v34 = vand.u32 2147483647, %v1641_v11  ;;  %v1708_v12 = vadd.f32 1.0, %v1187_v20 }
 0x1cc   :  { %v892_v5 = vmul.f32 %v675_v3, %v1563_v50  ;;  %v680_v8 = vmul.f32 %v1675_v53, %v679_v59  ;;  %v688_v15 = vand.u32 2147483648, %v1641_v11  ;;  %1190 = vpow2.f32 %v545_v4 }
 0x1cd   :  { %v547_v13 = vmul.f32 1.442695, %v1077_v21  ;;  %v1078_v14 = vmul.f32 -1.702, %v1696_v61  ;;  %vm683_vm9 = vweird.f32 %v1675_v53  ;;  %1192 = vrcp.f32 %v1708_v12 }
 0x1ce   :  { %v909_v16 = vpack.c.bf16 %v892_v5, %v891_v0  ;;  %v681_v35 = vadd.f32 %v1675_v53, %v680_v8  ;;  %v1189_v50 = vpop.eup %1188  ;;  %v701_v30 = vand.u32 2147483647, %v1673_v52  ;;  %v703_v18 = vand.u32 2147483648, %v1673_v52 }
 0x1cf   :  { %1194 = vpow2.f32 %v547_v13  ;;  %v549_v19 = vmul.f32 1.442695, %v1078_v14  ;;  %vm682_vm10 = vweird.f32 %v1641_v11  ;;  %v693_v22 = vmul.f32 %v1189_v50, %v1673_v52 }
 0x1d0   :  { %919 = vst [vmem:[%s1969_s5 + $0x10] sm:$0xff] %v909_v16  ;;  %v1724_v23 = vadd.f32 %v1611_v41, %v1537_v27  ;;  %vm1726_vm11 = vmor %vm682_vm10, %vm683_vm9  ;;  %vm1730_vm12 = vcmp.eq.f32.partialorder %v686_v34, 8.507059e+37  ;;  %v1740_v41 = vadd.f32 %v1644_v17, %v1539_v28  ;;  %v689_v42 = vor.u32 1.1754944e-38, %v688_v15 }
 0x1d1   :  { %1196 = vpow2.f32 %v549_v19  ;;  %v685_v26 = vsel %vm1726_vm11, %v1675_v53, %v681_v35  ;;  %v694_v11 = vsub.f32 1.0, %v693_v22  ;;  %vm697_vm13 = vweird.f32 %v1673_v52  ;;  %v462_v5 = vpop.f32.mrf.mxu2  ;;  %v485_v8 = vpop.f32.mrf.mxu3 }
 0x1d2   :  { %v1079_v32 = vmul.f32 -1.702, %v1724_v23  ;;  %v1191_v36 = vpop.eup %1190  ;;  %vm1747_vm14 = vcmp.eq.f32.partialorder %v701_v30, 8.507059e+37  ;;  %v704_v48 = vor.u32 1.1754944e-38, %v703_v18  ;;  %vm698_vm15 = vweird.f32 %v1189_v50 }
 0x1d3   :  { %v1751_v49 = vpop.eup %1192  ;;  %v695_v43 = vmul.f32 %v1189_v50, %v694_v11  ;;  %v1753_v17 = vadd.f32 1.0, %v1191_v36  ;;  %v690_v46 = vsel %vm1730_vm12, %v689_v42, %v685_v26  ;;  %vm712_vm0 = vweird.f32 %v1708_v12  ;;  %vm699_vm1 = vmor %vm697_vm13, %vm698_vm15 }
 0x1d4   :  { %v551_v51 = vmul.f32 1.442695, %v1079_v32  ;;  %v708_v54 = vmul.f32 %v1751_v49, %v1708_v12  ;;  %v716_v56 = vand.u32 2147483647, %v1708_v12  ;;  %v1080_v57 = vmul.f32 -1.702, %v1740_v41 }
 0x1d5   :  { %v1195_v53 = vpop.eup %1194  ;;  %v696_v47 = vadd.f32 %v1189_v50, %v695_v43  ;;  %1198 = vrcp.f32 %v1753_v17  ;;  %v1765_v58 = vadd.f32 %v1687_v44, %v1549_v38  ;;  %v1773_v0 = vadd.f32 %v1689_v60, %v1551_v39 }
 0x1d6   :  { %v709_v40 = vsub.f32 1.0, %v708_v54  ;;  %v1769_v62 = vadd.f32 1.0, %v1195_v53  ;;  %1200 = vpow2.f32 %v551_v51  ;;  %v893_v1 = vmul.f32 %v690_v46, %v1573_v63 }
 0x1d7   :  { %v1197_v37 = vpop.eup %1196  ;;  %v700_v59 = vsel %vm699_vm1, %v1189_v50, %v696_v47  ;;  %v718_v20 = vand.u32 2147483648, %v1708_v12  ;;  %v731_v4 = vand.u32 2147483647, %v1753_v17  ;;  %vm713_vm2 = vweird.f32 %v1751_v49 }
 0x1d8   :  { %v1777_v3 = vadd.f32 1.0, %v1197_v37  ;;  %v705_v44 = vsel %vm1747_vm14, %v704_v48, %v700_v59  ;;  %v710_v52 = vmul.f32 %v1751_v49, %v709_v40  ;;  %1202 = vrcp.f32 %v1769_v62  ;;  %vm1816_vm6 = vmor %vm712_vm0, %vm713_vm2 }
 0x1d9   :  { %v894_v21 = vmul.f32 %v705_v44, %v1581_v7  ;;  %v733_v63 = vand.u32 2147483648, %v1753_v17  ;;  %v553_v60 = vmul.f32 1.442695, %v1080_v57  ;;  %v1081_v15 = vmul.f32 -1.702, %v1765_v58 }
 0x1da   :  { %v711_v34 = vadd.f32 %v1751_v49, %v710_v52  ;;  %1204 = vrcp.f32 %v1777_v3  ;;  %v1082_v13 = vmul.f32 -1.702, %v1773_v0  ;;  %vm1791_vm3 = vcmp.eq.f32.partialorder %v716_v56, 8.507059e+37 }
 0x1db   :  { %v1199_v14 = vpop.eup %1198  ;;  %v910_v16 = vpack.c.bf16 %v894_v21, %v893_v1  ;;  %v719_v7 = vor.u32 1.1754944e-38, %v718_v20  ;;  %v1797_v50 = vadd.f32 %v1652_v31, %v1537_v27  ;;  %vm727_vm4 = vweird.f32 %v1753_v17 }
 0x1dc   :  { %v1201_v30 = vpop.eup %1200  ;;  %v723_v18 = vmul.f32 %v1199_v14, %v1753_v17  ;;  %vm1801_vm5 = vcmp.eq.f32.partialorder %v731_v4, 8.507059e+37  ;;  %v1807_v22 = vadd.f32 %v1702_v2, %v1539_v28  ;;  %v734_v31 = vor.u32 1.1754944e-38, %v733_v63 }
 0x1dd   :  { %920 = vst [vmem:[%s1969_s5 + $0x18] sm:$0xff] %v910_v16  ;;  %v746_v24 = vand.u32 2147483647, %v1769_v62  ;;  %v1821_v6 = vadd.f32 1.0, %v1201_v30  ;;  %1206 = vpow2.f32 %v553_v60  ;;  %v715_v2 = vsel %vm1816_vm6, %v1751_v49, %v711_v34 }
 0x1de   :  { %v1203_v28 = vpop.eup %1202  ;;  %v724_v26 = vsub.f32 1.0, %v723_v18  ;;  %v555_v11 = vmul.f32 1.442695, %v1081_v15  ;;  %v557_v32 = vmul.f32 1.442695, %v1082_v13  ;;  %vm742_vm7 = vweird.f32 %v1769_v62 }
 0x1df   :  { %v738_v12 = vmul.f32 %v1203_v28, %v1769_v62  ;;  %v748_v36 = vand.u32 2147483648, %v1769_v62  ;;  %1208 = vrcp.f32 %v1821_v6  ;;  %vm728_vm8 = vweird.f32 %v1199_v14 }
 0x1e0   :  { %v1205_v42 = vpop.eup %1204  ;;  %v725_v45 = vmul.f32 %v1199_v14, %v724_v26  ;;  %v761_v48 = vand.u32 2147483647, %v1777_v3  ;;  %1210 = vpow2.f32 %v555_v11  ;;  %v720_v9 = vsel %vm1791_vm3, %v719_v7, %v715_v2  ;;  %vm729_vm11 = vmor %vm727_vm4, %vm728_vm8 }
 0x1e1   :  { %v739_v49 = vsub.f32 1.0, %v738_v12  ;;  %v753_v43 = vmul.f32 %v1205_v42, %v1777_v3  ;;  %1212 = vpow2.f32 %v557_v32  ;;  %vm1834_vm9 = vcmp.eq.f32.partialorder %v746_v24, 8.507059e+37 }
 0x1e2   :  { %v726_v51 = vadd.f32 %v1199_v14, %v725_v45  ;;  %vm757_vm10 = vweird.f32 %v1777_v3  ;;  %v763_v46 = vand.u32 2147483648, %v1777_v3  ;;  %vm743_vm12 = vweird.f32 %v1203_v28 }
 0x1e3   :  { %v1207_v54 = vpop.eup %1206  ;;  %v740_v56 = vmul.f32 %v1203_v28, %v739_v49  ;;  %v749_v47 = vor.u32 1.1754944e-38, %v748_v36  ;;  %v754_v57 = vsub.f32 1.0, %v753_v43  ;;  %v895_v37 = vmul.f32 %v720_v9, %v1587_v10  ;;  %vm744_vm15 = vmor %vm742_vm7, %vm743_vm12 }
 0x1e4   :  { %v730_v40 = vsel %vm729_vm11, %v1199_v14, %v726_v51  ;;  %vm1843_vm13 = vcmp.eq.f32.partialorder %v761_v48, 8.507059e+37  ;;  %v1847_v59 = vadd.f32 1.0, %v1207_v54  ;;  %vm758_vm14 = vweird.f32 %v1205_v42 }
 0x1e5   :  { %v1849_v20 = vpop.eup %1208  ;;  %v735_v44 = vsel %vm1801_vm5, %v734_v31, %v730_v40  ;;  %v741_v17 = vadd.f32 %v1203_v28, %v740_v56  ;;  %v755_v52 = vmul.f32 %v1205_v42, %v754_v57  ;;  %v764_v10 = vor.u32 1.1754944e-38, %v763_v46  ;;  %vm759_vm0 = vmor %vm757_vm10, %vm758_vm14 }
 0x1e6   :  { %v1211_v4 = vpop.eup %1210  ;;  %v896_v21 = vmul.f32 %v735_v44, %v1602_v25  ;;  %v768_v63 = vmul.f32 %v1849_v20, %v1821_v6  ;;  %1214 = vrcp.f32 %v1847_v59  ;;  %v776_v34 = vand.u32 2147483647, %v1821_v6 }
 0x1e7   :  { %v1213_v60 = vpop.eup %1212  ;;  %v745_v5 = vsel %vm744_vm15, %v1203_v28, %v741_v17  ;;  %v756_v8 = vadd.f32 %v1205_v42, %v755_v52  ;;  %v1083_v15 = vmul.f32 -1.702, %v1797_v50  ;;  %v1084_v14 = vmul.f32 -1.702, %v1807_v22 }
 0x1e8   :  { %v911_v13 = vpack.c.bf16 %v896_v21, %v895_v37  ;;  %v750_v25 = vsel %vm1834_vm9, %v749_v47, %v745_v5  ;;  %v769_v62 = vsub.f32 1.0, %v768_v63  ;;  %v778_v7 = vand.u32 2147483648, %v1821_v6 }
 0x1e9   :  { %v897_v16 = vmul.f32 %v750_v25, %v1683_v55  ;;  %v760_v35 = vsel %vm759_vm0, %v1205_v42, %v756_v8  ;;  %v1868_v30 = vadd.f32 1.0, %v1211_v4  ;;  %v1876_v19 = vadd.f32 1.0, %v1213_v60 }
 0x1ea   :  { %921 = vst [vmem:[%s1969_s5 + $0x20] sm:$0xff] %v911_v13  ;;  %v765_v18 = vsel %vm1843_vm13, %v764_v10, %v760_v35  ;;  %v770_v3 = vmul.f32 %v1849_v20, %v769_v62  ;;  %v1880_v27 = vadd.f32 %v1742_v29, %v1549_v38  ;;  %vm773_vm1 = vweird.f32 %v1849_v20 }
 0x1eb   :  { %v898_v55 = vmul.f32 %v765_v18, %v1696_v61  ;;  %1216 = vrcp.f32 %v1868_v30  ;;  %v559_v31 = vmul.f32 1.442695, %v1083_v15  ;;  %v791_v2 = vand.u32 2147483647, %v1847_v59 }
 0x1ec   :  { %v1215_v24 = vpop.eup %1214  ;;  %v771_v28 = vadd.f32 %v1849_v20, %v770_v3  ;;  %1218 = vrcp.f32 %v1876_v19  ;;  %v561_v26 = vmul.f32 1.442695, %v1084_v14  ;;  %vm772_vm2 = vweird.f32 %v1821_v6 }
 0x1ed   :  { %v912_v11 = vpack.c.bf16 %v898_v55, %v897_v16  ;;  %v783_v38 = vmul.f32 %v1215_v24, %v1847_v59  ;;  %v1892_v61 = vadd.f32 %v1744_v33, %v1551_v39  ;;  %vm1894_vm3 = vmor %vm772_vm2, %vm773_vm1  ;;  %vm1898_vm4 = vcmp.eq.f32.partialorder %v776_v34, 8.507059e+37 }
 0x1ee   :  { %v793_v12 = vand.u32 2147483648, %v1847_v59  ;;  %v775_v6 = vsel %vm1894_vm3, %v1849_v20, %v771_v28  ;;  %1220 = vpow2.f32 %v559_v31  ;;  %v1085_v33 = vmul.f32 -1.702, %v1880_v27 }
 0x1ef   :  { %922 = vst [vmem:[%s1969_s5 + $0x28] sm:$0xff] %v912_v11  ;;  %v784_v39 = vsub.f32 1.0, %v783_v38  ;;  %v779_v36 = vor.u32 1.1754944e-38, %v778_v7  ;;  %vm787_vm5 = vweird.f32 %v1847_v59  ;;  %vm1911_vm6 = vcmp.eq.f32.partialorder %v791_v2, 8.507059e+37 }
 0x1f0   :  { %1222 = vpow2.f32 %v561_v26  ;;  %vm788_vm7 = vweird.f32 %v1215_v24  ;;  %v563_v9 = vmul.f32 1.442695, %v1085_v33  ;;  %v1086_v49 = vmul.f32 -1.702, %v1892_v61 }
 0x1f1   :  { %v1217_v45 = vpop.eup %1216  ;;  %v785_v48 = vmul.f32 %v1215_v24, %v784_v39  ;;  %v780_v51 = vsel %vm1898_vm4, %v779_v36, %v775_v6  ;;  %v794_v53 = vor.u32 1.1754944e-38, %v793_v12  ;;  %v806_v54 = vand.u32 2147483647, %v1868_v30  ;;  %vm789_vm8 = vmor %vm787_vm5, %vm788_vm7 }
 0x1f2   :  { %v1219_v43 = vpop.eup %1218  ;;  %v798_v46 = vmul.f32 %v1217_v45, %v1868_v30  ;;  %v808_v47 = vand.u32 2147483648, %v1868_v30  ;;  %1224 = vpow2.f32 %v563_v9  ;;  %v821_v40 = vand.u32 2147483647, %v1876_v19 }
 0x1f3   :  { %v786_v56 = vadd.f32 %v1215_v24, %v785_v48  ;;  %v813_v57 = vmul.f32 %v1219_v43, %v1876_v19  ;;  %v823_v1 = vand.u32 2147483648, %v1876_v19  ;;  %v565_v20 = vmul.f32 1.442695, %v1086_v49 }
 0x1f4   :  { %v799_v37 = vsub.f32 1.0, %v798_v46  ;;  %v1221_v44 = vpop.eup %1220  ;;  %v899_v17 = vmul.f32 %v780_v51, %v1724_v23  ;;  %vm803_vm9 = vweird.f32 %v1217_v45  ;;  %vm818_vm10 = vweird.f32 %v1219_v43 }
 0x1f5   :  { %v790_v52 = vsel %vm789_vm8, %v1215_v24, %v786_v56  ;;  %v814_v4 = vsub.f32 1.0, %v813_v57  ;;  %v583_v60 = vadd.f32 1.0, %v1221_v44  ;;  %1226 = vpow2.f32 %v565_v20 }
 0x1f6   :  { %v1223_v21 = vpop.eup %1222  ;;  %v795_v10 = vsel %vm1911_vm6, %v794_v53, %v790_v52  ;;  %v800_v63 = vmul.f32 %v1217_v45, %v799_v37  ;;  %vm802_vm11 = vweird.f32 %v1868_v30  ;;  %vm817_vm12 = vweird.f32 %v1876_v19 }
 0x1f7   :  { %v900_v59 = vmul.f32 %v795_v10, %v1740_v41  ;;  %v815_v5 = vmul.f32 %v1219_v43, %v814_v4  ;;  %v584_v8 = vadd.f32 1.0, %v1223_v21  ;;  %1228 = vrcp.f32 %v583_v60  ;;  %vm804_vm13 = vmor %vm802_vm11, %vm803_vm9 }
 0x1f8   :  { %v801_v34 = vadd.f32 %v1217_v45, %v800_v63  ;;  %v1225_v23 = vpop.eup %1224  ;;  %v809_v13 = vor.u32 1.1754944e-38, %v808_v47  ;;  %vm807_vm14 = vcmp.eq.f32.partialorder %v806_v54, 8.507059e+37  ;;  %vm819_vm15 = vmor %vm817_vm12, %vm818_vm10  ;;  %v824_v41 = vor.u32 1.1754944e-38, %v823_v1 }
 0x1f9   :  { %v913_v15 = vpack.c.bf16 %v900_v59, %v899_v17  ;;  %v816_v25 = vadd.f32 %v1219_v43, %v815_v5  ;;  %1230 = vrcp.f32 %v584_v8  ;;  %vm822_vm0 = vcmp.eq.f32.partialorder %v821_v40, 8.507059e+37 }
 0x1fa   :  { %v805_v62 = vsel %vm804_vm13, %v1217_v45, %v801_v34  ;;  %v585_v18 = vadd.f32 1.0, %v1225_v23  ;;  %v836_v2 = vand.u32 2147483647, %v583_v60  ;;  %v838_v11 = vand.u32 2147483648, %v583_v60 }
 0x1fb   :  { %923 = vst [vmem:[%s1969_s5 + $0x30] sm:$0xff] %v913_v15  ;;  %v810_v14 = vsel %vm807_vm14, %v809_v13, %v805_v62  ;;  %v820_v16 = vsel %vm819_vm15, %v1219_v43, %v816_v25  ;;  %v1227_v35 = vpop.eup %1226  ;;  %v851_v29 = vand.u32 2147483647, %v584_v8  ;;  %vm832_vm2 = vweird.f32 %v583_v60 }
 0x1fc   :  { %v901_v7 = vmul.f32 %v810_v14, %v1765_v58  ;;  %v825_v30 = vsel %vm822_vm0, %v824_v41, %v820_v16  ;;  %v1938_v19 = vadd.f32 1.0, %v1227_v35  ;;  %1232 = vrcp.f32 %v585_v18 }
 0x1fd   :  { %v902_v3 = vmul.f32 %v825_v30, %v1773_v0  ;;  %v1229_v55 = vpop.eup %1228  ;;  %v853_v0 = vand.u32 2147483648, %v584_v8  ;;  %vm1944_vm3 = vcmp.eq.f32.partialorder %v836_v2, 8.507059e+37  ;;  %v839_v42 = vor.u32 1.1754944e-38, %v838_v11 }
 0x1fe   :  { %v828_v28 = vmul.f32 %v1229_v55, %v583_v60  ;;  %1234 = vrcp.f32 %v1938_v19  ;;  %vm833_vm1 = vweird.f32 %v1229_v55  ;;  %vm847_vm5 = vweird.f32 %v584_v8 }
 0x1ff   :  { %v1231_v31 = vpop.eup %1230  ;;  %v914_v24 = vpack.c.bf16 %v902_v3, %v901_v7  ;;  %vm834_vm6 = vmor %vm832_vm2, %vm833_vm1  ;;  %vm852_vm7 = vcmp.eq.f32.partialorder %v851_v29, 8.507059e+37  ;;  %v854_v9 = vor.u32 1.1754944e-38, %v853_v0  ;;  %v866_v53 = vand.u32 2147483647, %v585_v18 }
 0x200   :  { %v843_v26 = vmul.f32 %v1231_v31, %v584_v8  ;;  %v829_v58 = vsub.f32 1.0, %v828_v28  ;;  %vm848_vm4 = vweird.f32 %v1231_v31  ;;  %v868_v46 = vand.u32 2147483648, %v585_v18 }
 0x201   :  { %924 = vst [vmem:[%s1969_s5 + $0x38] sm:$0xff] %v914_v24  ;;  %vm849_vm8 = vmor %vm847_vm5, %vm848_vm4  ;;  %v883_v57 = vand.u32 2147483648, %v1938_v19  ;;  %v881_v17 = vand.u32 2147483647, %v1938_v19  ;;  %vm862_vm11 = vweird.f32 %v585_v18  ;;  %vm877_vm13 = vweird.f32 %v1938_v19 }
 0x202   :  { %v844_v38 = vsub.f32 1.0, %v843_v26  ;;  %v830_v32 = vmul.f32 %v1229_v55, %v829_v58  ;;  %v1233_v12 = vpop.eup %1232  ;;  %v869_v21 = vor.u32 1.1754944e-38, %v868_v46  ;;  %vm867_vm14 = vcmp.eq.f32.partialorder %v866_v53, 8.507059e+37 }
 0x203   :  { %v858_v45 = vmul.f32 %v1233_v12, %v585_v18  ;;  %vm863_vm9 = vweird.f32 %v1233_v12  ;;  %vm882_vm0 = vcmp.eq.f32.partialorder %v881_v17, 8.507059e+37 }
 0x204   :  { %v845_v39 = vmul.f32 %v1231_v31, %v844_v38  ;;  %v1235_v33 = vpop.eup %1234  ;;  %v831_v36 = vadd.f32 %v1229_v55, %v830_v32  ;;  %vm864_vm12 = vmor %vm862_vm11, %vm863_vm9 }
 0x205   :  { %v873_v49 = vmul.f32 %v1235_v33, %v1938_v19  ;;  %v859_v51 = vsub.f32 1.0, %v858_v45  ;;  %vm878_vm10 = vweird.f32 %v1235_v33 }
 0x206   :  { %v846_v48 = vadd.f32 %v1231_v31, %v845_v39  ;;  %v835_v43 = vsel %vm834_vm6, %v1229_v55, %v831_v36  ;;  %vm879_vm15 = vmor %vm877_vm13, %vm878_vm10 }
 0x207   :  { %v840_v54 = vsel %vm1944_vm3, %v839_v42, %v835_v43  ;;  %v874_v47 = vsub.f32 1.0, %v873_v49  ;;  %v860_v1 = vmul.f32 %v1233_v12, %v859_v51 }
 0x208   :  { %v850_v56 = vsel %vm849_vm8, %v1231_v31, %v846_v48  ;;  %v903_v37 = vmul.f32 %v840_v54, %v1797_v50  ;;  %v884_v50 = vor.u32 1.1754944e-38, %v883_v57 }
 0x209   :  { %v855_v40 = vsel %vm852_vm7, %v854_v9, %v850_v56  ;;  %v875_v44 = vmul.f32 %v1235_v33, %v874_v47  ;;  %v861_v52 = vadd.f32 %v1233_v12, %v860_v1 }
 0x20a   :  { %v904_v20 = vmul.f32 %v855_v40, %v1807_v22 }
 0x20b   :  { %v876_v10 = vadd.f32 %v1235_v33, %v875_v44  ;;  %v865_v63 = vsel %vm864_vm12, %v1233_v12, %v861_v52 }
 0x20c   :  { %v915_v4 = vpack.c.bf16 %v904_v20, %v903_v37  ;;  %v870_v22 = vsel %vm867_vm14, %v869_v21, %v865_v63 }
 0x20d   :  { %v880_v60 = vsel %vm879_vm15, %v1235_v33, %v876_v10  ;;  %v905_v59 = vmul.f32 %v870_v22, %v1880_v27 }
 0x20e   :  { %925 = vst [vmem:[%s1969_s5 + $0x40] sm:$0x11] %v915_v4  ;;  %v885_v5 = vsel %vm882_vm0, %v884_v50, %v880_v60 }
 0x20f   :  { %v906_v8 = vmul.f32 %v885_v5, %v1892_v61 }
 0x211   :  { %v916_v34 = vpack.c.bf16 %v906_v8, %v905_v59 }
 0x213   :  { %926 = vst [vmem:[%s1969_s5 + $0x48] sm:$0x11] %v916_v34 }

</bundles_post_ra>
